<compile_context>
chip_gen: v7x
topology: tpu7x:2x2x1
jax: 0.10.0
libtpu: 0.0.40
codegen_flags: <defaults>
</compile_context>

<pallas_src>
import math
import functools

import jax
import jax.numpy as jnp
from jax.experimental import pallas as pl
from jax.experimental.pallas import tpu as pltpu

EPS = 1e-5


# ----------------------- Pallas kernel -----------------------

def conv_bn_kernel(p_ref, w_ref, g_ref, b_ref, o_ref, *, inv_m, apply_relu):
    """Fused conv-as-matmul + train-mode BatchNorm + optional ReLU for one layer.

    p_ref: (M, K)  bf16 im2col patches   (M = N*Do*Ho*Wo, K = k^3 * Cin)
    w_ref: (K, Co) bf16 reshaped conv weights
    g_ref/b_ref: (1, Co) f32 BN gamma / beta
    o_ref: (M, Co) output (bf16 for hidden layers, f32 for the final layer)
    """
    # MXU contraction with f32 accumulation.
    acc = jnp.dot(p_ref[...], w_ref[...], preferred_element_type=jnp.float32)

    # Per-channel batch statistics (biased variance, like PyTorch train-mode BN).
    mean = jnp.sum(acc, axis=0, keepdims=True) * inv_m            # (1, Co)
    centered = acc - mean
    var = jnp.sum(centered * centered, axis=0, keepdims=True) * inv_m

    scale = g_ref[...] * jax.lax.rsqrt(var + EPS)                 # (1, Co)
    y = centered * scale + b_ref[...]
    if apply_relu:
        y = jnp.maximum(y, 0.0)
    o_ref[...] = y.astype(o_ref.dtype)


def fused_conv_bn(patches, w2d, gamma2d, beta2d, *, apply_relu, out_dtype):
    """One conv layer = one pallas_call. Everything fits in VMEM at these sizes
    (largest resident operands < 1 MiB), so a single grid step is optimal."""
    M, K = patches.shape
    Co = w2d.shape[1]
    kern = functools.partial(conv_bn_kernel, inv_m=1.0 / M, apply_relu=apply_relu)
    return pl.pallas_call(
        kern,
        out_shape=jax.ShapeDtypeStruct((M, Co), out_dtype),
        grid=(1,),
        in_specs=[pl.BlockSpec((M, K), lambda i: (0, 0)),
                  pl.BlockSpec((K, Co), lambda i: (0, 0)),
                  pl.BlockSpec((1, Co), lambda i: (0, 0)),
                  pl.BlockSpec((1, Co), lambda i: (0, 0))],
        out_specs=pl.BlockSpec((M, Co), lambda i: (0, 0)),
        compiler_params=pltpu.CompilerParams(
            dimension_semantics=("arbitrary",)),
    )(patches, w2d, gamma2d, beta2d)


# ----------------------- JAX glue -----------------------

def im2col_ndhwc(x, k=4, stride=2, pad=2):
    """x: (N, D, H, W, C) channels-last -> (N*Do*Ho*Wo, k^3*C).
    Feature order is (kd, kh, kw, c), matching the prepared weight layout."""
    N, D, H, W, C = x.shape
    Do = (D + 2 * pad - k) // stride + 1
    Ho = (H + 2 * pad - k) // stride + 1
    Wo = (W + 2 * pad - k) // stride + 1
    xp = jnp.pad(x, ((0, 0), (pad, pad), (pad, pad), (pad, pad), (0, 0)))
    slices = []
    for kd in range(k):
        for kh in range(k):
            for kw in range(k):
                slices.append(xp[:, kd:kd + stride * (Do - 1) + 1:stride,
                                    kh:kh + stride * (Ho - 1) + 1:stride,
                                    kw:kw + stride * (Wo - 1) + 1:stride, :])
    patches = jnp.concatenate(slices, axis=-1)          # (N, Do, Ho, Wo, k^3*C)
    return patches.reshape(N * Do * Ho * Wo, k * k * k * C), (Do, Ho, Wo)


def init_params(key, number_of_classes):
    f = 6 + 4 * 3 + 2 * 5 + 1 * 7                        # 35
    feats = [1, f, f, f, f, number_of_classes]
    params = {"conv_w": [], "bn_gamma": [], "bn_beta": []}
    for i in range(len(feats) - 1):
        key, sub = jax.random.split(key)
        std = 1.0 / math.sqrt(feats[i] * 4 * 4 * 4)
        w = jax.random.normal(sub, (feats[i + 1], feats[i], 4, 4, 4), jnp.float32) * std
        params["conv_w"].append(w)
        params["bn_gamma"].append(jnp.ones((feats[i + 1],), jnp.float32))
        params["bn_beta"].append(jnp.zeros((feats[i + 1],), jnp.float32))
    params["bn_in_gamma"] = jnp.ones((1,), jnp.float32)
    params["bn_in_beta"] = jnp.zeros((1,), jnp.float32)
    params["bn_out_gamma"] = jnp.ones((number_of_classes,), jnp.float32)
    params["bn_out_beta"] = jnp.zeros((number_of_classes,), jnp.float32)
    return params, feats


def prepare_params(params):
    """Hoist all per-forward constant work out of the forward pass:
    conv weights -> (K, Cout) bf16 matmul operands with row order (kd, kh, kw, cin);
    BN affine -> (1, Cout) f32 rows for lane-broadcast inside the kernel."""
    pp = {"w2d": [], "gamma2d": [], "beta2d": []}
    for w, g, b in zip(params["conv_w"], params["bn_gamma"], params["bn_beta"]):
        co, ci = w.shape[0], w.shape[1]
        w2d = jnp.transpose(w, (2, 3, 4, 1, 0)).reshape(64 * ci, co)
        pp["w2d"].append(w2d.astype(jnp.bfloat16))
        pp["gamma2d"].append(g.reshape(1, co))
        pp["beta2d"].append(b.reshape(1, co))
    for k in ("bn_in_gamma", "bn_in_beta", "bn_out_gamma", "bn_out_beta"):
        pp[k] = params[k]
    return pp


def cnn_forward(pp, x):
    """x: (N, 1, D, H, W) f32 -> (N, num_classes) f32.
    Matches PyTorch CNN.forward in training mode (batch statistics for every BN)."""
    N = x.shape[0]
    # Single layout change: NCDHW -> NDHWC; stay channels-last for the whole net.
    x = jnp.transpose(x, (0, 2, 3, 4, 1)).astype(jnp.float32)

    # bn_in: BatchNorm3d(1) -> scalar scale/shift; tiny, plain JAX. Cast to bf16 for the MXU.
    mean = jnp.mean(x)
    var = jnp.mean(jnp.square(x - mean))
    scale = pp["bn_in_gamma"][0] * jax.lax.rsqrt(var + EPS)
    shift = pp["bn_in_beta"][0] - mean * scale
    x = (x * scale + shift).astype(jnp.bfloat16)

    n_layers = len(pp["w2d"])
    for i in range(n_layers):
        patches, (Do, Ho, Wo) = im2col_ndhwc(x)
        last = (i == n_layers - 1)
        co = pp["w2d"][i].shape[1]
        out2d = fused_conv_bn(
            patches, pp["w2d"][i], pp["gamma2d"][i], pp["beta2d"][i],
            apply_relu=not last,
            out_dtype=jnp.float32 if last else jnp.bfloat16)
        x = out2d.reshape(N, Do, Ho, Wo, co)             # channels-last, no transpose

    # x.mean(-1).mean(-1).mean(-1): global spatial mean pool (tiny glue reduction).
    x = jnp.mean(x, axis=(1, 2, 3))                      # (N, num_classes), f32

    # bn_out: BatchNorm1d on a (N, num_classes) tensor; tiny, plain JAX.
    mean = jnp.mean(x, axis=0)
    var = jnp.mean(jnp.square(x - mean[None, :]), axis=0)
    scale = pp["bn_out_gamma"] * jax.lax.rsqrt(var + EPS)
    shift = pp["bn_out_beta"] - mean * scale
    return x * scale[None, :] + shift[None, :]


if __name__ == "__main__":
    number_of_classes = 4
    key = jax.random.PRNGKey(0)
    pkey, xkey = jax.random.split(key)
    params, feats = init_params(pkey, number_of_classes)
    prepped = prepare_params(params)

    # small input consistent with the module: [batch, 1, x, y, z]
    x = jax.random.normal(xkey, (2, 1, 8, 8, 8), jnp.float32)

    fwd = jax.jit(cnn_forward)
    out = jax.block_until_ready(fwd(prepped, x))
    assert out.shape == (2, number_of_classes)
    assert bool(jnp.all(jnp.isfinite(out)))
    print("KERNEL_OK")
</pallas_src>

<mosaic_0001>
module attributes {stable_mosaic.version = 11 : i64} {
  func.func @conv_bn_kernel(%arg0: i32, %arg1: memref<250x64xbf16, #tpu.memory_space<vmem>>, %arg2: memref<64x35xbf16, #tpu.memory_space<vmem>>, %arg3: memref<1x35xf32, #tpu.memory_space<vmem>>, %arg4: memref<1x35xf32, #tpu.memory_space<vmem>>, %arg5: memref<250x35xbf16, #tpu.memory_space<vmem>>) attributes {dimension_semantics = [#tpu.dimension_semantics<arbitrary>], iteration_bounds = array<i64: 1>, scalar_prefetch = 0 : i64, scratch_operands = 0 : i64, tpu.core_type = #tpu.core_type<tc>, window_params = [{pipeline_mode = #tpu.pipeline_mode<synchronous>, transform_indices = @transform_0, window_bounds = array<i64: 250, 64>}, {pipeline_mode = #tpu.pipeline_mode<synchronous>, transform_indices = @transform_1, window_bounds = array<i64: 64, 35>}, {pipeline_mode = #tpu.pipeline_mode<synchronous>, transform_indices = @transform_2, window_bounds = array<i64: 1, 35>}, {pipeline_mode = #tpu.pipeline_mode<synchronous>, transform_indices = @transform_3, window_bounds = array<i64: 1, 35>}, {pipeline_mode = #tpu.pipeline_mode<synchronous>, transform_indices = @transform_4, window_bounds = array<i64: 250, 35>}]} {
    %c0 = arith.constant 0 : index
    %c0_0 = arith.constant 0 : index
    %0 = vector.load %arg1[%c0, %c0_0] : memref<250x64xbf16, #tpu.memory_space<vmem>>, vector<250x64xbf16>
    %c0_1 = arith.constant 0 : index
    %c0_2 = arith.constant 0 : index
    %1 = vector.load %arg2[%c0_1, %c0_2] : memref<64x35xbf16, #tpu.memory_space<vmem>>, vector<64x35xbf16>
    %cst = arith.constant dense<0.000000e+00> : vector<250x35xf32>
    %2 = tpu.matmul %0, %1, %cst {dimension_numbers = #tpu.dot_dimension_numbers<[1], [0], [0], [1], [0, 0, 1, 1], [], []>} : vector<250x64xbf16>, vector<64x35xbf16>, vector<250x35xf32> -> vector<250x35xf32>
    %cst_3 = arith.constant dense<0.000000e+00> : vector<35xf32>
    %3 = vector.multi_reduction <add>, %2, %cst_3 [0] : vector<250x35xf32> to vector<35xf32>
    %4 = vector.shape_cast %3 : vector<35xf32> to vector<1x35xf32>
    %cst_4 = arith.constant 4.000000e-03 : f32
    %5 = vector.broadcast %cst_4 : f32 to vector<1x35xf32>
    %6 = arith.mulf %4, %5 : vector<1x35xf32>
    %7 = vector.broadcast %6 : vector<1x35xf32> to vector<250x35xf32>
    %8 = arith.subf %2, %7 : vector<250x35xf32>
    %9 = arith.mulf %8, %8 : vector<250x35xf32>
    %cst_5 = arith.constant dense<0.000000e+00> : vector<35xf32>
    %10 = vector.multi_reduction <add>, %9, %cst_5 [0] : vector<250x35xf32> to vector<35xf32>
    %11 = vector.shape_cast %10 : vector<35xf32> to vector<1x35xf32>
    %cst_6 = arith.constant 4.000000e-03 : f32
    %12 = vector.broadcast %cst_6 : f32 to vector<1x35xf32>
    %13 = arith.mulf %11, %12 : vector<1x35xf32>
    %c0_7 = arith.constant 0 : index
    %c0_8 = arith.constant 0 : index
    %14 = vector.load %arg3[%c0_7, %c0_8] : memref<1x35xf32, #tpu.memory_space<vmem>>, vector<1x35xf32>
    %cst_9 = arith.constant 9.99999974E-6 : f32
    %15 = vector.broadcast %cst_9 : f32 to vector<1x35xf32>
    %16 = arith.addf %13, %15 : vector<1x35xf32>
    %17 = math.rsqrt %16 : vector<1x35xf32>
    %18 = arith.mulf %14, %17 : vector<1x35xf32>
    %19 = vector.broadcast %18 : vector<1x35xf32> to vector<250x35xf32>
    %20 = arith.mulf %8, %19 : vector<250x35xf32>
    %c0_10 = arith.constant 0 : index
    %c0_11 = arith.constant 0 : index
    %21 = vector.load %arg4[%c0_10, %c0_11] : memref<1x35xf32, #tpu.memory_space<vmem>>, vector<1x35xf32>
    %22 = vector.broadcast %21 : vector<1x35xf32> to vector<250x35xf32>
    %23 = arith.addf %20, %22 : vector<250x35xf32>
    %cst_12 = arith.constant 0.000000e+00 : f32
    %24 = vector.broadcast %cst_12 : f32 to vector<250x35xf32>
    %25 = arith.maximumf %23, %24 : vector<250x35xf32>
    %26 = arith.truncf %25 : vector<250x35xf32> to vector<250x35xbf16>
    %c0_13 = arith.constant 0 : index
    %c0_14 = arith.constant 0 : index
    %27 = vector.load %arg5[%c0_13, %c0_14] : memref<250x35xbf16, #tpu.memory_space<vmem>>, vector<250x35xbf16>
    tpu.vector_store %arg5[%c0_13, %c0_14], %26 {strides = array<i32>} : memref<250x35xbf16, #tpu.memory_space<vmem>>, vector<250x35xbf16>,
    return
  }
  func.func @transform_0(%arg0: i32) -> (i32, i32) {
    %c0_i32 = arith.constant 0 : i32
    %c0_i32_0 = arith.constant 0 : i32
    %c0_i32_1 = arith.constant 0 : i32
    return %c0_i32, %c0_i32_0 : i32, i32
  }
  func.func @transform_1(%arg0: i32) -> (i32, i32) {
    %c0_i32 = arith.constant 0 : i32
    %c0_i32_0 = arith.constant 0 : i32
    %c0_i32_1 = arith.constant 0 : i32
    return %c0_i32, %c0_i32_0 : i32, i32
  }
  func.func @transform_2(%arg0: i32) -> (i32, i32) {
    %c0_i32 = arith.constant 0 : i32
    %c0_i32_0 = arith.constant 0 : i32
    %c0_i32_1 = arith.constant 0 : i32
    return %c0_i32, %c0_i32_0 : i32, i32
  }
  func.func @transform_3(%arg0: i32) -> (i32, i32) {
    %c0_i32 = arith.constant 0 : i32
    %c0_i32_0 = arith.constant 0 : i32
    %c0_i32_1 = arith.constant 0 : i32
    return %c0_i32, %c0_i32_0 : i32, i32
  }
  func.func @transform_4(%arg0: i32) -> (i32, i32) {
    %c0_i32 = arith.constant 0 : i32
    %c0_i32_0 = arith.constant 0 : i32
    %c0_i32_1 = arith.constant 0 : i32
    return %c0_i32, %c0_i32_0 : i32, i32
  }
}

module attributes {stable_mosaic.version = 11 : i64} {
  func.func @conv_bn_kernel(%arg0: i32, %arg1: memref<54x2240xbf16, #tpu.memory_space<vmem>>, %arg2: memref<2240x35xbf16, #tpu.memory_space<vmem>>, %arg3: memref<1x35xf32, #tpu.memory_space<vmem>>, %arg4: memref<1x35xf32, #tpu.memory_space<vmem>>, %arg5: memref<54x35xbf16, #tpu.memory_space<vmem>>) attributes {dimension_semantics = [#tpu.dimension_semantics<arbitrary>], iteration_bounds = array<i64: 1>, scalar_prefetch = 0 : i64, scratch_operands = 0 : i64, tpu.core_type = #tpu.core_type<tc>, window_params = [{pipeline_mode = #tpu.pipeline_mode<synchronous>, transform_indices = @transform_0, window_bounds = array<i64: 54, 2240>}, {pipeline_mode = #tpu.pipeline_mode<synchronous>, transform_indices = @transform_1, window_bounds = array<i64: 2240, 35>}, {pipeline_mode = #tpu.pipeline_mode<synchronous>, transform_indices = @transform_2, window_bounds = array<i64: 1, 35>}, {pipeline_mode = #tpu.pipeline_mode<synchronous>, transform_indices = @transform_3, window_bounds = array<i64: 1, 35>}, {pipeline_mode = #tpu.pipeline_mode<synchronous>, transform_indices = @transform_4, window_bounds = array<i64: 54, 35>}]} {
    %c0 = arith.constant 0 : index
    %c0_0 = arith.constant 0 : index
    %0 = vector.load %arg1[%c0, %c0_0] : memref<54x2240xbf16, #tpu.memory_space<vmem>>, vector<54x2240xbf16>
    %c0_1 = arith.constant 0 : index
    %c0_2 = arith.constant 0 : index
    %1 = vector.load %arg2[%c0_1, %c0_2] : memref<2240x35xbf16, #tpu.memory_space<vmem>>, vector<2240x35xbf16>
    %cst = arith.constant dense<0.000000e+00> : vector<54x35xf32>
    %2 = tpu.matmul %0, %1, %cst {dimension_numbers = #tpu.dot_dimension_numbers<[1], [0], [0], [1], [0, 0, 1, 1], [], []>} : vector<54x2240xbf16>, vector<2240x35xbf16>, vector<54x35xf32> -> vector<54x35xf32>
    %cst_3 = arith.constant dense<0.000000e+00> : vector<35xf32>
    %3 = vector.multi_reduction <add>, %2, %cst_3 [0] : vector<54x35xf32> to vector<35xf32>
    %4 = vector.shape_cast %3 : vector<35xf32> to vector<1x35xf32>
    %cst_4 = arith.constant 0.0185185187 : f32
    %5 = vector.broadcast %cst_4 : f32 to vector<1x35xf32>
    %6 = arith.mulf %4, %5 : vector<1x35xf32>
    %7 = vector.broadcast %6 : vector<1x35xf32> to vector<54x35xf32>
    %8 = arith.subf %2, %7 : vector<54x35xf32>
    %9 = arith.mulf %8, %8 : vector<54x35xf32>
    %cst_5 = arith.constant dense<0.000000e+00> : vector<35xf32>
    %10 = vector.multi_reduction <add>, %9, %cst_5 [0] : vector<54x35xf32> to vector<35xf32>
    %11 = vector.shape_cast %10 : vector<35xf32> to vector<1x35xf32>
    %cst_6 = arith.constant 0.0185185187 : f32
    %12 = vector.broadcast %cst_6 : f32 to vector<1x35xf32>
    %13 = arith.mulf %11, %12 : vector<1x35xf32>
    %c0_7 = arith.constant 0 : index
    %c0_8 = arith.constant 0 : index
    %14 = vector.load %arg3[%c0_7, %c0_8] : memref<1x35xf32, #tpu.memory_space<vmem>>, vector<1x35xf32>
    %cst_9 = arith.constant 9.99999974E-6 : f32
    %15 = vector.broadcast %cst_9 : f32 to vector<1x35xf32>
    %16 = arith.addf %13, %15 : vector<1x35xf32>
    %17 = math.rsqrt %16 : vector<1x35xf32>
    %18 = arith.mulf %14, %17 : vector<1x35xf32>
    %19 = vector.broadcast %18 : vector<1x35xf32> to vector<54x35xf32>
    %20 = arith.mulf %8, %19 : vector<54x35xf32>
    %c0_10 = arith.constant 0 : index
    %c0_11 = arith.constant 0 : index
    %21 = vector.load %arg4[%c0_10, %c0_11] : memref<1x35xf32, #tpu.memory_space<vmem>>, vector<1x35xf32>
    %22 = vector.broadcast %21 : vector<1x35xf32> to vector<54x35xf32>
    %23 = arith.addf %20, %22 : vector<54x35xf32>
    %cst_12 = arith.constant 0.000000e+00 : f32
    %24 = vector.broadcast %cst_12 : f32 to vector<54x35xf32>
    %25 = arith.maximumf %23, %24 : vector<54x35xf32>
    %26 = arith.truncf %25 : vector<54x35xf32> to vector<54x35xbf16>
    %c0_13 = arith.constant 0 : index
    %c0_14 = arith.constant 0 : index
    %27 = vector.load %arg5[%c0_13, %c0_14] : memref<54x35xbf16, #tpu.memory_space<vmem>>, vector<54x35xbf16>
    tpu.vector_store %arg5[%c0_13, %c0_14], %26 {strides = array<i32>} : memref<54x35xbf16, #tpu.memory_space<vmem>>, vector<54x35xbf16>,
    return
  }
  func.func @transform_0(%arg0: i32) -> (i32, i32) {
    %c0_i32 = arith.constant 0 : i32
    %c0_i32_0 = arith.constant 0 : i32
    %c0_i32_1 = arith.constant 0 : i32
    return %c0_i32, %c0_i32_0 : i32, i32
  }
  func.func @transform_1(%arg0: i32) -> (i32, i32) {
    %c0_i32 = arith.constant 0 : i32
    %c0_i32_0 = arith.constant 0 : i32
    %c0_i32_1 = arith.constant 0 : i32
    return %c0_i32, %c0_i32_0 : i32, i32
  }
  func.func @transform_2(%arg0: i32) -> (i32, i32) {
    %c0_i32 = arith.constant 0 : i32
    %c0_i32_0 = arith.constant 0 : i32
    %c0_i32_1 = arith.constant 0 : i32
    return %c0_i32, %c0_i32_0 : i32, i32
  }
  func.func @transform_3(%arg0: i32) -> (i32, i32) {
    %c0_i32 = arith.constant 0 : i32
    %c0_i32_0 = arith.constant 0 : i32
    %c0_i32_1 = arith.constant 0 : i32
    return %c0_i32, %c0_i32_0 : i32, i32
  }
  func.func @transform_4(%arg0: i32) -> (i32, i32) {
    %c0_i32 = arith.constant 0 : i32
    %c0_i32_0 = arith.constant 0 : i32
    %c0_i32_1 = arith.constant 0 : i32
    return %c0_i32, %c0_i32_0 : i32, i32
  }
}

module attributes {stable_mosaic.version = 11 : i64} {
  func.func @conv_bn_kernel(%arg0: i32, %arg1: memref<16x2240xbf16, #tpu.memory_space<vmem>>, %arg2: memref<2240x35xbf16, #tpu.memory_space<vmem>>, %arg3: memref<1x35xf32, #tpu.memory_space<vmem>>, %arg4: memref<1x35xf32, #tpu.memory_space<vmem>>, %arg5: memref<16x35xbf16, #tpu.memory_space<vmem>>) attributes {dimension_semantics = [#tpu.dimension_semantics<arbitrary>], iteration_bounds = array<i64: 1>, scalar_prefetch = 0 : i64, scratch_operands = 0 : i64, tpu.core_type = #tpu.core_type<tc>, window_params = [{pipeline_mode = #tpu.pipeline_mode<synchronous>, transform_indices = @transform_0, window_bounds = array<i64: 16, 2240>}, {pipeline_mode = #tpu.pipeline_mode<synchronous>, transform_indices = @transform_1, window_bounds = array<i64: 2240, 35>}, {pipeline_mode = #tpu.pipeline_mode<synchronous>, transform_indices = @transform_2, window_bounds = array<i64: 1, 35>}, {pipeline_mode = #tpu.pipeline_mode<synchronous>, transform_indices = @transform_3, window_bounds = array<i64: 1, 35>}, {pipeline_mode = #tpu.pipeline_mode<synchronous>, transform_indices = @transform_4, window_bounds = array<i64: 16, 35>}]} {
    %c0 = arith.constant 0 : index
    %c0_0 = arith.constant 0 : index
    %0 = vector.load %arg1[%c0, %c0_0] : memref<16x2240xbf16, #tpu.memory_space<vmem>>, vector<16x2240xbf16>
    %c0_1 = arith.constant 0 : index
    %c0_2 = arith.constant 0 : index
    %1 = vector.load %arg2[%c0_1, %c0_2] : memref<2240x35xbf16, #tpu.memory_space<vmem>>, vector<2240x35xbf16>
    %cst = arith.constant dense<0.000000e+00> : vector<16x35xf32>
    %2 = tpu.matmul %0, %1, %cst {dimension_numbers = #tpu.dot_dimension_numbers<[1], [0], [0], [1], [0, 0, 1, 1], [], []>} : vector<16x2240xbf16>, vector<2240x35xbf16>, vector<16x35xf32> -> vector<16x35xf32>
    %cst_3 = arith.constant dense<0.000000e+00> : vector<35xf32>
    %3 = vector.multi_reduction <add>, %2, %cst_3 [0] : vector<16x35xf32> to vector<35xf32>
    %4 = vector.shape_cast %3 : vector<35xf32> to vector<1x35xf32>
    %cst_4 = arith.constant 6.250000e-02 : f32
    %5 = vector.broadcast %cst_4 : f32 to vector<1x35xf32>
    %6 = arith.mulf %4, %5 : vector<1x35xf32>
    %7 = vector.broadcast %6 : vector<1x35xf32> to vector<16x35xf32>
    %8 = arith.subf %2, %7 : vector<16x35xf32>
    %9 = arith.mulf %8, %8 : vector<16x35xf32>
    %cst_5 = arith.constant dense<0.000000e+00> : vector<35xf32>
    %10 = vector.multi_reduction <add>, %9, %cst_5 [0] : vector<16x35xf32> to vector<35xf32>
    %11 = vector.shape_cast %10 : vector<35xf32> to vector<1x35xf32>
    %cst_6 = arith.constant 6.250000e-02 : f32
    %12 = vector.broadcast %cst_6 : f32 to vector<1x35xf32>
    %13 = arith.mulf %11, %12 : vector<1x35xf32>
    %c0_7 = arith.constant 0 : index
    %c0_8 = arith.constant 0 : index
    %14 = vector.load %arg3[%c0_7, %c0_8] : memref<1x35xf32, #tpu.memory_space<vmem>>, vector<1x35xf32>
    %cst_9 = arith.constant 9.99999974E-6 : f32
    %15 = vector.broadcast %cst_9 : f32 to vector<1x35xf32>
    %16 = arith.addf %13, %15 : vector<1x35xf32>
    %17 = math.rsqrt %16 : vector<1x35xf32>
    %18 = arith.mulf %14, %17 : vector<1x35xf32>
    %19 = vector.broadcast %18 : vector<1x35xf32> to vector<16x35xf32>
    %20 = arith.mulf %8, %19 : vector<16x35xf32>
    %c0_10 = arith.constant 0 : index
    %c0_11 = arith.constant 0 : index
    %21 = vector.load %arg4[%c0_10, %c0_11] : memref<1x35xf32, #tpu.memory_space<vmem>>, vector<1x35xf32>
    %22 = vector.broadcast %21 : vector<1x35xf32> to vector<16x35xf32>
    %23 = arith.addf %20, %22 : vector<16x35xf32>
    %cst_12 = arith.constant 0.000000e+00 : f32
    %24 = vector.broadcast %cst_12 : f32 to vector<16x35xf32>
    %25 = arith.maximumf %23, %24 : vector<16x35xf32>
    %26 = arith.truncf %25 : vector<16x35xf32> to vector<16x35xbf16>
    %c0_13 = arith.constant 0 : index
    %c0_14 = arith.constant 0 : index
    %27 = vector.load %arg5[%c0_13, %c0_14] : memref<16x35xbf16, #tpu.memory_space<vmem>>, vector<16x35xbf16>
    tpu.vector_store %arg5[%c0_13, %c0_14], %26 {strides = array<i32>} : memref<16x35xbf16, #tpu.memory_space<vmem>>, vector<16x35xbf16>,
    return
  }
  func.func @transform_0(%arg0: i32) -> (i32, i32) {
    %c0_i32 = arith.constant 0 : i32
    %c0_i32_0 = arith.constant 0 : i32
    %c0_i32_1 = arith.constant 0 : i32
    return %c0_i32, %c0_i32_0 : i32, i32
  }
  func.func @transform_1(%arg0: i32) -> (i32, i32) {
    %c0_i32 = arith.constant 0 : i32
    %c0_i32_0 = arith.constant 0 : i32
    %c0_i32_1 = arith.constant 0 : i32
    return %c0_i32, %c0_i32_0 : i32, i32
  }
  func.func @transform_2(%arg0: i32) -> (i32, i32) {
    %c0_i32 = arith.constant 0 : i32
    %c0_i32_0 = arith.constant 0 : i32
    %c0_i32_1 = arith.constant 0 : i32
    return %c0_i32, %c0_i32_0 : i32, i32
  }
  func.func @transform_3(%arg0: i32) -> (i32, i32) {
    %c0_i32 = arith.constant 0 : i32
    %c0_i32_0 = arith.constant 0 : i32
    %c0_i32_1 = arith.constant 0 : i32
    return %c0_i32, %c0_i32_0 : i32, i32
  }
  func.func @transform_4(%arg0: i32) -> (i32, i32) {
    %c0_i32 = arith.constant 0 : i32
    %c0_i32_0 = arith.constant 0 : i32
    %c0_i32_1 = arith.constant 0 : i32
    return %c0_i32, %c0_i32_0 : i32, i32
  }
}

module attributes {stable_mosaic.version = 11 : i64} {
  func.func @conv_bn_kernel(%arg0: i32, %arg1: memref<16x2240xbf16, #tpu.memory_space<vmem>>, %arg2: memref<2240x4xbf16, #tpu.memory_space<vmem>>, %arg3: memref<1x4xf32, #tpu.memory_space<vmem>>, %arg4: memref<1x4xf32, #tpu.memory_space<vmem>>, %arg5: memref<16x4xf32, #tpu.memory_space<vmem>>) attributes {dimension_semantics = [#tpu.dimension_semantics<arbitrary>], iteration_bounds = array<i64: 1>, scalar_prefetch = 0 : i64, scratch_operands = 0 : i64, tpu.core_type = #tpu.core_type<tc>, window_params = [{pipeline_mode = #tpu.pipeline_mode<synchronous>, transform_indices = @transform_0, window_bounds = array<i64: 16, 2240>}, {pipeline_mode = #tpu.pipeline_mode<synchronous>, transform_indices = @transform_1, window_bounds = array<i64: 2240, 4>}, {pipeline_mode = #tpu.pipeline_mode<synchronous>, transform_indices = @transform_2, window_bounds = array<i64: 1, 4>}, {pipeline_mode = #tpu.pipeline_mode<synchronous>, transform_indices = @transform_3, window_bounds = array<i64: 1, 4>}, {pipeline_mode = #tpu.pipeline_mode<synchronous>, transform_indices = @transform_4, window_bounds = array<i64: 16, 4>}]} {
    %c0 = arith.constant 0 : index
    %c0_0 = arith.constant 0 : index
    %0 = vector.load %arg1[%c0, %c0_0] : memref<16x2240xbf16, #tpu.memory_space<vmem>>, vector<16x2240xbf16>
    %c0_1 = arith.constant 0 : index
    %c0_2 = arith.constant 0 : index
    %1 = vector.load %arg2[%c0_1, %c0_2] : memref<2240x4xbf16, #tpu.memory_space<vmem>>, vector<2240x4xbf16>
    %cst = arith.constant dense<0.000000e+00> : vector<16x4xf32>
    %2 = tpu.matmul %0, %1, %cst {dimension_numbers = #tpu.dot_dimension_numbers<[1], [0], [0], [1], [0, 0, 1, 1], [], []>} : vector<16x2240xbf16>, vector<2240x4xbf16>, vector<16x4xf32> -> vector<16x4xf32>
    %cst_3 = arith.constant dense<0.000000e+00> : vector<4xf32>
    %3 = vector.multi_reduction <add>, %2, %cst_3 [0] : vector<16x4xf32> to vector<4xf32>
    %4 = vector.shape_cast %3 : vector<4xf32> to vector<1x4xf32>
    %cst_4 = arith.constant 6.250000e-02 : f32
    %5 = vector.broadcast %cst_4 : f32 to vector<1x4xf32>
    %6 = arith.mulf %4, %5 : vector<1x4xf32>
    %7 = vector.broadcast %6 : vector<1x4xf32> to vector<16x4xf32>
    %8 = arith.subf %2, %7 : vector<16x4xf32>
    %9 = arith.mulf %8, %8 : vector<16x4xf32>
    %cst_5 = arith.constant dense<0.000000e+00> : vector<4xf32>
    %10 = vector.multi_reduction <add>, %9, %cst_5 [0] : vector<16x4xf32> to vector<4xf32>
    %11 = vector.shape_cast %10 : vector<4xf32> to vector<1x4xf32>
    %cst_6 = arith.constant 6.250000e-02 : f32
    %12 = vector.broadcast %cst_6 : f32 to vector<1x4xf32>
    %13 = arith.mulf %11, %12 : vector<1x4xf32>
    %c0_7 = arith.constant 0 : index
    %c0_8 = arith.constant 0 : index
    %14 = vector.load %arg3[%c0_7, %c0_8] : memref<1x4xf32, #tpu.memory_space<vmem>>, vector<1x4xf32>
    %cst_9 = arith.constant 9.99999974E-6 : f32
    %15 = vector.broadcast %cst_9 : f32 to vector<1x4xf32>
    %16 = arith.addf %13, %15 : vector<1x4xf32>
    %17 = math.rsqrt %16 : vector<1x4xf32>
    %18 = arith.mulf %14, %17 : vector<1x4xf32>
    %19 = vector.broadcast %18 : vector<1x4xf32> to vector<16x4xf32>
    %20 = arith.mulf %8, %19 : vector<16x4xf32>
    %c0_10 = arith.constant 0 : index
    %c0_11 = arith.constant 0 : index
    %21 = vector.load %arg4[%c0_10, %c0_11] : memref<1x4xf32, #tpu.memory_space<vmem>>, vector<1x4xf32>
    %22 = vector.broadcast %21 : vector<1x4xf32> to vector<16x4xf32>
    %23 = arith.addf %20, %22 : vector<16x4xf32>
    %c0_12 = arith.constant 0 : index
    %c0_13 = arith.constant 0 : index
    %24 = vector.load %arg5[%c0_12, %c0_13] : memref<16x4xf32, #tpu.memory_space<vmem>>, vector<16x4xf32>
    tpu.vector_store %arg5[%c0_12, %c0_13], %23 {strides = array<i32>} : memref<16x4xf32, #tpu.memory_space<vmem>>, vector<16x4xf32>,
    return
  }
  func.func @transform_0(%arg0: i32) -> (i32, i32) {
    %c0_i32 = arith.constant 0 : i32
    %c0_i32_0 = arith.constant 0 : i32
    %c0_i32_1 = arith.constant 0 : i32
    return %c0_i32, %c0_i32_0 : i32, i32
  }
  func.func @transform_1(%arg0: i32) -> (i32, i32) {
    %c0_i32 = arith.constant 0 : i32
    %c0_i32_0 = arith.constant 0 : i32
    %c0_i32_1 = arith.constant 0 : i32
    return %c0_i32, %c0_i32_0 : i32, i32
  }
  func.func @transform_2(%arg0: i32) -> (i32, i32) {
    %c0_i32 = arith.constant 0 : i32
    %c0_i32_0 = arith.constant 0 : i32
    %c0_i32_1 = arith.constant 0 : i32
    return %c0_i32, %c0_i32_0 : i32, i32
  }
  func.func @transform_3(%arg0: i32) -> (i32, i32) {
    %c0_i32 = arith.constant 0 : i32
    %c0_i32_0 = arith.constant 0 : i32
    %c0_i32_1 = arith.constant 0 : i32
    return %c0_i32, %c0_i32_0 : i32, i32
  }
  func.func @transform_4(%arg0: i32) -> (i32, i32) {
    %c0_i32 = arith.constant 0 : i32
    %c0_i32_0 = arith.constant 0 : i32
    %c0_i32_1 = arith.constant 0 : i32
    return %c0_i32, %c0_i32_0 : i32, i32
  }
}

</mosaic_0001>

<bundles_post_ra>
// kernel: cnn_forward.5
= control target key start
LH: loop header
LB: loop body
LE: loop exit
PB: predicated region body
PF: predicated region fallthrough
CT: control target
= control target key end

     0   :  { %vm162_vm0 = vcmask 523264   ;;  %vm372_vm1 = vcmask 285696   ;;  %vm434_vm2 = vcmask 279552   ;;  %vm819_vm3 = vcmask 281600   ;;  %s1727_s1 = inlined_call_operand.vmem [shape: bf16[64,35], index: 1, kind: input, shape index: {}]   ;;  %s1728_s0 = inlined_call_operand.vmem [shape: bf16[250,64], index: 0, kind: input, shape index: {}]   ;;  %s1729_s2 = inlined_call_operand.vmem [shape: f32[1,35], index: 2, kind: input, shape index: {}]   ;;  %s1730_s3 = inlined_call_operand.vmem [shape: f32[1,35], index: 3, kind: input, shape index: {}]   ;;  %s1731_s4 = inlined_call_operand.vmem [shape: bf16[250,35], index: 4, kind: output, shape index: {}]  }
   0x1   :  { %v1026_v0 = vld [vmem:[%s1727_s1] sm:$0xff]   ;;  %v1027_v1 = vld [vmem:[%s1727_s1 + $0x8] sm:$0xff]   ;;  %v1028_v2 = vld [vmem:[%s1727_s1 + $0x10] sm:$0xff]   ;;  %vm851_vm4 = vcmask 278528  }
   0x2   :  { %978 = vmatprep.subr.bf16.mxu0 %v1026_v0  ;;  %1018 = vmatprep.subr.bf16.mxu1 %v1026_v0  ;;  %v1030_v3 = vld [vmem:[%s1728_s0] sm:$0xff]   ;;  %v1029_v4 = vld [vmem:[%s1727_s1 + $0x18] sm:$0xff]   ;;  %v1031_v5 = vld [vmem:[%s1728_s0 + $0x8] sm:$0xff]  }
   0x3   :  { %979 = vmatpush3.bf16.msra.mxu0 %v1026_v0  ;;  %1022 = vmatpush3.bf16.msra.mxu1 %v1026_v0  ;;  %v1038_v6 = vld [vmem:[%s1728_s0 + $0x40] sm:$0xff]   ;;  %v1032_v7 = vld [vmem:[%s1728_s0 + $0x10] sm:$0xff]   ;;  %v1039_v8 = vld [vmem:[%s1728_s0 + $0x48] sm:$0xff]  }
   0x4   :  { %980 = vmatprep.subr.bf16.mxu0 %v1027_v1  ;;  %1019 = vmatprep.subr.bf16.mxu1 %v1027_v1  ;;  %v1040_v9 = vld [vmem:[%s1728_s0 + $0x50] sm:$0xff]   ;;  %v1033_v10 = vld [vmem:[%s1728_s0 + $0x18] sm:$0xff]   ;;  %v1034_v12 = vld [vmem:[%s1728_s0 + $0x20] sm:$0xff]  }
   0x5   :  { %986 = vmatprep.mubr.msk.bf16.mxu0 %vm162_vm0, %v1030_v3  ;;  %1002 = vmatprep.mubr.msk.bf16.mxu1 %vm162_vm0, %v1038_v6  ;;  %v1041_v11 = vld [vmem:[%s1728_s0 + $0x58] sm:$0xff]   ;;  %v1042_v13 = vld [vmem:[%s1728_s0 + $0x60] sm:$0xff]   ;;  %v1035_v14 = vld [vmem:[%s1728_s0 + $0x28] sm:$0xff]  }
   0x6   :  { %v1043_v15 = vld [vmem:[%s1728_s0 + $0x68] sm:$0xff]   ;;  %v1036_v16 = vld [vmem:[%s1728_s0 + $0x30] sm:$0xff]   ;;  %v1037_v18 = vld [vmem:[%s1728_s0 + $0x38] sm:$0xff]  }
   0x7   :  { %981 = vmatpush3.bf16.msra.mxu0 %v1027_v1  ;;  %1023 = vmatpush3.bf16.msra.mxu1 %v1027_v1  ;;  %v1044_v17 = vld [vmem:[%s1728_s0 + $0x70] sm:$0xff]   ;;  %v1045_v19 = vld [vmem:[%s1728_s0 + $0x78] sm:$0x1f]  }
   0x8   :  { %982 = vmatprep.subr.bf16.mxu0 %v1028_v2  ;;  %1020 = vmatprep.subr.bf16.mxu1 %v1028_v2 }
   0xb   :  { %983 = vmatpush3.bf16.msra.mxu0 %v1028_v2  ;;  %1024 = vmatpush3.bf16.msra.mxu1 %v1028_v2 }
   0xc   :  { %984 = vmatprep.subr.bf16.mxu0 %v1029_v4  ;;  %1021 = vmatprep.subr.bf16.mxu1 %v1029_v4 }
   0xf   :  { %985 = vmatpush3.bf16.msra.mxu0 %v1029_v4  ;;  %1025 = vmatpush3.bf16.msra.mxu1 %v1029_v4 }
  0x12   :  { %987 = vmatmul.mubr.msk.bf16.vlgmr.msra.gmra.mrb[0].mxu0 %vm162_vm0, %v1031_v5  ;;  %1003 = vmatmul.mubr.msk.bf16.vlgmr.msra.gmra.mrb[0].mxu1 %vm162_vm0, %v1039_v8 }
  0x13   :  { %990 = vmatprep.mubr.msk.bf16.mxu0 %vm162_vm0, %v1032_v7  ;;  %1006 = vmatprep.mubr.msk.bf16.mxu1 %vm162_vm0, %v1040_v9 }
  0x1a   :  { %991 = vmatmul.mubr.msk.bf16.gmra.mrb[4].mxu0 %vm162_vm0, %v1033_v10  ;;  %1007 = vmatmul.mubr.msk.bf16.gmra.mrb[4].mxu1 %vm162_vm0, %v1041_v11 }
  0x1b   :  { %994 = vmatprep.mubr.msk.bf16.mxu0 %vm162_vm0, %v1034_v12  ;;  %1010 = vmatprep.mubr.msk.bf16.mxu1 %vm162_vm0, %v1042_v13 }
  0x22   :  { %995 = vmatmul.mubr.msk.bf16.gmra.mrb[8].mxu0 %vm162_vm0, %v1035_v14  ;;  %1011 = vmatmul.mubr.msk.bf16.gmra.mrb[8].mxu1 %vm162_vm0, %v1043_v15 }
  0x23   :  { %998 = vmatprep.mubr.msk.bf16.mxu0 %vm162_vm0, %v1036_v16  ;;  %1014 = vmatprep.mubr.msk.bf16.mxu1 %vm162_vm0, %v1044_v17 }
  0x2a   :  { %999 = vmatmul.mubr.msk.bf16.gmra.mrb[12].mxu0 %vm162_vm0, %v1037_v18  ;;  %1015 = vmatmul.mubr.msk.bf16.gmra.mrb[12].mxu1 %vm162_vm0, %v1045_v19 }
  0xe5   :  { %v1149_v20 = vpop.f32.mrb[0].mxu0  ;;  %v1151_v21 = vpop.f32.mrb[0].mxu1 }
  0xe6   :  { %v1153_v22 = vpop.f32.mrb[1].mxu0  ;;  %v1155_v23 = vpop.f32.mrb[1].mxu1  ;;  %v376_v31 = vsel %vm372_vm1, %v1149_v20, 0.0 }
  0xe7   :  { %v1157_v24 = vpop.f32.mrb[2].mxu0  ;;  %v1159_v25 = vpop.f32.mrb[2].mxu1  ;;  %v373_v28 = vsel %vm372_vm1, %v1153_v22, 0.0  ;;  %v404_v18 = vsel %vm372_vm1, %v1155_v23, 0.0 }
  0xe8   :  { %v1161_v26 = vpop.f32.mrb[3].mxu0  ;;  %v1163_v27 = vpop.f32.mrb[3].mxu1  ;;  %v378_v33 = vsel %vm372_vm1, %v1157_v24, 0.0 }
  0xe9   :  { %v374_v29 = vsel %vm372_vm1, %v1161_v26, 0.0 }
  0xea   :  { %v375_v30 = vadd.f32 %v374_v29, %v373_v28  ;;  %v406_v29 = vsel %vm372_vm1, %v1163_v27, 0.0 }
  0xec   :  { %v377_v32 = vadd.f32 %v376_v31, %v375_v30  ;;  %v408_v31 = vsel %vm372_vm1, %v1151_v21, 0.0 }
  0xed   :  { %v1173_v34 = vpop.f32.mrb[4].mxu0  ;;  %v1175_v35 = vpop.f32.mrb[4].mxu1 }
  0xee   :  { %v1177_v36 = vpop.f32.mrb[5].mxu0  ;;  %v379_v37 = vadd.f32 %v378_v33, %v377_v32  ;;  %v1179_v38 = vpop.f32.mrb[5].mxu1  ;;  %v384_v47 = vsel %vm372_vm1, %v1173_v34, 0.0  ;;  %v410_v33 = vsel %vm372_vm1, %v1159_v25, 0.0 }
  0xef   :  { %v380_v39 = vsel %vm372_vm1, %v1177_v36, 0.0  ;;  %v1183_v40 = vpop.f32.mrb[6].mxu0  ;;  %v1185_v41 = vpop.f32.mrb[6].mxu1 }
  0xf0   :  { %v381_v42 = vadd.f32 %v380_v39, %v379_v37  ;;  %v1187_v43 = vpop.f32.mrb[7].mxu0  ;;  %v1189_v44 = vpop.f32.mrb[7].mxu1  ;;  %v386_v49 = vsel %vm372_vm1, %v1183_v40, 0.0  ;;  %v412_v37 = vsel %vm372_vm1, %v1179_v38, 0.0 }
  0xf1   :  { %v382_v45 = vsel %vm372_vm1, %v1187_v43, 0.0 }
  0xf2   :  { %v383_v46 = vadd.f32 %v382_v45, %v381_v42  ;;  %v414_v45 = vsel %vm372_vm1, %v1189_v44, 0.0 }
  0xf4   :  { %v385_v48 = vadd.f32 %v384_v47, %v383_v46  ;;  %v416_v47 = vsel %vm372_vm1, %v1175_v35, 0.0 }
  0xf5   :  { %v1197_v50 = vpop.f32.mrb[8].mxu0  ;;  %v1199_v51 = vpop.f32.mrb[8].mxu1 }
  0xf6   :  { %v1201_v52 = vpop.f32.mrb[9].mxu0  ;;  %v387_v53 = vadd.f32 %v386_v49, %v385_v48  ;;  %v1203_v54 = vpop.f32.mrb[9].mxu1  ;;  %v392_v63 = vsel %vm372_vm1, %v1197_v50, 0.0  ;;  %v418_v49 = vsel %vm372_vm1, %v1185_v41, 0.0 }
  0xf7   :  { %v388_v55 = vsel %vm372_vm1, %v1201_v52, 0.0  ;;  %v1207_v56 = vpop.f32.mrb[10].mxu0  ;;  %v1209_v57 = vpop.f32.mrb[10].mxu1 }
  0xf8   :  { %v389_v58 = vadd.f32 %v388_v55, %v387_v53  ;;  %v1211_v59 = vpop.f32.mrb[11].mxu0  ;;  %v1213_v60 = vpop.f32.mrb[11].mxu1  ;;  %v394_v1 = vsel %vm372_vm1, %v1207_v56, 0.0  ;;  %v420_v53 = vsel %vm372_vm1, %v1203_v54, 0.0 }
  0xf9   :  { %v390_v61 = vsel %vm372_vm1, %v1211_v59, 0.0 }
  0xfa   :  { %v391_v62 = vadd.f32 %v390_v61, %v389_v58  ;;  %v422_v61 = vsel %vm372_vm1, %v1213_v60, 0.0 }
  0xfc   :  { %v393_v0 = vadd.f32 %v392_v63, %v391_v62  ;;  %v424_v63 = vsel %vm372_vm1, %v1199_v51, 0.0 }
  0xfd   :  { %v1221_v2 = vpop.f32.mrb[12].mxu0  ;;  %v1223_v3 = vpop.f32.mrb[12].mxu1 }
  0xfe   :  { %v1225_v4 = vpop.f32.mrb[13].mxu0  ;;  %v395_v5 = vadd.f32 %v394_v1, %v393_v0  ;;  %v1227_v6 = vpop.f32.mrb[13].mxu1  ;;  %v400_v15 = vsel %vm372_vm1, %v1221_v2, 0.0  ;;  %v426_v1 = vsel %vm372_vm1, %v1209_v57, 0.0 }
  0xff   :  { %v396_v7 = vsel %vm372_vm1, %v1225_v4, 0.0  ;;  %v1231_v8 = vpop.f32.mrb[14].mxu0  ;;  %v1233_v9 = vpop.f32.mrb[14].mxu1 }
 0x100   :  { %v397_v10 = vadd.f32 %v396_v7, %v395_v5  ;;  %v296_v11 = vpop.f32.mrb[15].mxu0  ;;  %v1235_v12 = vpop.f32.mrb[15].mxu1  ;;  %v402_v17 = vsel %vm372_vm1, %v1231_v8, 0.0  ;;  %v428_v5 = vsel %vm372_vm1, %v1227_v6, 0.0 }
 0x101   :  { %v398_v13 = vsel %vm372_vm1, %v296_v11, 0.0 }
 0x102   :  { %v399_v14 = vadd.f32 %v398_v13, %v397_v10  ;;  %v430_v13 = vsel %vm372_vm1, %v1235_v12, 0.0 }
 0x104   :  { %v401_v16 = vadd.f32 %v400_v15, %v399_v14  ;;  %v432_v15 = vsel %vm372_vm1, %v1223_v3, 0.0 }
 0x106   :  { %v403_v19 = vadd.f32 %v402_v17, %v401_v16  ;;  %v435_v17 = vsel %vm434_vm2, %v1233_v9, 0.0 }
 0x108   :  { %v405_v28 = vadd.f32 %v404_v18, %v403_v19 }
 0x10a   :  { %v407_v30 = vadd.f32 %v406_v29, %v405_v28 }
 0x10c   :  { %v409_v32 = vadd.f32 %v408_v31, %v407_v30 }
 0x10e   :  { %v411_v39 = vadd.f32 %v410_v33, %v409_v32 }
 0x110   :  { %v413_v42 = vadd.f32 %v412_v37, %v411_v39 }
 0x112   :  { %v415_v46 = vadd.f32 %v414_v45, %v413_v42 }
 0x114   :  { %v417_v48 = vadd.f32 %v416_v47, %v415_v46 }
 0x116   :  { %v419_v55 = vadd.f32 %v418_v49, %v417_v48 }
 0x118   :  { %v421_v58 = vadd.f32 %v420_v53, %v419_v55 }
 0x11a   :  { %v423_v62 = vadd.f32 %v422_v61, %v421_v58 }
 0x11c   :  { %v425_v0 = vadd.f32 %v424_v63, %v423_v62 }
 0x11e   :  { %v427_v7 = vadd.f32 %v426_v1, %v425_v0 }
 0x120   :  { %v429_v10 = vadd.f32 %v428_v5, %v427_v7 }
 0x122   :  { %v431_v14 = vadd.f32 %v430_v13, %v429_v10 }
 0x124   :  { %v433_v16 = vadd.f32 %v432_v15, %v431_v14 }
 0x126   :  { %v436_v18 = vadd.f32 %v435_v17, %v433_v16 }
 0x128   :  { %v437_v19 = vrot.slane %v436_v18, 4 }
 0x12a   :  { %v438_v28 = vadd.f32 %v437_v19, %v436_v18 }
 0x12c   :  { %v439_v29 = vrot.slane %v438_v28, 2 }
 0x12e   :  { %v440_v30 = vadd.f32 %v439_v29, %v438_v28 }
 0x130   :  { %v441_v31 = vrot.slane %v440_v30, 1 }
 0x132   :  { %v442_v32 = vadd.f32 %v441_v31, %v440_v30 }
 0x134   :  { %v443_v33 = vmul.f32 0.004, %v442_v32 }
 0x136   :  { %v1275_v37 = vsub.f32 %v1153_v22, %v443_v33  ;;  %v1278_v39 = vsub.f32 %v1161_v26, %v443_v33  ;;  %v1281_v42 = vsub.f32 %v1149_v20, %v443_v33  ;;  %v1284_v45 = vsub.f32 %v1157_v24, %v443_v33 }
 0x137   :  { %v1287_v46 = vsub.f32 %v1177_v36, %v443_v33  ;;  %v1290_v47 = vsub.f32 %v1187_v43, %v443_v33  ;;  %v1293_v48 = vsub.f32 %v1173_v34, %v443_v33  ;;  %v1296_v22 = vsub.f32 %v1183_v40, %v443_v33 }
 0x138   :  { %v1299_v26 = vsub.f32 %v1201_v52, %v443_v33  ;;  %v1302_v20 = vsub.f32 %v1211_v59, %v443_v33  ;;  %v1305_v24 = vsub.f32 %v1197_v50, %v443_v33  ;;  %v1308_v36 = vsub.f32 %v1207_v56, %v443_v33 }
 0x139   :  { %v1311_v43 = vsub.f32 %v1225_v4, %v443_v33  ;;  %v1313_v34 = vsub.f32 %v296_v11, %v443_v33  ;;  %v1316_v40 = vsub.f32 %v1221_v2, %v443_v33  ;;  %v1319_v52 = vsub.f32 %v1231_v8, %v443_v33 }
 0x13a   :  { %v1322_v59 = vsub.f32 %v1155_v23, %v443_v33  ;;  %v1325_v50 = vsub.f32 %v1163_v27, %v443_v33  ;;  %v1328_v56 = vsub.f32 %v1151_v21, %v443_v33  ;;  %v1331_v4 = vsub.f32 %v1159_v25, %v443_v33 }
 0x13b   :  { %v1334_v11 = vsub.f32 %v1179_v38, %v443_v33  ;;  %v1337_v2 = vsub.f32 %v1189_v44, %v443_v33  ;;  %v1340_v8 = vsub.f32 %v1175_v35, %v443_v33  ;;  %v1343_v23 = vsub.f32 %v1185_v41, %v443_v33 }
 0x13c   :  { %v1346_v27 = vsub.f32 %v1203_v54, %v443_v33  ;;  %v1349_v21 = vsub.f32 %v1213_v60, %v443_v33  ;;  %v1352_v25 = vsub.f32 %v1199_v51, %v443_v33  ;;  %v1355_v38 = vsub.f32 %v1209_v57, %v443_v33 }
 0x13d   :  { %v1358_v44 = vsub.f32 %v1227_v6, %v443_v33  ;;  %v1361_v35 = vsub.f32 %v1235_v12, %v443_v33  ;;  %v1364_v41 = vsub.f32 %v1223_v3, %v443_v33  ;;  %v1367_v54 = vsub.f32 %v1233_v9, %v443_v33 }
 0x13e   :  { %v476_v60 = vmul.f32 %v1275_v37, %v1275_v37  ;;  %v477_v51 = vmul.f32 %v1278_v39, %v1278_v39  ;;  %v478_v57 = vmul.f32 %v1281_v42, %v1281_v42  ;;  %v479_v6 = vmul.f32 %v1284_v45, %v1284_v45 }
 0x13f   :  { %v480_v9 = vmul.f32 %v1287_v46, %v1287_v46  ;;  %v481_v58 = vmul.f32 %v1290_v47, %v1290_v47  ;;  %v482_v63 = vmul.f32 %v1293_v48, %v1293_v48  ;;  %v483_v5 = vmul.f32 %v1296_v22, %v1296_v22 }
 0x140   :  { %v508_v12 = vsel %vm372_vm1, %v476_v60, 0.0  ;;  %v509_v3 = vsel %vm372_vm1, %v477_v51, 0.0  ;;  %v511_v53 = vsel %vm372_vm1, %v478_v57, 0.0  ;;  %v513_v61 = vsel %vm372_vm1, %v479_v6, 0.0 }
 0x141   :  { %v510_v49 = vadd.f32 %v509_v3, %v508_v12  ;;  %v515_v0 = vsel %vm372_vm1, %v480_v9, 0.0  ;;  %v517_v7 = vsel %vm372_vm1, %v481_v58, 0.0  ;;  %v484_v13 = vmul.f32 %v1299_v26, %v1299_v26 }
 0x142   :  { %v519_v14 = vsel %vm372_vm1, %v482_v63, 0.0  ;;  %v485_v16 = vmul.f32 %v1302_v20, %v1302_v20  ;;  %v521_v17 = vsel %vm372_vm1, %v483_v5, 0.0  ;;  %v486_v19 = vmul.f32 %v1305_v24, %v1305_v24 }
 0x143   :  { %v512_v55 = vadd.f32 %v511_v53, %v510_v49  ;;  %v523_v28 = vsel %vm372_vm1, %v484_v13, 0.0  ;;  %v487_v30 = vmul.f32 %v1308_v36, %v1308_v36  ;;  %v488_v33 = vmul.f32 %v1311_v43, %v1311_v43 }
 0x144   :  { %v525_v31 = vsel %vm372_vm1, %v485_v16, 0.0  ;;  %v527_v60 = vsel %vm372_vm1, %v486_v19, 0.0  ;;  %v489_v57 = vmul.f32 %v1313_v34, %v1313_v34  ;;  %v490_v3 = vmul.f32 %v1316_v40, %v1316_v40 }
 0x145   :  { %v514_v62 = vadd.f32 %v513_v61, %v512_v55  ;;  %v529_v6 = vsel %vm372_vm1, %v487_v30, 0.0  ;;  %v531_v49 = vsel %vm372_vm1, %v488_v33, 0.0  ;;  %v491_v53 = vmul.f32 %v1319_v52, %v1319_v52 }
 0x146   :  { %v533_v55 = vsel %vm372_vm1, %v489_v57, 0.0  ;;  %v492_v61 = vmul.f32 %v1322_v59, %v1322_v59 }
 0x147   :  { %v516_v1 = vadd.f32 %v515_v0, %v514_v62  ;;  %v535_v62 = vsel %vm372_vm1, %v490_v3, 0.0  ;;  %v493_v0 = vmul.f32 %v1325_v50, %v1325_v50 }
 0x149   :  { %v518_v10 = vadd.f32 %v517_v7, %v516_v1  ;;  %v537_v1 = vsel %vm372_vm1, %v491_v53, 0.0  ;;  %v494_v7 = vmul.f32 %v1328_v56, %v1328_v56 }
 0x14b   :  { %v520_v15 = vadd.f32 %v519_v14, %v518_v10  ;;  %v539_v10 = vsel %vm372_vm1, %v492_v61, 0.0  ;;  %v495_v14 = vmul.f32 %v1331_v4, %v1331_v4 }
 0x14d   :  { %v522_v18 = vadd.f32 %v521_v17, %v520_v15  ;;  %v541_v15 = vsel %vm372_vm1, %v493_v0, 0.0  ;;  %v496_v17 = vmul.f32 %v1334_v11, %v1334_v11 }
 0x14f   :  { %v524_v29 = vadd.f32 %v523_v28, %v522_v18  ;;  %v543_v18 = vsel %vm372_vm1, %v494_v7, 0.0  ;;  %v497_v28 = vmul.f32 %v1337_v2, %v1337_v2 }
 0x151   :  { %v526_v32 = vadd.f32 %v525_v31, %v524_v29  ;;  %v545_v29 = vsel %vm372_vm1, %v495_v14, 0.0  ;;  %v498_v31 = vmul.f32 %v1340_v8, %v1340_v8 }
 0x153   :  { %v528_v51 = vadd.f32 %v527_v60, %v526_v32  ;;  %v547_v32 = vsel %vm372_vm1, %v496_v17, 0.0  ;;  %v499_v60 = vmul.f32 %v1343_v23, %v1343_v23 }
 0x155   :  { %v530_v12 = vadd.f32 %v529_v6, %v528_v51  ;;  %v549_v51 = vsel %vm372_vm1, %v497_v28, 0.0  ;;  %v500_v6 = vmul.f32 %v1346_v27, %v1346_v27 }
 0x157   :  { %v532_v9 = vadd.f32 %v531_v49, %v530_v12  ;;  %v551_v12 = vsel %vm372_vm1, %v498_v31, 0.0  ;;  %v501_v49 = vmul.f32 %v1349_v21, %v1349_v21 }
 0x159   :  { %v534_v58 = vadd.f32 %v533_v55, %v532_v9  ;;  %v553_v9 = vsel %vm372_vm1, %v499_v60, 0.0  ;;  %v502_v55 = vmul.f32 %v1352_v25, %v1352_v25 }
 0x15b   :  { %v536_v63 = vadd.f32 %v535_v62, %v534_v58  ;;  %v555_v58 = vsel %vm372_vm1, %v500_v6, 0.0  ;;  %v503_v62 = vmul.f32 %v1355_v38, %v1355_v38 }
 0x15d   :  { %v538_v5 = vadd.f32 %v537_v1, %v536_v63  ;;  %v557_v63 = vsel %vm372_vm1, %v501_v49, 0.0  ;;  %v504_v1 = vmul.f32 %v1358_v44, %v1358_v44 }
 0x15f   :  { %v540_v13 = vadd.f32 %v539_v10, %v538_v5  ;;  %v559_v5 = vsel %vm372_vm1, %v502_v55, 0.0  ;;  %v505_v10 = vmul.f32 %v1361_v35, %v1361_v35  ;;  %v578_v55 = vld [vmem:[%s1729_s2] sm:$0x1] }
 0x161   :  { %v542_v16 = vadd.f32 %v541_v15, %v540_v13  ;;  %v561_v13 = vsel %vm372_vm1, %v503_v62, 0.0  ;;  %v506_v15 = vmul.f32 %v1364_v41, %v1364_v41 }
 0x163   :  { %v544_v19 = vadd.f32 %v543_v18, %v542_v16  ;;  %v563_v16 = vsel %vm372_vm1, %v504_v1, 0.0  ;;  %v507_v18 = vmul.f32 %v1367_v54, %v1367_v54 }
 0x165   :  { %v546_v30 = vadd.f32 %v545_v29, %v544_v19  ;;  %v565_v19 = vsel %vm372_vm1, %v505_v10, 0.0  ;;  %v567_v29 = vsel %vm372_vm1, %v506_v15, 0.0  ;;  %v569_v31 = vsel %vm434_vm2, %v507_v18, 0.0 }
 0x167   :  { %v548_v33 = vadd.f32 %v547_v32, %v546_v30 }
 0x169   :  { %v550_v57 = vadd.f32 %v549_v51, %v548_v33 }
 0x16b   :  { %v552_v3 = vadd.f32 %v551_v12, %v550_v57 }
 0x16d   :  { %v554_v53 = vadd.f32 %v553_v9, %v552_v3  ;;  %v583_v9 = vlaneseq }
 0x16f   :  { %v556_v61 = vadd.f32 %v555_v58, %v554_v53  ;;  %v584_v53 = vshrl.u32 %v583_v9, 7 }
 0x171   :  { %v558_v0 = vadd.f32 %v557_v63, %v556_v61  ;;  %v585_v58 = vsub.s32 0, %v584_v53 }
 0x173   :  { %v560_v7 = vadd.f32 %v559_v5, %v558_v0 }
 0x175   :  { %v562_v14 = vadd.f32 %v561_v13, %v560_v7 }
 0x177   :  { %v564_v17 = vadd.f32 %v563_v16, %v562_v14 }
 0x179   :  { %v566_v28 = vadd.f32 %v565_v19, %v564_v17 }
 0x17b   :  { %v568_v30 = vadd.f32 %v567_v29, %v566_v28 }
 0x17d   :  { %v570_v32 = vadd.f32 %v569_v31, %v568_v30 }
 0x17f   :  { %v571_v33 = vrot.slane %v570_v32, 4 }
 0x181   :  { %v572_v60 = vadd.f32 %v571_v33, %v570_v32 }
 0x183   :  { %v573_v51 = vrot.slane %v572_v60, 2 }
 0x185   :  { %v574_v57 = vadd.f32 %v573_v51, %v572_v60 }
 0x187   :  { %v575_v6 = vrot.slane %v574_v57, 1 }
 0x189   :  { %v576_v12 = vadd.f32 %v575_v6, %v574_v57 }
 0x18b   :  { %v577_v3 = vmul.f32 0.004, %v576_v12 }
 0x18d   :  { %v579_v49 = vadd.f32 1e-05, %v577_v3 }
 0x18f   :  { %1046 = vrsqrt.f32 %v579_v49 }
 0x199   :  { %v1047_v61 = vpop.eup %1046 }
 0x19a   :  { %v581_v62 = vmul.f32 %v1047_v61, %v578_v55 }
 0x19c   :  { %v586_v63 = vrot.slane %v581_v62, %v585_v58 }
 0x19e   :  { %v588_v0 = vmul.f32 %v586_v63, %v1275_v37  ;;  %v589_v1 = vmul.f32 %v586_v63, %v1278_v39  ;;  %v590_v5 = vmul.f32 %v586_v63, %v1281_v42  ;;  %v591_v7 = vmul.f32 %v586_v63, %v1284_v45 }
 0x19f   :  { %v592_v10 = vmul.f32 %v586_v63, %v1287_v46  ;;  %v593_v13 = vmul.f32 %v586_v63, %v1290_v47  ;;  %v594_v14 = vmul.f32 %v586_v63, %v1293_v48  ;;  %v595_v15 = vmul.f32 %v586_v63, %v1296_v22 }
 0x1a0   :  { %v596_v16 = vmul.f32 %v586_v63, %v1299_v26  ;;  %v597_v17 = vmul.f32 %v586_v63, %v1302_v20  ;;  %v598_v37 = vmul.f32 %v586_v63, %v1305_v24  ;;  %v599_v39 = vmul.f32 %v586_v63, %v1308_v36 }
 0x1a1   :  { %v600_v42 = vmul.f32 %v586_v63, %v1311_v43  ;;  %v601_v45 = vmul.f32 %v586_v63, %v1313_v34  ;;  %v602_v46 = vmul.f32 %v586_v63, %v1316_v40  ;;  %v603_v47 = vmul.f32 %v586_v63, %v1319_v52  ;;  %v893_v40 = vld [vmem:[%s1730_s3] ss:$0 sm:$0xff] }
 0x1a2   :  { %v604_v48 = vmul.f32 %v586_v63, %v1322_v59  ;;  %v605_v22 = vmul.f32 %v586_v63, %v1325_v50  ;;  %v606_v26 = vmul.f32 %v586_v63, %v1328_v56  ;;  %v607_v20 = vmul.f32 %v586_v63, %v1331_v4 }
 0x1a3   :  { %v608_v24 = vmul.f32 %v586_v63, %v1334_v11  ;;  %v609_v36 = vmul.f32 %v586_v63, %v1337_v2  ;;  %v610_v43 = vmul.f32 %v586_v63, %v1340_v8  ;;  %v611_v34 = vmul.f32 %v586_v63, %v1343_v23 }
 0x1a4   :  { %v612_v52 = vmul.f32 %v586_v63, %v1346_v27  ;;  %v613_v59 = vmul.f32 %v586_v63, %v1349_v21  ;;  %v614_v50 = vmul.f32 %v586_v63, %v1352_v25  ;;  %v615_v56 = vmul.f32 %v586_v63, %v1355_v38 }
 0x1a5   :  { %v616_v4 = vmul.f32 %v586_v63, %v1358_v44  ;;  %v617_v11 = vmul.f32 %v586_v63, %v1361_v35  ;;  %v618_v2 = vmul.f32 %v586_v63, %v1364_v41  ;;  %v619_v8 = vmul.f32 %v586_v63, %v1367_v54 }
 0x1a6   :  { %v1503_v23 = vadd.f32 %v893_v40, %v588_v0  ;;  %v1505_v18 = vadd.f32 %v893_v40, %v589_v1  ;;  %v1507_v19 = vadd.f32 %v893_v40, %v590_v5  ;;  %v1509_v27 = vadd.f32 %v893_v40, %v591_v7 }
 0x1a7   :  { %v1511_v21 = vadd.f32 %v893_v40, %v592_v10  ;;  %v1513_v25 = vadd.f32 %v893_v40, %v593_v13  ;;  %v1515_v38 = vadd.f32 %v893_v40, %v594_v14  ;;  %v1517_v44 = vadd.f32 %v893_v40, %v595_v15 }
 0x1a8   :  { %v1519_v35 = vadd.f32 %v893_v40, %v596_v16  ;;  %v1521_v41 = vadd.f32 %v893_v40, %v597_v17  ;;  %v1523_v54 = vadd.f32 %v893_v40, %v598_v37  ;;  %v1525_v28 = vadd.f32 %v893_v40, %v599_v39 }
 0x1a9   :  { %v1527_v29 = vadd.f32 %v893_v40, %v600_v42  ;;  %v1529_v30 = vadd.f32 %v893_v40, %v601_v45  ;;  %v1531_v31 = vadd.f32 %v893_v40, %v602_v46  ;;  %v1533_v32 = vadd.f32 %v893_v40, %v603_v47 }
 0x1aa   :  { %v1535_v33 = vadd.f32 %v893_v40, %v604_v48  ;;  %v1537_v60 = vadd.f32 %v893_v40, %v605_v22  ;;  %v1539_v51 = vadd.f32 %v893_v40, %v606_v26  ;;  %v1541_v57 = vadd.f32 %v893_v40, %v607_v20 }
 0x1ab   :  { %v1543_v6 = vadd.f32 %v893_v40, %v608_v24  ;;  %v1545_v12 = vadd.f32 %v893_v40, %v609_v36  ;;  %v1547_v3 = vadd.f32 %v893_v40, %v610_v43  ;;  %v1549_v49 = vadd.f32 %v893_v40, %v611_v34 }
 0x1ac   :  { %v1551_v9 = vadd.f32 %v893_v40, %v612_v52  ;;  %v1553_v53 = vadd.f32 %v893_v40, %v613_v59  ;;  %v1555_v55 = vadd.f32 %v893_v40, %v614_v50  ;;  %v1557_v58 = vadd.f32 %v893_v40, %v615_v56 }
 0x1ad   :  { %v1559_v61 = vadd.f32 %v893_v40, %v616_v4  ;;  %v1561_v62 = vadd.f32 %v893_v40, %v617_v11  ;;  %v1563_v63 = vadd.f32 %v893_v40, %v618_v2  ;;  %v1565_v0 = vadd.f32 %v893_v40, %v619_v8 }
 0x1ae   :  { %v659_v1 = vmax.f32 %v1503_v23, 0.0  ;;  %v660_v5 = vmax.f32 %v1505_v18, 0.0  ;;  %v661_v7 = vmax.f32 %v1507_v19, 0.0  ;;  %v662_v10 = vmax.f32 %v1509_v27, 0.0 }
 0x1af   :  { %v663_v13 = vmax.f32 %v1511_v21, 0.0  ;;  %v664_v14 = vmax.f32 %v1513_v25, 0.0  ;;  %v665_v15 = vmax.f32 %v1515_v38, 0.0  ;;  %v666_v16 = vmax.f32 %v1517_v44, 0.0 }
 0x1b0   :  { %v667_v17 = vmax.f32 %v1519_v35, 0.0  ;;  %v668_v37 = vmax.f32 %v1521_v41, 0.0  ;;  %v669_v39 = vmax.f32 %v1523_v54, 0.0  ;;  %v670_v42 = vmax.f32 %v1525_v28, 0.0 }
 0x1b1   :  { %v671_v45 = vmax.f32 %v1527_v29, 0.0  ;;  %v672_v46 = vmax.f32 %v1529_v30, 0.0  ;;  %v673_v47 = vmax.f32 %v1531_v31, 0.0  ;;  %v674_v48 = vmax.f32 %v1533_v32, 0.0 }
 0x1b2   :  { %v675_v22 = vmax.f32 %v1535_v33, 0.0  ;;  %v676_v26 = vmax.f32 %v1537_v60, 0.0  ;;  %v677_v20 = vmax.f32 %v1539_v51, 0.0  ;;  %v678_v24 = vmax.f32 %v1541_v57, 0.0 }
 0x1b3   :  { %v679_v36 = vmax.f32 %v1543_v6, 0.0  ;;  %v680_v43 = vmax.f32 %v1545_v12, 0.0  ;;  %v681_v34 = vmax.f32 %v1547_v3, 0.0  ;;  %v682_v40 = vmax.f32 %v1549_v49, 0.0 }
 0x1b4   :  { %v683_v52 = vmax.f32 %v1551_v9, 0.0  ;;  %v684_v59 = vmax.f32 %v1553_v53, 0.0  ;;  %v685_v50 = vmax.f32 %v1555_v55, 0.0  ;;  %v686_v56 = vmax.f32 %v1557_v58, 0.0 }
 0x1b5   :  { %v687_v4 = vmax.f32 %v1559_v61, 0.0  ;;  %v688_v11 = vmax.f32 %v1561_v62, 0.0  ;;  %v689_v2 = vmax.f32 %v1563_v63, 0.0  ;;  %v690_v8 = vmax.f32 %v1565_v0, 0.0 }
 0x1b6   :  { %v926_v23 = vpack.c.bf16 %v659_v1, %v659_v1  ;;  %v927_v18 = vpack.c.bf16 %v660_v5, %v660_v5  ;;  %v928_v19 = vpack.c.bf16 %v661_v7, %v661_v7  ;;  %v929_v27 = vpack.c.bf16 %v662_v10, %v662_v10 }
 0x1b7   :  { %v930_v21 = vpack.c.bf16 %v663_v13, %v663_v13  ;;  %v931_v25 = vpack.c.bf16 %v664_v14, %v664_v14  ;;  %v932_v38 = vpack.c.bf16 %v665_v15, %v665_v15  ;;  %v933_v44 = vpack.c.bf16 %v666_v16, %v666_v16 }
 0x1b8   :  { %v934_v35 = vpack.c.bf16 %v667_v17, %v667_v17  ;;  %v935_v41 = vpack.c.bf16 %v668_v37, %v668_v37  ;;  %v936_v54 = vpack.c.bf16 %v669_v39, %v669_v39  ;;  %v937_v28 = vpack.c.bf16 %v670_v42, %v670_v42  ;;  %820 = vst.msk [vmem:[%s1731_s4] sm:$0xf] %vm819_vm3, %v926_v23 }
 0x1b9   :  { %821 = vst.msk [vmem:[%s1731_s4 + $0x4] sm:$0xf] %vm819_vm3, %v927_v18  ;;  %822 = vst.msk [vmem:[%s1731_s4 + $0x8] sm:$0xf] %vm819_vm3, %v928_v19  ;;  %v938_v29 = vpack.c.bf16 %v671_v45, %v671_v45  ;;  %v939_v30 = vpack.c.bf16 %v672_v46, %v672_v46  ;;  %v940_v31 = vpack.c.bf16 %v673_v47, %v673_v47 }
 0x1ba   :  { %823 = vst.msk [vmem:[%s1731_s4 + $0xc] sm:$0xf] %vm819_vm3, %v929_v27  ;;  %v941_v32 = vpack.c.bf16 %v674_v48, %v674_v48  ;;  %824 = vst.msk [vmem:[%s1731_s4 + $0x10] sm:$0xf] %vm819_vm3, %v930_v21  ;;  %v942_v33 = vpack.c.bf16 %v675_v22, %v675_v22  ;;  %v943_v60 = vpack.c.bf16 %v676_v26, %v676_v26 }
 0x1bb   :  { %825 = vst.msk [vmem:[%s1731_s4 + $0x14] sm:$0xf] %vm819_vm3, %v931_v25  ;;  %826 = vst.msk [vmem:[%s1731_s4 + $0x18] sm:$0xf] %vm819_vm3, %v932_v38  ;;  %v944_v51 = vpack.c.bf16 %v677_v20, %v677_v20  ;;  %v945_v57 = vpack.c.bf16 %v678_v24, %v678_v24  ;;  %v946_v6 = vpack.c.bf16 %v679_v36, %v679_v36 }
 0x1bc   :  { %827 = vst.msk [vmem:[%s1731_s4 + $0x1c] sm:$0xf] %vm819_vm3, %v933_v44  ;;  %828 = vst.msk [vmem:[%s1731_s4 + $0x20] sm:$0xf] %vm819_vm3, %v934_v35  ;;  %v947_v12 = vpack.c.bf16 %v680_v43, %v680_v43  ;;  %v948_v3 = vpack.c.bf16 %v681_v34, %v681_v34  ;;  %v949_v49 = vpack.c.bf16 %v682_v40, %v682_v40 }
 0x1bd   :  { %829 = vst.msk [vmem:[%s1731_s4 + $0x24] sm:$0xf] %vm819_vm3, %v935_v41  ;;  %830 = vst.msk [vmem:[%s1731_s4 + $0x28] sm:$0xf] %vm819_vm3, %v936_v54  ;;  %v950_v9 = vpack.c.bf16 %v683_v52, %v683_v52  ;;  %v951_v53 = vpack.c.bf16 %v684_v59, %v684_v59  ;;  %v952_v55 = vpack.c.bf16 %v685_v50, %v685_v50 }
 0x1be   :  { %831 = vst.msk [vmem:[%s1731_s4 + $0x2c] sm:$0xf] %vm819_vm3, %v937_v28  ;;  %832 = vst.msk [vmem:[%s1731_s4 + $0x30] sm:$0xf] %vm819_vm3, %v938_v29  ;;  %v953_v58 = vpack.c.bf16 %v686_v56, %v686_v56  ;;  %v954_v61 = vpack.c.bf16 %v687_v4, %v687_v4  ;;  %v955_v62 = vpack.c.bf16 %v688_v11, %v688_v11 }
 0x1bf   :  { %833 = vst.msk [vmem:[%s1731_s4 + $0x34] sm:$0xf] %vm819_vm3, %v939_v30  ;;  %834 = vst.msk [vmem:[%s1731_s4 + $0x38] sm:$0xf] %vm819_vm3, %v940_v31  ;;  %v956_v63 = vpack.c.bf16 %v689_v2, %v689_v2  ;;  %v957_v0 = vpack.c.bf16 %v690_v8, %v690_v8 }
 0x1c0   :  { %835 = vst.msk [vmem:[%s1731_s4 + $0x3c] sm:$0xf] %vm819_vm3, %v941_v32  ;;  %836 = vst.msk [vmem:[%s1731_s4 + $0x40] sm:$0xf] %vm819_vm3, %v942_v33 }
 0x1c1   :  { %837 = vst.msk [vmem:[%s1731_s4 + $0x44] sm:$0xf] %vm819_vm3, %v943_v60  ;;  %838 = vst.msk [vmem:[%s1731_s4 + $0x48] sm:$0xf] %vm819_vm3, %v944_v51 }
 0x1c2   :  { %839 = vst.msk [vmem:[%s1731_s4 + $0x4c] sm:$0xf] %vm819_vm3, %v945_v57  ;;  %840 = vst.msk [vmem:[%s1731_s4 + $0x50] sm:$0xf] %vm819_vm3, %v946_v6 }
 0x1c3   :  { %841 = vst.msk [vmem:[%s1731_s4 + $0x54] sm:$0xf] %vm819_vm3, %v947_v12  ;;  %842 = vst.msk [vmem:[%s1731_s4 + $0x58] sm:$0xf] %vm819_vm3, %v948_v3 }
 0x1c4   :  { %843 = vst.msk [vmem:[%s1731_s4 + $0x5c] sm:$0xf] %vm819_vm3, %v949_v49  ;;  %844 = vst.msk [vmem:[%s1731_s4 + $0x60] sm:$0xf] %vm819_vm3, %v950_v9 }
 0x1c5   :  { %845 = vst.msk [vmem:[%s1731_s4 + $0x64] sm:$0xf] %vm819_vm3, %v951_v53  ;;  %846 = vst.msk [vmem:[%s1731_s4 + $0x68] sm:$0xf] %vm819_vm3, %v952_v55 }
 0x1c6   :  { %847 = vst.msk [vmem:[%s1731_s4 + $0x6c] sm:$0xf] %vm819_vm3, %v953_v58  ;;  %848 = vst.msk [vmem:[%s1731_s4 + $0x70] sm:$0xf] %vm819_vm3, %v954_v61 }
 0x1c7   :  { %849 = vst.msk [vmem:[%s1731_s4 + $0x74] sm:$0xf] %vm819_vm3, %v955_v62  ;;  %850 = vst.msk [vmem:[%s1731_s4 + $0x78] sm:$0xf] %vm819_vm3, %v956_v63 }
 0x1c8   :  { %852 = vst.msk [vmem:[%s1731_s4 + $0x7c] sm:$0x1] %vm851_vm4, %v957_v0 }

// kernel: cnn_forward.6
= control target key start
LH: loop header
LB: loop body
LE: loop exit
PB: predicated region body
PF: predicated region fallthrough
CT: control target
= control target key end

     0   :  { %vm1530_vm0 = vcmask 523264   ;;  %vm2119_vm1 = vcmask 285696   ;;  %vm2131_vm2 = vcmask 283648   ;;  %vm2242_vm3 = vcmask 281600   ;;  %s3750_s1 = inlined_call_operand.vmem [shape: bf16[2240,35], index: 1, kind: input, shape index: {}]   ;;  %s3751_s0 = inlined_call_operand.vmem [shape: bf16[54,2240], index: 0, kind: input, shape index: {}]   ;;  %s3752_s2 = inlined_call_operand.vmem [shape: f32[1,35], index: 2, kind: input, shape index: {}]   ;;  %s3753_s3 = inlined_call_operand.vmem [shape: f32[1,35], index: 3, kind: input, shape index: {}]   ;;  %s3754_s4 = inlined_call_operand.vmem [shape: bf16[54,35], index: 4, kind: output, shape index: {}]  }
   0x1   :  { %v2807_v0 = vld [vmem:[%s3750_s1 + $0x40] sm:$0xff]   ;;  %v2809_v2 = vld [vmem:[%s3750_s1 + $0x48] sm:$0xff]   ;;  %v2811_v4 = vld [vmem:[%s3750_s1 + $0x50] sm:$0xff]   ;;  %vm2249_vm4 = vcmask 280576  }
   0x2   :  { %v2808_v1 = vld [vmem:[%s3750_s1] sm:$0xff]   ;;  %2486 = vmatprep.subr.bf16.mxu1 %v2807_v0  ;;  %v2810_v3 = vld [vmem:[%s3750_s1 + $0x8] sm:$0xff]   ;;  %v2812_v5 = vld [vmem:[%s3750_s1 + $0x10] sm:$0xff]  }
   0x3   :  { %2487 = vmatpush3.bf16.msra.mxu1 %v2808_v1  ;;  %v2813_v6 = vld [vmem:[%s3750_s1 + $0x58] sm:$0xff]   ;;  %v2817_v8 = vld [vmem:[%s3750_s1 + $0x140] sm:$0xff]   ;;  %v2821_v12 = vld [vmem:[%s3750_s1 + $0x148] sm:$0xff]  }
   0x4   :  { %2488 = vmatprep.subr.bf16.mxu1 %v2809_v2  ;;  %v2814_v7 = vld [vmem:[%s3750_s1 + $0x18] sm:$0xff]   ;;  %v2815_v9 = vld [vmem:[%s3750_s1 + $0x60] sm:$0xff]   ;;  %2566 = vmatprep.subr.bf16.mxu0 %v2817_v8  ;;  %v2818_v13 = vld [vmem:[%s3750_s1 + $0x68] sm:$0xff]  }
   0x5   :  { %v2819_v10 = vld [vmem:[%s3750_s1 + $0x100] sm:$0xff]   ;;  %v2823_v14 = vld [vmem:[%s3750_s1 + $0x108] sm:$0xff]   ;;  %v2825_v16 = vld [vmem:[%s3750_s1 + $0x150] sm:$0xff]  }
   0x6   :  { %v2816_v11 = vld [vmem:[%s3750_s1 + $0x20] sm:$0xff]   ;;  %2567 = vmatpush3.bf16.msra.mxu0 %v2819_v10  ;;  %v2820_v15 = vld [vmem:[%s3750_s1 + $0x28] sm:$0xff]   ;;  %v2822_v17 = vld [vmem:[%s3750_s1 + $0x70] sm:$0xff]  }
   0x7   :  { %2489 = vmatpush3.bf16.msra.mxu1 %v2810_v3  ;;  %2568 = vmatprep.subr.bf16.mxu0 %v2821_v12  ;;  %v2827_v18 = vld [vmem:[%s3750_s1 + $0x110] sm:$0xff]   ;;  %v2826_v20 = vld [vmem:[%s3750_s1 + $0x78] sm:$0xff]   ;;  %v2831_v21 = vld [vmem:[%s3751_s0 + $0x4] ss:$72 sps:$4 sm:$0xff]  }
   0x8   :  { %2490 = vmatprep.subr.bf16.mxu1 %v2811_v4  ;;  %v2824_v19 = vld [vmem:[%s3750_s1 + $0x30] sm:$0xff]   ;;  %v2832_v22 = vld [vmem:[%s3750_s1 + $0x158] sm:$0xff]   ;;  %1575 = vmatprep.mubr.bf16.mxu1 %v2831_v21  ;;  %v2833_v25 = vld [vmem:[%s3750_s1 + $0xc0] sm:$0xff]  }
   0x9   :  { %v2828_v23 = vld [vmem:[%s3750_s1 + $0x38] sm:$0xff]   ;;  %v2829_v26 = vld [vmem:[%s3751_s0] ss:$72 sps:$4 sm:$0xff]   ;;  %v2844_v36 = vld [vmem:[%s3750_s1 + $0xd0] sm:$0xff]  }
   0xa   :  { %2569 = vmatpush3.bf16.msra.mxu0 %v2823_v14  ;;  %v2834_v24 = vld [vmem:[%s3750_s1 + $0x118] sm:$0xff]   ;;  %v2836_v27 = vld [vmem:[%s3750_s1 + $0x160] sm:$0xff]   ;;  %v2837_v30 = vld [vmem:[%s3750_s1 + $0xc8] sm:$0xff]  }
   0xb   :  { %2491 = vmatpush3.bf16.msra.mxu1 %v2812_v5  ;;  %2570 = vmatprep.subr.bf16.mxu0 %v2825_v16  ;;  %v2835_v28 = vld [vmem:[%s3750_s1 + $0x80] sm:$0xff]   ;;  %v2840_v31 = vld [vmem:[%s3751_s0 + $0x94] ss:$72 sps:$4 sm:$0xff]   ;;  %v2842_v32 = vld [vmem:[%s3750_s1 + $0x168] sm:$0xff]  }
   0xc   :  { %2492 = vmatprep.subr.bf16.mxu1 %v2813_v6  ;;  %v2838_v29 = vld [vmem:[%s3750_s1 + $0x120] sm:$0xff]   ;;  %v2839_v33 = vld [vmem:[%s3750_s1 + $0x88] sm:$0xff]   ;;  %v2843_v35 = vld [vmem:[%s3751_s0 + $0x90] ss:$72 sps:$4 sm:$0xff]  }
   0xd   :  { %v2845_v34 = vld [vmem:[%s3750_s1 + $0x128] sm:$0xff]   ;;  %v2847_v37 = vld [vmem:[%s3750_s1 + $0x170] sm:$0xff]   ;;  %v2848_v40 = vld [vmem:[%s3750_s1 + $0xd8] sm:$0xff]  }
   0xe   :  { %2571 = vmatpush3.bf16.msra.mxu0 %v2827_v18  ;;  %v2846_v38 = vld [vmem:[%s3750_s1 + $0x90] sm:$0xff]   ;;  %v2851_v41 = vld [vmem:[%s3751_s0 + $0x124] ss:$72 sps:$4 sm:$0xff]   ;;  %v2850_v42 = vld [vmem:[%s3750_s1 + $0x98] sm:$0xff]  }
   0xf   :  { %2493 = vmatpush3.bf16.msra.mxu1 %v2814_v7  ;;  %2572 = vmatprep.subr.bf16.mxu0 %v2832_v22  ;;  %v2849_v39 = vld [vmem:[%s3750_s1 + $0x130] sm:$0xff]   ;;  %v2853_v43 = vld [vmem:[%s3750_s1 + $0x178] sm:$0xff]   ;;  %v2855_v44 = vld [vmem:[%s3750_s1 + $0xe0] sm:$0xff]  }
  0x10   :  { %2494 = vmatprep.subr.bf16.mxu1 %v2815_v9  ;;  %v2854_v45 = vld [vmem:[%s3751_s0 + $0x120] ss:$72 sps:$4 sm:$0xff]   ;;  %v2856_v46 = vld [vmem:[%s3750_s1 + $0x138] sm:$0xff]   ;;  %v72_v54 = vld [vmem:[%s3751_s0 + $0x1b0] sm:$0x77] }
  0x11   :  { %v2857_v47 = vld [vmem:[%s3750_s1 + $0xa0] sm:$0xff]   ;;  %v2858_v48 = vld [vmem:[%s3751_s0 + $0x10] ss:$72 sps:$4 sm:$0xff]   ;;  %v2860_v49 = vld [vmem:[%s3751_s0 + $0x14] ss:$72 sps:$4 sm:$0xff]   ;;  %v2310_v55 = vcombine.high %v72_v54, %v72_v54  ;;  %v2309_v58 = vcombine.low %v72_v54, %v72_v54 }
  0x12   :  { %2573 = vmatpush3.bf16.msra.mxu0 %v2834_v24  ;;  %v2861_v50 = vld [vmem:[%s3750_s1 + $0x240] sm:$0xff]   ;;  %1703 = vmatprep.mubr.bf16.mxu0 %v2860_v49  ;;  %v2862_v51 = vld [vmem:[%s3750_s1 + $0xe8] sm:$0xff]   ;;  %v2868_v57 = vld [vmem:[%s3750_s1 + $0xf0] sm:$0xff]  }
  0x13   :  { %2495 = vmatpush3.bf16.msra.mxu1 %v2816_v11  ;;  %2574 = vmatprep.subr.bf16.mxu0 %v2836_v27  ;;  %v2863_v52 = vld [vmem:[%s3750_s1 + $0x200] sm:$0xff]   ;;  %v2864_v53 = vld [vmem:[%s3750_s1 + $0xa8] sm:$0xff]   ;;  %v2870_v60 = vld [vmem:[%s3750_s1 + $0xb0] sm:$0xff]  }
  0x14   :  { %2496 = vmatprep.subr.bf16.mxu1 %v2818_v13  ;;  %v2866_v56 = vld [vmem:[%s3750_s1 + $0x248] sm:$0xff]   ;;  %v2873_v62 = vld [vmem:[%s3750_s1 + $0x250] sm:$0xff]   ;;  %v2874_v63 = vld [vmem:[%s3750_s1 + $0xf8] sm:$0xff]  }
  0x15   :  { %v2869_v59 = vld [vmem:[%s3750_s1 + $0x208] sm:$0xff]   ;;  %v2876_v1 = vld [vmem:[%s3750_s1 + $0x210] sm:$0xff]   ;;  %v2877_v2 = vld [vmem:[%s3750_s1 + $0xb8] sm:$0xff]  }
  0x16   :  { %2575 = vmatpush3.bf16.msra.mxu0 %v2838_v29  ;;  %v2871_v61 = vld [vmem:[%s3751_s0 + $0xa4] ss:$72 sps:$4 sm:$0xff]   ;;  %v2875_v0 = vld [vmem:[%s3751_s0 + $0xa0] ss:$72 sps:$4 sm:$0xff]   ;;  %v2881_v5 = vld [vmem:[%s3750_s1 + $0x258] sm:$0xff]  }
  0x17   :  { %2497 = vmatpush3.bf16.msra.mxu1 %v2820_v15  ;;  %2576 = vmatprep.subr.bf16.mxu0 %v2842_v32  ;;  %v2878_v3 = vld [vmem:[%s3751_s0 + $0x8] ss:$72 sps:$4 sm:$0xff]   ;;  %v2880_v4 = vld [vmem:[%s3751_s0 + $0xc] ss:$72 sps:$4 sm:$0xff]   ;;  %v2882_v6 = vld [vmem:[%s3750_s1 + $0x1c0] sm:$0xff]  }
  0x18   :  { %2498 = vmatprep.subr.bf16.mxu1 %v2822_v17  ;;  %v2883_v7 = vld [vmem:[%s3750_s1 + $0x218] sm:$0xff]   ;;  %v2884_v8 = vld [vmem:[%s3750_s1 + $0x180] sm:$0xff]   ;;  %v2889_v12 = vld [vmem:[%s3750_s1 + $0x1c8] sm:$0xff]  }
  0x19   :  { %v2885_v9 = vld [vmem:[%s3751_s0 + $0x134] ss:$72 sps:$4 sm:$0xff]   ;;  %v2887_v10 = vld [vmem:[%s3750_s1 + $0x260] sm:$0xff]   ;;  %v2888_v11 = vld [vmem:[%s3751_s0 + $0x130] ss:$72 sps:$4 sm:$0xff]  }
  0x1a   :  { %2577 = vmatpush3.bf16.msra.mxu0 %v2845_v34  ;;  %v2890_v13 = vld [vmem:[%s3750_s1 + $0x220] sm:$0xff]   ;;  %v2891_v14 = vld [vmem:[%s3750_s1 + $0x188] sm:$0xff]   ;;  %v2896_v18 = vld [vmem:[%s3750_s1 + $0x1d0] sm:$0xff]  }
  0x1b   :  { %2499 = vmatpush3.bf16.msra.mxu1 %v2824_v19  ;;  %2578 = vmatprep.subr.bf16.mxu0 %v2847_v37  ;;  %v2892_v15 = vld [vmem:[%s3751_s0 + $0x9c] ss:$72 sps:$4 sm:$0xff]   ;;  %v2894_v16 = vld [vmem:[%s3750_s1 + $0x268] sm:$0xff]   ;;  %v2895_v17 = vld [vmem:[%s3751_s0 + $0x98] ss:$72 sps:$4 sm:$0xff]  }
  0x1c   :  { %2500 = vmatprep.subr.bf16.mxu1 %v2826_v20  ;;  %v2897_v19 = vld [vmem:[%s3750_s1 + $0x228] sm:$0xff]   ;;  %v2898_v20 = vld [vmem:[%s3750_s1 + $0x190] sm:$0xff]   ;;  %v74_v21 = vld [vmem:[%s3751_s0 + $0x1c0] sm:$0x77] }
  0x1d   :  { %v2314_v22 = vcombine.high %v74_v21, %v74_v21  ;;  %v2313_v24 = vcombine.low %v74_v21, %v74_v21  ;;  %v2904_v27 = vld [vmem:[%s3750_s1 + $0x198] sm:$0xff]   ;;  %v2912_v34 = vld [vmem:[%s3751_s0 + $0x20] ss:$72 sps:$4 sm:$0xff]  }
  0x1e   :  { %2579 = vmatpush3.bf16.msra.mxu0 %v2849_v39  ;;  %v2907_v29 = vld [vmem:[%s3750_s1 + $0x278] sm:$0xff]   ;;  %v2916_v37 = vld [vmem:[%s3750_s1 + $0x1e8] sm:$0xff]  }
  0x1f   :  { %2501 = vmatpush3.bf16.msra.mxu1 %v2828_v23  ;;  %2580 = vmatprep.subr.bf16.mxu0 %v2853_v43  ;;  %v2900_v23 = vld [vmem:[%s3750_s1 + $0x270] sm:$0xff]   ;;  %v2910_v32 = vld [vmem:[%s3750_s1 + $0x238] sm:$0xff]   ;;  %v2918_v39 = vld [vmem:[%s3750_s1 + $0x1a8] sm:$0xff]  }
  0x20   :  { %2526 = vmatprep.subr.bf16.mxu1 %v2833_v25  ;;  %v2902_v25 = vld [vmem:[%s3750_s1 + $0x1d8] sm:$0xff]  }
  0x21   :  { %v2928_v49 = vld [vmem:[%s3750_s1 + $0x1f8] sm:$0xff]  }
  0x22   :  { %1576 = vmatmul.mubr.bf16.vlgmr.msra.gmra.mrb[0].mxu1 %v2829_v26  ;;  %2581 = vmatpush3.bf16.msra.mxu0 %v2856_v46  ;;  %v2903_v26 = vld [vmem:[%s3750_s1 + $0x230] sm:$0xff]   ;;  %v2934_v54 = vld [vmem:[%s3751_s0 + $0x1c] ss:$72 sps:$4 sm:$0xff]  }
  0x23   :  { %2527 = vmatpush3.bf16.msra.mxu1 %v2835_v28  ;;  %1583 = vmatprep.mubr.bf16.mxu1 %v2840_v31  ;;  %v2905_v28 = vld [vmem:[%s3751_s0 + $0x12c] ss:$72 sps:$4 sm:$0xff]   ;;  %v2909_v31 = vld [vmem:[%s3750_s1 + $0x1e0] sm:$0xff]  }
  0x24   :  { %2528 = vmatprep.subr.bf16.mxu1 %v2837_v30  ;;  %2646 = vmatprep.subr.bf16.mxu0 %v2861_v50  ;;  %v2908_v30 = vld [vmem:[%s3751_s0 + $0x128] ss:$72 sps:$4 sm:$0xff]   ;;  %v2968_v21 = vld [vmem:[%s3751_s0 + $0x34] ss:$72 sps:$4 sm:$0xff]  }
  0x25   :  { %1704 = vmatmul.mubr.bf16.vlgmr.msra.gmra.mrb[0].mxu0 %v2858_v48  ;;  %v2924_v46 = vld [vmem:[%s3750_s1 + $0x1b0] sm:$0xff]  }
  0x26   :  { %2647 = vmatpush3.bf16.msra.mxu0 %v2863_v52  ;;  %1711 = vmatprep.mubr.bf16.mxu0 %v2871_v61  ;;  %v2927_v48 = vld [vmem:[%s3750_s1 + $0x350] sm:$0xff]   ;;  %v2931_v52 = vld [vmem:[%s3750_s1 + $0x1b8] sm:$0xff]   ;;  %v2942_v61 = vld [vmem:[%s3751_s0 + $0x140] ss:$72 sps:$4 sm:$0xff]  }
  0x27   :  { %2529 = vmatpush3.bf16.msra.mxu1 %v2839_v33  ;;  %2648 = vmatprep.subr.bf16.mxu0 %v2866_v56  ;;  %v2911_v33 = vld [vmem:[%s3750_s1 + $0x1a0] sm:$0xff]   ;;  %v2929_v50 = vld [vmem:[%s3751_s0 + $0xb0] ss:$72 sps:$4 sm:$0xff]  }
  0x28   :  { %2530 = vmatprep.subr.bf16.mxu1 %v2844_v36  ;;  %v2915_v36 = vld [vmem:[%s3750_s1 + $0x340] sm:$0xff]  }
  0x29   :  { %v2936_v56 = vld [vmem:[%s3750_s1 + $0x2c0] sm:$0xff]  }
  0x2a   :  { %1584 = vmatmul.mubr.bf16.gmra.mrb[4].mxu1 %v2843_v35  ;;  %2649 = vmatpush3.bf16.msra.mxu0 %v2869_v59  ;;  %v2914_v35 = vld [vmem:[%s3751_s0 + $0x24] ss:$72 sps:$4 sm:$0xff]  }
  0x2b   :  { %2531 = vmatpush3.bf16.msra.mxu1 %v2846_v38  ;;  %1591 = vmatprep.mubr.bf16.mxu1 %v2851_v41  ;;  %v2917_v38 = vld [vmem:[%s3750_s1 + $0x300] sm:$0xff]  }
  0x2c   :  { %2532 = vmatprep.subr.bf16.mxu1 %v2848_v40  ;;  %2650 = vmatprep.subr.bf16.mxu0 %v2873_v62  ;;  %v73_v40 = vld [vmem:[%s3751_s0 + $0x1b8] sm:$0x77]  ;;  %v2939_v59 = vld [vmem:[%s3751_s0 + $0x144] ss:$72 sps:$4 sm:$0xff]  }
  0x2d   :  { %1712 = vmatmul.mubr.bf16.gmra.mrb[4].mxu0 %v2875_v0  ;;  %v2312_v41 = vcombine.high %v73_v40, %v73_v40  ;;  %v2311_v43 = vcombine.low %v73_v40, %v73_v40  ;;  %v2943_v62 = vld [vmem:[%s3750_s1 + $0x2c8] sm:$0xff]  }
  0x2e   :  { %2651 = vmatpush3.bf16.msra.mxu0 %v2876_v1  ;;  %1719 = vmatprep.mubr.bf16.mxu0 %v2885_v9  ;;  %v2945_v0 = vld [vmem:[%s3750_s1 + $0x288] sm:$0xff]   ;;  %v2954_v9 = vld [vmem:[%s3750_s1 + $0x370] sm:$0xff]  }
  0x2f   :  { %2533 = vmatpush3.bf16.msra.mxu1 %v2850_v42  ;;  %2652 = vmatprep.subr.bf16.mxu0 %v2881_v5  ;;  %v2920_v42 = vld [vmem:[%s3750_s1 + $0x348] sm:$0xff]  }
  0x30   :  { %2534 = vmatprep.subr.bf16.mxu1 %v2855_v44  ;;  %v2922_v44 = vld [vmem:[%s3750_s1 + $0x1f0] sm:$0xff]   ;;  %v2951_v5 = vld [vmem:[%s3750_s1 + $0x328] sm:$0xff]  }
  0x31   :  { %v2946_v1 = vld [vmem:[%s3751_s0 + $0xac] ss:$72 sps:$4 sm:$0xff]  }
  0x32   :  { %1592 = vmatmul.mubr.bf16.gmra.mrb[8].mxu1 %v2854_v45  ;;  %2653 = vmatpush3.bf16.msra.mxu0 %v2883_v7  ;;  %v2923_v45 = vld [vmem:[%s3750_s1 + $0x308] sm:$0xff]   ;;  %v76_v7 = vld [vmem:[%s3751_s0 + $0x1d0] sm:$0x77] }
  0x33   :  { %2535 = vmatpush3.bf16.msra.mxu1 %v2857_v47  ;;  %1599 = vmatprep.mubr.bf16.mxu1 %v2310_v55  ;;  %v2925_v47 = vld [vmem:[%s3751_s0 + $0xb4] ss:$72 sps:$4 sm:$0xff]   ;;  %v2986_v40 = vld [vmem:[%s3750_s1 + $0x3c8] sm:$0xff]  }
  0x34   :  { %2536 = vmatprep.subr.bf16.mxu1 %v2862_v51  ;;  %2654 = vmatprep.subr.bf16.mxu0 %v2887_v10  ;;  %v2930_v51 = vld [vmem:[%s3750_s1 + $0x310] sm:$0xff]   ;;  %v2935_v55 = vld [vmem:[%s3750_s1 + $0x358] sm:$0xff]   ;;  %v2317_v10 = vcombine.low %v76_v7, %v76_v7 }
  0x35   :  { %1720 = vmatmul.mubr.bf16.gmra.mrb[8].mxu0 %v2888_v11  ;;  %v2956_v11 = vld [vmem:[%s3750_s1 + $0x2d8] sm:$0xff]  }
  0x36   :  { %2655 = vmatpush3.bf16.msra.mxu0 %v2890_v13  ;;  %1727 = vmatprep.mubr.bf16.mxu0 %v2314_v22  ;;  %v2958_v13 = vld [vmem:[%s3750_s1 + $0x298] sm:$0xff]   ;;  %v3048_v22 = vmov 0  }
  0x37   :  { %2537 = vmatpush3.bf16.msra.mxu1 %v2864_v53  ;;  %2656 = vmatprep.subr.bf16.mxu0 %v2894_v16  ;;  %v2932_v53 = vld [vmem:[%s3751_s0 + $0x18] ss:$72 sps:$4 sm:$0xff]  }
  0x38   :  { %2538 = vmatprep.subr.bf16.mxu1 %v2868_v57  ;;  %v2937_v57 = vld [vmem:[%s3750_s1 + $0x318] sm:$0xff]  }
  0x39   :  { %v2962_v16 = vld [vmem:[%s3751_s0 + $0x138] ss:$72 sps:$4 sm:$0xff]  }
  0x3a   :  { %1600 = vmatmul.mubr.bf16.gmra.mrb[12].mxu1 %v2309_v58  ;;  %2657 = vmatpush3.bf16.msra.mxu0 %v2897_v19  ;;  %v2938_v58 = vld [vmem:[%s3750_s1 + $0x280] sm:$0xff]  }
  0x3b   :  { %2539 = vmatpush3.bf16.msra.mxu1 %v2870_v60  ;;  %1639 = vmatprep.mubr.bf16.mxu1 %v2880_v4  ;;  %v2941_v60 = vld [vmem:[%s3750_s1 + $0x360] sm:$0xff]   ;;  %v2950_v4 = vld [vmem:[%s3750_s1 + $0x2d0] sm:$0xff]  }
  0x3c   :  { %2540 = vmatprep.subr.bf16.mxu1 %v2874_v63  ;;  %2658 = vmatprep.subr.bf16.mxu0 %v2900_v23  ;;  %v2944_v63 = vld [vmem:[%s3750_s1 + $0x320] sm:$0xff]   ;;  %v2969_v23 = vld [vmem:[%s3750_s1 + $0x2e8] sm:$0xff]  }
  0x3d   :  { %1728 = vmatmul.mubr.bf16.gmra.mrb[12].mxu0 %v2313_v24  ;;  %v2965_v19 = vld [vmem:[%s3750_s1 + $0x2a0] sm:$0xff]  }
  0x3e   :  { %2659 = vmatpush3.bf16.msra.mxu0 %v2903_v26  ;;  %1831 = vmatprep.mubr.bf16.mxu0 %v2914_v35  ;;  %v2970_v24 = vld [vmem:[%s3750_s1 + $0x400] sm:$0xff]   ;;  %v75_v26 = vld [vmem:[%s3751_s0 + $0x1c8] sm:$0x77] }
  0x3f   :  { %2541 = vmatpush3.bf16.msra.mxu1 %v2877_v2  ;;  %2660 = vmatprep.subr.bf16.mxu0 %v2907_v29  ;;  %v2948_v2 = vld [vmem:[%s3750_s1 + $0x368] sm:$0xff]   ;;  %v2974_v29 = vld [vmem:[%s3750_s1 + $0x2f0] sm:$0xff]  }
  0x40   :  { %2606 = vmatprep.subr.bf16.mxu1 %v2882_v6  ;;  %v2952_v6 = vld [vmem:[%s3750_s1 + $0x290] sm:$0xff]  }
  0x41   :  { %v2980_v35 = vld [vmem:[%s3751_s0 + $0x28] ss:$72 sps:$4 sm:$0xff]  }
  0x42   :  { %1640 = vmatmul.mubr.bf16.vlgmr.msra.gmra.mrb[16].mxu1 %v2878_v3  ;;  %2661 = vmatpush3.bf16.msra.mxu0 %v2910_v32  ;;  %v2949_v3 = vld [vmem:[%s3751_s0 + $0xa8] ss:$72 sps:$4 sm:$0xff]   ;;  %v2977_v32 = vld [vmem:[%s3750_s1 + $0x2f8] sm:$0xff]  }
  0x43   :  { %2607 = vmatpush3.bf16.msra.mxu1 %v2884_v8  ;;  %1647 = vmatprep.mubr.bf16.mxu1 %v2892_v15  ;;  %v2318_v8 = vcombine.high %v76_v7, %v76_v7  ;;  %v2961_v15 = vld [vmem:[%s3750_s1 + $0x378] sm:$0xff]  }
  0x44   :  { %2608 = vmatprep.subr.bf16.mxu1 %v2889_v12  ;;  %2726 = vmatprep.subr.bf16.mxu0 %v2915_v36  ;;  %v2957_v12 = vld [vmem:[%s3750_s1 + $0x330] sm:$0xff]  }
  0x45   :  { %1832 = vmatmul.mubr.bf16.vlgmr.msra.gmra.mrb[16].mxu0 %v2912_v34  ;;  %v2979_v34 = vld [vmem:[%s3750_s1 + $0x2b8] sm:$0xff]   ;;  %v2982_v36 = vld [vmem:[%s3751_s0 + $0x2c] ss:$72 sps:$4 sm:$0xff]  }
  0x46   :  { %2727 = vmatpush3.bf16.msra.mxu0 %v2917_v38  ;;  %1839 = vmatprep.mubr.bf16.mxu0 %v2925_v47  ;;  %v2984_v38 = vld [vmem:[%s3750_s1 + $0x418] sm:$0xff]   ;;  %v2994_v47 = vld [vmem:[%s3751_s0 + $0xc4] ss:$72 sps:$4 sm:$0xff]  }
  0x47   :  { %2609 = vmatpush3.bf16.msra.mxu1 %v2891_v14  ;;  %2728 = vmatprep.subr.bf16.mxu0 %v2920_v42  ;;  %v2959_v14 = vld [vmem:[%s3751_s0 + $0x13c] ss:$72 sps:$4 sm:$0xff]   ;;  %v2988_v42 = vld [vmem:[%s3750_s1 + $0x388] sm:$0xff]  }
  0x48   :  { %2610 = vmatprep.subr.bf16.mxu1 %v2896_v18  ;;  %v2964_v18 = vld [vmem:[%s3750_s1 + $0x338] sm:$0xff]  }
  0x4a   :  { %1648 = vmatmul.mubr.bf16.gmra.mrb[20].mxu1 %v2895_v17  ;;  %2729 = vmatpush3.bf16.msra.mxu0 %v2923_v45  ;;  %v2963_v17 = vld [vmem:[%s3750_s1 + $0x2e0] sm:$0xff]   ;;  %v2992_v45 = vld [vmem:[%s3750_s1 + $0x3d0] sm:$0xff]  }
  0x4b   :  { %2611 = vmatpush3.bf16.msra.mxu1 %v2898_v20  ;;  %1655 = vmatprep.mubr.bf16.mxu1 %v2905_v28  ;;  %v2966_v20 = vld [vmem:[%s3751_s0 + $0x30] ss:$72 sps:$4 sm:$0xff]   ;;  %v2315_v28 = vcombine.low %v75_v26, %v75_v26 }
  0x4c   :  { %2612 = vmatprep.subr.bf16.mxu1 %v2902_v25  ;;  %2730 = vmatprep.subr.bf16.mxu0 %v2927_v48  ;;  %v2971_v25 = vld [vmem:[%s3750_s1 + $0x2a8] sm:$0xff]   ;;  %v2996_v48 = vld [vmem:[%s3750_s1 + $0x390] sm:$0xff]  }
  0x4d   :  { %1840 = vmatmul.mubr.bf16.gmra.mrb[20].mxu0 %v2929_v50  ;;  %v2998_v50 = vld [vmem:[%s3750_s1 + $0x3d8] sm:$0xff]  }
  0x4e   :  { %2731 = vmatpush3.bf16.msra.mxu0 %v2930_v51  ;;  %1847 = vmatprep.mubr.bf16.mxu0 %v2939_v59  ;;  %v2999_v51 = vld [vmem:[%s3750_s1 + $0x430] sm:$0xff]  }
  0x4f   :  { %2613 = vmatpush3.bf16.msra.mxu1 %v2904_v27  ;;  %2732 = vmatprep.subr.bf16.mxu0 %v2935_v55  ;;  %v2316_v27 = vcombine.high %v75_v26, %v75_v26  ;;  %v3004_v55 = vld [vmem:[%s3750_s1 + $0x3e0] sm:$0xff]   ;;  %v3009_v59 = vld [vmem:[%s3751_s0 + $0x150] ss:$72 sps:$4 sm:$0xff]  }
  0x50   :  { %2614 = vmatprep.subr.bf16.mxu1 %v2909_v31  ;;  %v2976_v31 = vld [vmem:[%s3750_s1 + $0x2b0] sm:$0xff]   ;;  %v3041_v26 = vld [vmem:[%s3751_s0 + $0x160] ss:$72 sps:$4 sm:$0xff]  }
  0x52   :  { %1656 = vmatmul.mubr.bf16.gmra.mrb[24].mxu1 %v2908_v30  ;;  %2733 = vmatpush3.bf16.msra.mxu0 %v2937_v57  ;;  %v2975_v30 = vld [vmem:[%s3750_s1 + $0x408] sm:$0xff]   ;;  %v3006_v57 = vld [vmem:[%s3751_s0 + $0x154] ss:$72 sps:$4 sm:$0xff]  }
  0x53   :  { %2615 = vmatpush3.bf16.msra.mxu1 %v2911_v33  ;;  %1663 = vmatprep.mubr.bf16.mxu1 %v2312_v41  ;;  %v2978_v33 = vld [vmem:[%s3750_s1 + $0x410] sm:$0xff]   ;;  %v2987_v41 = vld [vmem:[%s3750_s1 + $0x420] sm:$0xff]  }
  0x54   :  { %2616 = vmatprep.subr.bf16.mxu1 %v2916_v37  ;;  %2734 = vmatprep.subr.bf16.mxu0 %v2941_v60  ;;  %v2983_v37 = vld [vmem:[%s3750_s1 + $0x3c0] sm:$0xff]   ;;  %v3010_v60 = vld [vmem:[%s3750_s1 + $0x3e8] sm:$0xff]  }
  0x55   :  { %1848 = vmatmul.mubr.bf16.gmra.mrb[24].mxu0 %v2942_v61  ;;  %v3011_v61 = vld [vmem:[%s3750_s1 + $0x440] sm:$0xff]  }
  0x56   :  { %2735 = vmatpush3.bf16.msra.mxu0 %v2944_v63  ;;  %1855 = vmatprep.mubr.bf16.mxu0 %v2318_v8  ;;  %v77_v63 = vld [vmem:[%s3751_s0 + $0x1d8] sm:$0x77] }
  0x57   :  { %2617 = vmatpush3.bf16.msra.mxu1 %v2918_v39  ;;  %2736 = vmatprep.subr.bf16.mxu0 %v2948_v2  ;;  %v2985_v39 = vld [vmem:[%s3750_s1 + $0x380] sm:$0xff]   ;;  %v2319_v2 = vcombine.low %v77_v63, %v77_v63  ;;  %v3020_v8 = vld [vmem:[%s3750_s1 + $0x3f8] sm:$0xff]  }
  0x58   :  { %2618 = vmatprep.subr.bf16.mxu1 %v2922_v44  ;;  %v2991_v44 = vld [vmem:[%s3751_s0 + $0xb8] ss:$72 sps:$4 sm:$0xff]  }
  0x5a   :  { %1664 = vmatmul.mubr.bf16.gmra.mrb[28].mxu1 %v2311_v43  ;;  %2737 = vmatpush3.bf16.msra.mxu0 %v2951_v5  ;;  %v2989_v43 = vld [vmem:[%s3751_s0 + $0xbc] ss:$72 sps:$4 sm:$0xff]  }
  0x5b   :  { %2619 = vmatpush3.bf16.msra.mxu1 %v2924_v46  ;;  %1767 = vmatprep.mubr.bf16.mxu1 %v2934_v54  ;;  %v2993_v46 = vld [vmem:[%s3750_s1 + $0x428] sm:$0xff]  }
  0x5c   :  { %2620 = vmatprep.subr.bf16.mxu1 %v2928_v49  ;;  %2738 = vmatprep.subr.bf16.mxu0 %v2954_v9  ;;  %v2997_v49 = vld [vmem:[%s3751_s0 + $0xc0] ss:$72 sps:$4 sm:$0xff]   ;;  %v3021_v9 = vld [vmem:[%s3750_s1 + $0x450] sm:$0xff]  }
  0x5d   :  { %1856 = vmatmul.mubr.bf16.gmra.mrb[28].mxu0 %v2317_v10  ;;  %v3003_v54 = vld [vmem:[%s3751_s0 + $0x148] ss:$72 sps:$4 sm:$0xff]   ;;  %v3022_v10 = vld [vmem:[%s3750_s1 + $0x3b8] sm:$0xff]  }
  0x5e   :  { %2739 = vmatpush3.bf16.msra.mxu0 %v2957_v12  ;;  %1959 = vmatprep.mubr.bf16.mxu0 %v2968_v21  ;;  %v3023_v12 = vld [vmem:[%s3751_s0 + $0x38] ss:$72 sps:$4 sm:$0xff]   ;;  %v3039_v21 = vld [vmem:[%s3751_s0 + $0x164] ss:$72 sps:$4 sm:$0xff]  }
  0x5f   :  { %2621 = vmatpush3.bf16.msra.mxu1 %v2931_v52  ;;  %2740 = vmatprep.subr.bf16.mxu0 %v2961_v15  ;;  %v3000_v52 = vld [vmem:[%s3750_s1 + $0x398] sm:$0xff]   ;;  %v3030_v15 = vld [vmem:[%s3751_s0 + $0xcc] ss:$72 sps:$4 sm:$0xff]  }
  0x60   :  { %2686 = vmatprep.subr.bf16.mxu1 %v2936_v56  ;;  %v3005_v56 = vld [vmem:[%s3750_s1 + $0x438] sm:$0xff]  }
  0x62   :  { %1768 = vmatmul.mubr.bf16.vlgmr.msra.gmra.mrb[32].mxu1 %v2932_v53  ;;  %2741 = vmatpush3.bf16.msra.mxu0 %v2964_v18  ;;  %v3001_v53 = vld [vmem:[%s3751_s0 + $0x14c] ss:$72 sps:$4 sm:$0xff]   ;;  %v3032_v18 = vld [vmem:[%s3751_s0 + $0xc8] ss:$72 sps:$4 sm:$0xff]  }
  0x63   :  { %2687 = vmatpush3.bf16.msra.mxu1 %v2938_v58  ;;  %1775 = vmatprep.mubr.bf16.mxu1 %v2946_v1  ;;  %v3008_v58 = vld [vmem:[%s3750_s1 + $0x3a0] sm:$0xff]   ;;  %v3015_v1 = vld [vmem:[%s3750_s1 + $0x3f0] sm:$0xff]  }
  0x64   :  { %2688 = vmatprep.subr.bf16.mxu1 %v2943_v62  ;;  %2055 = vmatprep.subr.bf16.mxu0 %v3048_v22  ;;  %v3012_v62 = vld [vmem:[%s3750_s1 + $0x3a8] sm:$0xff]  }
  0x65   :  { %1960 = vmatmul.mubr.bf16.vlgmr.msra.gmra.mrb[32].mxu0 %v2966_v20  ;;  %v3035_v20 = vld [vmem:[%s3751_s0 + $0xd0] ss:$72 sps:$4 sm:$0xff]  }
  0x66   :  { %2056 = vmatpush1.bf16.msra.mxu0 %v2970_v24  ;;  %1967 = vmatprep.mubr.bf16.mxu0 %v2994_v47 }
  0x67   :  { %2689 = vmatpush3.bf16.msra.mxu1 %v2945_v0  ;;  %2057 = vmatprep.subr.bf16.mxu0 %v3048_v22  ;;  %v2320_v0 = vcombine.high %v77_v63, %v77_v63 }
  0x68   :  { %2690 = vmatprep.subr.bf16.mxu1 %v2950_v4  ;;  %v78_v4 = vld [vmem:[%s3751_s0 + $0x1e0] sm:$0x77] }
  0x69   :  { %v2322_v5 = vcombine.high %v78_v4, %v78_v4  ;;  %v2321_v7 = vcombine.low %v78_v4, %v78_v4 }
  0x6a   :  { %1776 = vmatmul.mubr.bf16.gmra.mrb[36].mxu1 %v2949_v3  ;;  %2058 = vmatpush1.bf16.msra.mxu0 %v2975_v30  ;;  %v3016_v3 = vld [vmem:[%s3750_s1 + $0x448] sm:$0xff]  }
  0x6b   :  { %2691 = vmatpush3.bf16.msra.mxu1 %v2952_v6  ;;  %1783 = vmatprep.mubr.bf16.mxu1 %v2959_v14  ;;  %v3018_v6 = vld [vmem:[%s3750_s1 + $0x3b0] sm:$0xff]   ;;  %v3029_v14 = vld [vmem:[%s3751_s0 + $0x44] ss:$72 sps:$4 sm:$0xff]  }
  0x6c   :  { %2692 = vmatprep.subr.bf16.mxu1 %v2956_v11  ;;  %2059 = vmatprep.subr.bf16.mxu0 %v3048_v22  ;;  %v3025_v11 = vld [vmem:[%s3751_s0 + $0x3c] ss:$72 sps:$4 sm:$0xff]  }
  0x6d   :  { %1968 = vmatmul.mubr.bf16.gmra.mrb[36].mxu0 %v2997_v49 }
  0x6e   :  { %2060 = vmatpush1.bf16.msra.mxu0 %v2978_v33  ;;  %1975 = vmatprep.mubr.bf16.mxu0 %v3006_v57 }
  0x6f   :  { %2693 = vmatpush3.bf16.msra.mxu1 %v2958_v13  ;;  %2061 = vmatprep.subr.bf16.mxu0 %v3048_v22  ;;  %v3026_v13 = vld [vmem:[%s3750_s1 + $0x458] sm:$0xff]  }
  0x70   :  { %2694 = vmatprep.subr.bf16.mxu1 %v2963_v17  ;;  %v3033_v17 = vld [vmem:[%s3751_s0 + $0xd4] ss:$72 sps:$4 sm:$0xff]  }
  0x72   :  { %1784 = vmatmul.mubr.bf16.gmra.mrb[40].mxu1 %v2962_v16  ;;  %2062 = vmatpush1.bf16.msra.mxu0 %v2984_v38  ;;  %v3027_v16 = vld [vmem:[%s3751_s0 + $0x40] ss:$72 sps:$4 sm:$0xff]  }
  0x73   :  { %2695 = vmatpush3.bf16.msra.mxu1 %v2965_v19  ;;  %1791 = vmatprep.mubr.bf16.mxu1 %v2316_v27  ;;  %v3036_v19 = vld [vmem:[%s3751_s0 + $0x15c] ss:$72 sps:$4 sm:$0xff]  }
  0x74   :  { %2696 = vmatprep.subr.bf16.mxu1 %v2969_v23  ;;  %2063 = vmatprep.subr.bf16.mxu0 %v3048_v22  ;;  %v3038_v23 = vld [vmem:[%s3751_s0 + $0x158] ss:$72 sps:$4 sm:$0xff]  }
  0x75   :  { %1976 = vmatmul.mubr.bf16.gmra.mrb[40].mxu0 %v3009_v59 }
  0x76   :  { %2064 = vmatpush1.bf16.msra.mxu0 %v2987_v41  ;;  %1983 = vmatprep.mubr.bf16.mxu0 %v2322_v5 }
  0x77   :  { %2697 = vmatpush3.bf16.msra.mxu1 %v2971_v25  ;;  %2065 = vmatprep.subr.bf16.mxu0 %v3048_v22  ;;  %v80_v25 = vld [vmem:[%s3751_s0 + $0x1f0] sm:$0x77] }
  0x78   :  { %2698 = vmatprep.subr.bf16.mxu1 %v2974_v29  ;;  %v2326_v27 = vcombine.high %v80_v25, %v80_v25  ;;  %v2325_v29 = vcombine.low %v80_v25, %v80_v25 }
  0x7a   :  { %1792 = vmatmul.mubr.bf16.gmra.mrb[44].mxu1 %v2315_v28  ;;  %2066 = vmatpush1.bf16.msra.mxu0 %v2993_v46 }
  0x7b   :  { %2699 = vmatpush3.bf16.msra.mxu1 %v2976_v31  ;;  %1895 = vmatprep.mubr.bf16.mxu1 %v2982_v36 }
  0x7c   :  { %2700 = vmatprep.subr.bf16.mxu1 %v2977_v32  ;;  %2067 = vmatprep.subr.bf16.mxu0 %v3048_v22 }
  0x7d   :  { %1984 = vmatmul.mubr.bf16.gmra.mrb[44].mxu0 %v2321_v7 }
  0x7e   :  { %2068 = vmatpush1.bf16.msra.mxu0 %v2999_v51  ;;  %2467 = vmatprep.mubr.msk.bf16.mxu0 %vm1530_vm0, %v3029_v14 }
  0x7f   :  { %2701 = vmatpush3.bf16.msra.mxu1 %v2979_v34  ;;  %2069 = vmatprep.subr.bf16.mxu0 %v3048_v22 }
  0x80   :  { %2766 = vmatprep.subr.bf16.mxu1 %v2983_v37 }
  0x82   :  { %1896 = vmatmul.mubr.bf16.vlgmr.msra.gmra.mrb[48].mxu1 %v2980_v35  ;;  %2070 = vmatpush1.bf16.msra.mxu0 %v3005_v56 }
  0x83   :  { %2767 = vmatpush3.bf16.msra.mxu1 %v2985_v39  ;;  %1903 = vmatprep.mubr.bf16.mxu1 %v2989_v43 }
  0x84   :  { %2768 = vmatprep.subr.bf16.mxu1 %v2986_v40  ;;  %2071 = vmatprep.subr.bf16.mxu0 %v3048_v22 }
  0x86   :  { %2072 = vmatpush1.bf16.msra.mxu0 %v3011_v61 }
  0x87   :  { %2769 = vmatpush3.bf16.msra.mxu1 %v2988_v42  ;;  %2073 = vmatprep.subr.bf16.mxu0 %v3048_v22 }
  0x88   :  { %2770 = vmatprep.subr.bf16.mxu1 %v2992_v45 }
  0x8a   :  { %1904 = vmatmul.mubr.bf16.gmra.mrb[52].mxu1 %v2991_v44  ;;  %2074 = vmatpush1.bf16.msra.mxu0 %v3016_v3 }
  0x8b   :  { %2771 = vmatpush3.bf16.msra.mxu1 %v2996_v48  ;;  %1911 = vmatprep.mubr.bf16.mxu1 %v3001_v53 }
  0x8c   :  { %2772 = vmatprep.subr.bf16.mxu1 %v2998_v50  ;;  %2075 = vmatprep.subr.bf16.mxu0 %v3048_v22 }
  0x8e   :  { %2076 = vmatpush1.bf16.msra.mxu0 %v3021_v9 }
  0x8f   :  { %2773 = vmatpush3.bf16.msra.mxu1 %v3000_v52  ;;  %2077 = vmatprep.subr.bf16.mxu0 %v3048_v22  ;;  %v79_v22 = vld [vmem:[%s3751_s0 + $0x1e8] sm:$0x77] }
  0x90   :  { %2774 = vmatprep.subr.bf16.mxu1 %v3004_v55  ;;  %v2324_v24 = vcombine.high %v79_v22, %v79_v22  ;;  %v2323_v28 = vcombine.low %v79_v22, %v79_v22 }
  0x92   :  { %1912 = vmatmul.mubr.bf16.gmra.mrb[56].mxu1 %v3003_v54  ;;  %2078 = vmatpush1.bf16.msra.mxu0 %v3026_v13 }
  0x93   :  { %2775 = vmatpush3.bf16.msra.mxu1 %v3008_v58  ;;  %1919 = vmatprep.mubr.bf16.mxu1 %v2320_v0 }
  0x94   :  { %2776 = vmatprep.subr.bf16.mxu1 %v3010_v60 }
  0x95   :  { %2088 = vmatmul.mubr.bf16.vlgmr.msra.gmra.mrb[48].mxu0 %v3027_v16 }
  0x96   :  { %2468 = vmatprep.mubr.msk.bf16.mxu0 %vm1530_vm0, %v3033_v17 }
  0x97   :  { %2777 = vmatpush3.bf16.msra.mxu1 %v3012_v62 }
  0x98   :  { %2778 = vmatprep.subr.bf16.mxu1 %v3015_v1 }
  0x9a   :  { %1920 = vmatmul.mubr.bf16.gmra.mrb[60].mxu1 %v2319_v2 }
  0x9b   :  { %2779 = vmatpush3.bf16.msra.mxu1 %v3018_v6  ;;  %2023 = vmatprep.mubr.bf16.mxu1 %v3025_v11 }
  0x9c   :  { %2780 = vmatprep.subr.bf16.mxu1 %v3020_v8 }
  0x9d   :  { %2096 = vmatmul.mubr.bf16.gmra.mrb[52].mxu0 %v3035_v20 }
  0x9e   :  { %2469 = vmatprep.mubr.msk.bf16.mxu0 %vm1530_vm0, %v3039_v21 }
  0x9f   :  { %2781 = vmatpush3.bf16.msra.mxu1 %v3022_v10 }
  0xa2   :  { %2024 = vmatmul.mubr.bf16.vlgmr.msra.gmra.mrb[64].mxu1 %v3023_v12 }
  0xa3   :  { %2031 = vmatprep.mubr.bf16.mxu1 %v3030_v15 }
  0xa5   :  { %2104 = vmatmul.mubr.bf16.gmra.mrb[56].mxu0 %v3041_v26 }
  0xa6   :  { %2470 = vmatprep.mubr.msk.bf16.mxu0 %vm1530_vm0, %v2326_v27 }
  0xaa   :  { %2032 = vmatmul.mubr.bf16.gmra.mrb[68].mxu1 %v3032_v18 }
  0xab   :  { %2039 = vmatprep.mubr.bf16.mxu1 %v3036_v19 }
  0xad   :  { %2112 = vmatmul.mubr.bf16.gmra.mrb[60].mxu0 %v2325_v29 }
  0xb2   :  { %2040 = vmatmul.mubr.bf16.gmra.mrb[72].mxu1 %v3038_v23 }
  0xb3   :  { %2047 = vmatprep.mubr.bf16.mxu1 %v2324_v24 }
  0xba   :  { %2048 = vmatmul.mubr.bf16.gmra.mrb[76].mxu1 %v2323_v28 }
  0xf5   :  { %v2502_v30 = vpop.f32.mrb[0].mxu1 }
  0xf6   :  { %v2503_v31 = vpop.f32.mrb[1].mxu1 }
  0xf7   :  { %v2504_v32 = vadd.f32 %v2503_v31, %v2502_v30  ;;  %v2505_v33 = vpop.f32.mrb[2].mxu1 }
  0xf8   :  { %v2506_v34 = vpop.f32.mrb[3].mxu1  ;;  %v2582_v44 = vpop.f32.mrb[0].mxu0 }
  0xf9   :  { %v2507_v35 = vadd.f32 %v2506_v34, %v2505_v33  ;;  %v2583_v47 = vpop.f32.mrb[1].mxu0 }
  0xfa   :  { %v2584_v49 = vadd.f32 %v2583_v47, %v2582_v44  ;;  %v2585_v50 = vpop.f32.mrb[2].mxu0 }
  0xfb   :  { %v2586_v52 = vpop.f32.mrb[3].mxu0 }
  0xfc   :  { %v2587_v53 = vadd.f32 %v2586_v52, %v2585_v50 }
  0xfd   :  { %v2508_v36 = vpop.f32.mrb[4].mxu1 }
  0xfe   :  { %v2509_v37 = vpop.f32.mrb[5].mxu1 }
  0xff   :  { %v2510_v38 = vadd.f32 %v2509_v37, %v2508_v36  ;;  %v2511_v39 = vpop.f32.mrb[6].mxu1 }
 0x100   :  { %v2512_v40 = vpop.f32.mrb[7].mxu1  ;;  %v2588_v58 = vpop.f32.mrb[4].mxu0 }
 0x101   :  { %v2513_v41 = vadd.f32 %v2512_v40, %v2511_v39  ;;  %v2589_v60 = vpop.f32.mrb[5].mxu0 }
 0x102   :  { %v2590_v61 = vadd.f32 %v2589_v60, %v2588_v58  ;;  %v2591_v62 = vpop.f32.mrb[6].mxu0 }
 0x103   :  { %v2592_v63 = vpop.f32.mrb[7].mxu0 }
 0x104   :  { %v2593_v0 = vadd.f32 %v2592_v63, %v2591_v62 }
 0x105   :  { %v2514_v42 = vpop.f32.mrb[8].mxu1 }
 0x106   :  { %v2515_v43 = vpop.f32.mrb[9].mxu1 }
 0x107   :  { %v2516_v45 = vadd.f32 %v2515_v43, %v2514_v42  ;;  %v2517_v46 = vpop.f32.mrb[10].mxu1 }
 0x108   :  { %v2518_v48 = vpop.f32.mrb[11].mxu1  ;;  %v2594_v8 = vpop.f32.mrb[8].mxu0 }
 0x109   :  { %v2519_v51 = vadd.f32 %v2518_v48, %v2517_v46  ;;  %v2595_v9 = vpop.f32.mrb[9].mxu0 }
 0x10a   :  { %v2596_v11 = vadd.f32 %v2595_v9, %v2594_v8  ;;  %v2597_v12 = vpop.f32.mrb[10].mxu0 }
 0x10b   :  { %v2598_v14 = vpop.f32.mrb[11].mxu0 }
 0x10c   :  { %v2599_v15 = vadd.f32 %v2598_v14, %v2597_v12 }
 0x10d   :  { %v2520_v54 = vpop.f32.mrb[12].mxu1 }
 0x10e   :  { %v2521_v55 = vpop.f32.mrb[13].mxu1 }
 0x10f   :  { %v2522_v56 = vadd.f32 %v2521_v55, %v2520_v54  ;;  %v2523_v57 = vpop.f32.mrb[14].mxu1 }
 0x110   :  { %v2524_v59 = vpop.f32.mrb[15].mxu1  ;;  %v2600_v25 = vpop.f32.mrb[12].mxu0 }
 0x111   :  { %v2601_v27 = vpop.f32.mrb[13].mxu0 }
 0x112   :  { %v2602_v28 = vadd.f32 %v2601_v27, %v2600_v25  ;;  %v2603_v29 = vpop.f32.mrb[14].mxu0 }
 0x113   :  { %v2604_v31 = vpop.f32.mrb[15].mxu0 }
 0x115   :  { %v2542_v1 = vpop.f32.mrb[16].mxu1 }
 0x116   :  { %v2543_v2 = vpop.f32.mrb[17].mxu1 }
 0x117   :  { %v2544_v3 = vadd.f32 %v2543_v2, %v2542_v1  ;;  %v2545_v4 = vpop.f32.mrb[18].mxu1 }
 0x118   :  { %v2546_v5 = vpop.f32.mrb[19].mxu1  ;;  %v2662_v40 = vpop.f32.mrb[16].mxu0 }
 0x119   :  { %v1642_v6 = vadd.f32 %v2544_v3, %v2504_v32  ;;  %v2547_v7 = vadd.f32 %v2546_v5, %v2545_v4  ;;  %v2663_v43 = vpop.f32.mrb[17].mxu0 }
 0x11a   :  { %v2664_v44 = vadd.f32 %v2663_v43, %v2662_v40 }
 0x11b   :  { %v1645_v10 = vadd.f32 %v2547_v7, %v2507_v35  ;;  %v1706_v13 = vadd.f32 %v2584_v49, %v1642_v6 }
 0x11d   :  { %v1709_v16 = vadd.f32 %v2587_v53, %v1645_v10  ;;  %v2548_v17 = vpop.f32.mrb[20].mxu1 }
 0x11e   :  { %v2549_v18 = vpop.f32.mrb[21].mxu1 }
 0x11f   :  { %v2550_v19 = vadd.f32 %v2549_v18, %v2548_v17  ;;  %v2551_v20 = vpop.f32.mrb[22].mxu1 }
 0x120   :  { %v2552_v21 = vpop.f32.mrb[23].mxu1 }
 0x121   :  { %v1650_v22 = vadd.f32 %v2550_v19, %v2510_v38  ;;  %v2553_v23 = vadd.f32 %v2552_v21, %v2551_v20 }
 0x123   :  { %v1653_v24 = vadd.f32 %v2553_v23, %v2513_v41  ;;  %v1714_v26 = vadd.f32 %v2590_v61, %v1650_v22  ;;  %v2665_v41 = vpop.f32.mrb[18].mxu0 }
 0x124   :  { %v2666_v46 = vpop.f32.mrb[19].mxu0 }
 0x125   :  { %v1717_v30 = vadd.f32 %v2593_v0, %v1653_v24  ;;  %v2554_v32 = vpop.f32.mrb[24].mxu1  ;;  %v2667_v48 = vadd.f32 %v2666_v46, %v2665_v41  ;;  %v2668_v57 = vpop.f32.mrb[20].mxu0 }
 0x126   :  { %v2555_v33 = vpop.f32.mrb[25].mxu1  ;;  %v2669_v58 = vpop.f32.mrb[21].mxu0 }
 0x127   :  { %v2556_v34 = vadd.f32 %v2555_v33, %v2554_v32  ;;  %v2557_v35 = vpop.f32.mrb[26].mxu1  ;;  %v2671_v60 = vpop.f32.mrb[22].mxu0 }
 0x128   :  { %v2558_v36 = vpop.f32.mrb[27].mxu1  ;;  %v2672_v61 = vpop.f32.mrb[23].mxu0 }
 0x129   :  { %v1658_v37 = vadd.f32 %v2556_v34, %v2516_v45  ;;  %v2559_v39 = vadd.f32 %v2558_v36, %v2557_v35  ;;  %v2670_v45 = vadd.f32 %v2669_v58, %v2668_v57  ;;  %v2674_v5 = vpop.f32.mrb[24].mxu0 }
 0x12a   :  { %v2675_v7 = vpop.f32.mrb[25].mxu0 }
 0x12b   :  { %v1661_v42 = vadd.f32 %v2559_v39, %v2519_v51  ;;  %v1722_v38 = vadd.f32 %v2596_v11, %v1658_v37  ;;  %v2673_v51 = vadd.f32 %v2672_v61, %v2671_v60  ;;  %v2676_v9 = vadd.f32 %v2675_v7, %v2674_v5 }
 0x12d   :  { %v1725_v47 = vadd.f32 %v2599_v15, %v1661_v42  ;;  %v2560_v49 = vpop.f32.mrb[28].mxu1 }
 0x12e   :  { %v2561_v50 = vpop.f32.mrb[29].mxu1 }
 0x12f   :  { %v2562_v52 = vadd.f32 %v2561_v50, %v2560_v49  ;;  %v2563_v53 = vpop.f32.mrb[30].mxu1 }
 0x130   :  { %v2564_v54 = vpop.f32.mrb[31].mxu1 }
 0x131   :  { %v1666_v55 = vadd.f32 %v2562_v52, %v2522_v56  ;;  %v2677_v56 = vpop.f32.mrb[26].mxu0 }
 0x132   :  { %v2678_v10 = vpop.f32.mrb[27].mxu0 }
 0x133   :  { %v1730_v59 = vadd.f32 %v2602_v28, %v1666_v55  ;;  %v2679_v12 = vadd.f32 %v2678_v10, %v2677_v56  ;;  %v2680_v22 = vpop.f32.mrb[28].mxu0 }
 0x135   :  { %v2622_v62 = vpop.f32.mrb[32].mxu1 }
 0x136   :  { %v2623_v63 = vpop.f32.mrb[33].mxu1 }
 0x137   :  { %v2624_v0 = vadd.f32 %v2623_v63, %v2622_v62  ;;  %v2625_v1 = vpop.f32.mrb[34].mxu1 }
 0x138   :  { %v2626_v2 = vpop.f32.mrb[35].mxu1 }
 0x139   :  { %v1770_v3 = vadd.f32 %v2624_v0, %v1706_v13  ;;  %v2627_v4 = vadd.f32 %v2626_v2, %v2625_v1  ;;  %v2681_v13 = vpop.f32.mrb[29].mxu0 }
 0x13a   :  { %v2682_v25 = vadd.f32 %v2681_v13, %v2680_v22 }
 0x13b   :  { %v1773_v6 = vadd.f32 %v2627_v4, %v1709_v16  ;;  %v1834_v8 = vadd.f32 %v2664_v44, %v1770_v3  ;;  %v2683_v16 = vpop.f32.mrb[30].mxu0 }
 0x13c   :  { %v2684_v27 = vpop.f32.mrb[31].mxu0 }
 0x13d   :  { %v1837_v11 = vadd.f32 %v2667_v48, %v1773_v6  ;;  %v2628_v14 = vpop.f32.mrb[36].mxu1  ;;  %v2742_v37 = vpop.f32.mrb[32].mxu0 }
 0x13e   :  { %v2629_v15 = vpop.f32.mrb[37].mxu1  ;;  %v2743_v40 = vpop.f32.mrb[33].mxu0 }
 0x13f   :  { %v2630_v17 = vadd.f32 %v2629_v15, %v2628_v14  ;;  %v2631_v18 = vpop.f32.mrb[38].mxu1  ;;  %v2744_v42 = vadd.f32 %v2743_v40, %v2742_v37  ;;  %v2745_v43 = vpop.f32.mrb[34].mxu0 }
 0x140   :  { %v2632_v19 = vpop.f32.mrb[39].mxu1 }
 0x141   :  { %v1778_v20 = vadd.f32 %v2630_v17, %v1714_v26  ;;  %v2633_v21 = vadd.f32 %v2632_v19, %v2631_v18 }
 0x143   :  { %v1781_v23 = vadd.f32 %v2633_v21, %v1717_v30  ;;  %v1842_v24 = vadd.f32 %v2670_v45, %v1778_v20  ;;  %v2746_v30 = vpop.f32.mrb[35].mxu0 }
 0x144   :  { %v2747_v41 = vadd.f32 %v2746_v30, %v2745_v43  ;;  %v2748_v1 = vpop.f32.mrb[36].mxu0 }
 0x145   :  { %v1845_v28 = vadd.f32 %v2673_v51, %v1781_v23  ;;  %v2634_v29 = vpop.f32.mrb[40].mxu1  ;;  %v2749_v4 = vpop.f32.mrb[37].mxu0 }
 0x146   :  { %v2635_v31 = vpop.f32.mrb[41].mxu1  ;;  %v2750_v6 = vadd.f32 %v2749_v4, %v2748_v1 }
 0x147   :  { %v2636_v32 = vadd.f32 %v2635_v31, %v2634_v29  ;;  %v2637_v33 = vpop.f32.mrb[42].mxu1 }
 0x148   :  { %v2638_v34 = vpop.f32.mrb[43].mxu1 }
 0x149   :  { %v1786_v35 = vadd.f32 %v2636_v32, %v1722_v38  ;;  %v2639_v36 = vadd.f32 %v2638_v34, %v2637_v33 }
 0x14b   :  { %v1789_v39 = vadd.f32 %v2639_v36, %v1725_v47  ;;  %v1850_v26 = vadd.f32 %v2676_v9, %v1786_v35 }
 0x14d   :  { %v1853_v44 = vadd.f32 %v2679_v12, %v1789_v39  ;;  %v2640_v46 = vpop.f32.mrb[44].mxu1 }
 0x14e   :  { %v2641_v48 = vpop.f32.mrb[45].mxu1 }
 0x14f   :  { %v2642_v49 = vadd.f32 %v2641_v48, %v2640_v46  ;;  %v2643_v50 = vpop.f32.mrb[46].mxu1 }
 0x150   :  { %v2644_v52 = vpop.f32.mrb[47].mxu1 }
 0x151   :  { %v1794_v53 = vadd.f32 %v2642_v49, %v1730_v59  ;;  %v2751_v59 = vpop.f32.mrb[38].mxu0 }
 0x152   :  { %v2752_v56 = vpop.f32.mrb[39].mxu0 }
 0x153   :  { %v1858_v54 = vadd.f32 %v2682_v25, %v1794_v53  ;;  %v2753_v10 = vadd.f32 %v2752_v56, %v2751_v59  ;;  %v2754_v19 = vpop.f32.mrb[40].mxu0 }
 0x154   :  { %v2755_v21 = vpop.f32.mrb[41].mxu0 }
 0x155   :  { %v2702_v55 = vpop.f32.mrb[48].mxu1  ;;  %v2756_v13 = vadd.f32 %v2755_v21, %v2754_v19  ;;  %v2757_v25 = vpop.f32.mrb[42].mxu0 }
 0x156   :  { %v2703_v57 = vpop.f32.mrb[49].mxu1  ;;  %v2758_v16 = vpop.f32.mrb[43].mxu0 }
 0x157   :  { %v2704_v38 = vadd.f32 %v2703_v57, %v2702_v55  ;;  %v2705_v58 = vpop.f32.mrb[50].mxu1  ;;  %v2759_v29 = vadd.f32 %v2758_v16, %v2757_v25  ;;  %v2760_v35 = vpop.f32.mrb[44].mxu0 }
 0x158   :  { %v2706_v45 = vpop.f32.mrb[51].mxu1  ;;  %v2761_v37 = vpop.f32.mrb[45].mxu0 }
 0x159   :  { %v1898_v47 = vadd.f32 %v2704_v38, %v1834_v8  ;;  %v2707_v60 = vadd.f32 %v2706_v45, %v2705_v58  ;;  %v2762_v40 = vadd.f32 %v2761_v37, %v2760_v35 }
 0x15b   :  { %v1901_v61 = vadd.f32 %v2707_v60, %v1837_v11  ;;  %v1962_v51 = vadd.f32 %v2744_v42, %v1898_v47  ;;  %v2763_v42 = vpop.f32.mrb[46].mxu0 }
 0x15c   :  { %v2764_v43 = vpop.f32.mrb[47].mxu0 }
 0x15d   :  { %v2708_v62 = vpop.f32.mrb[52].mxu1  ;;  %v1965_v63 = vadd.f32 %v2747_v41, %v1901_v61 }
 0x15e   :  { %v2709_v0 = vpop.f32.mrb[53].mxu1 }
 0x15f   :  { %v2710_v2 = vadd.f32 %v2709_v0, %v2708_v62  ;;  %v2711_v3 = vpop.f32.mrb[54].mxu1 }
 0x160   :  { %v2712_v5 = vpop.f32.mrb[55].mxu1 }
 0x161   :  { %v1906_v7 = vadd.f32 %v2710_v2, %v1842_v24  ;;  %v2713_v9 = vadd.f32 %v2712_v5, %v2711_v3 }
 0x163   :  { %v1909_v12 = vadd.f32 %v2713_v9, %v1845_v28  ;;  %v1970_v14 = vadd.f32 %v2750_v6, %v1906_v7 }
 0x165   :  { %v1973_v8 = vadd.f32 %v2753_v10, %v1909_v12  ;;  %v2714_v15 = vpop.f32.mrb[56].mxu1 }
 0x166   :  { %v2715_v11 = vpop.f32.mrb[57].mxu1 }
 0x167   :  { %v2716_v17 = vadd.f32 %v2715_v11, %v2714_v15  ;;  %v2717_v18 = vpop.f32.mrb[58].mxu1 }
 0x168   :  { %v2718_v20 = vpop.f32.mrb[59].mxu1  ;;  %v2089_v49 = vpop.f32.mrb[48].mxu0 }
 0x169   :  { %v1914_v22 = vadd.f32 %v2716_v17, %v1850_v26  ;;  %v2719_v23 = vadd.f32 %v2718_v20, %v2717_v18  ;;  %v2091_v53 = vpop.f32.mrb[49].mxu0 }
 0x16a   :  { %v2092_v55 = vpop.f32.mrb[50].mxu0 }
 0x16b   :  { %v1917_v27 = vadd.f32 %v2719_v23, %v1853_v44  ;;  %v1978_v24 = vadd.f32 %v2756_v13, %v1914_v22  ;;  %v2094_v58 = vpop.f32.mrb[51].mxu0 }
 0x16d   :  { %v1981_v31 = vadd.f32 %v2759_v29, %v1917_v27  ;;  %v2720_v32 = vpop.f32.mrb[60].mxu1 }
 0x16e   :  { %v2721_v28 = vpop.f32.mrb[61].mxu1 }
 0x16f   :  { %v2722_v33 = vadd.f32 %v2721_v28, %v2720_v32  ;;  %v2723_v34 = vpop.f32.mrb[62].mxu1 }
 0x170   :  { %v2724_v36 = vpop.f32.mrb[63].mxu1 }
 0x171   :  { %v1922_v39 = vadd.f32 %v2722_v33, %v1858_v54 }
 0x173   :  { %v1986_v26 = vadd.f32 %v2762_v40, %v1922_v39 }
 0x175   :  { %v2782_v30 = vpop.f32.mrb[64].mxu1 }
 0x176   :  { %v2783_v41 = vpop.f32.mrb[65].mxu1 }
 0x177   :  { %v2784_v46 = vadd.f32 %v2783_v41, %v2782_v30  ;;  %v2785_v48 = vpop.f32.mrb[66].mxu1 }
 0x178   :  { %v2786_v44 = vpop.f32.mrb[67].mxu1 }
 0x179   :  { %v2787_v50 = vadd.f32 %v2786_v44, %v2785_v48  ;;  %v2026_v52 = vadd.f32 %v2784_v46, %v1962_v51  ;;  %v2097_v51 = vpop.f32.mrb[52].mxu0 }
 0x17a   :  { %v2099_v5 = vpop.f32.mrb[53].mxu0 }
 0x17b   :  { %v3699_v57 = vadd.f32 %v2089_v49, %v2026_v52  ;;  %v2029_v38 = vadd.f32 %v2787_v50, %v1965_v63  ;;  %v2100_v6 = vpop.f32.mrb[54].mxu0 }
 0x17c   :  { %v2102_v7 = vpop.f32.mrb[55].mxu0 }
 0x17d   :  { %v2093_v54 = vadd.f32 %v2092_v55, %v2029_v38  ;;  %v2788_v45 = vpop.f32.mrb[68].mxu1  ;;  %v2120_v60 = vsel %vm2119_vm1, %v3699_v57, 0.0  ;;  %v2105_v21 = vpop.f32.mrb[56].mxu0 }
 0x17e   :  { %v2789_v47 = vpop.f32.mrb[69].mxu1  ;;  %v2107_v23 = vpop.f32.mrb[57].mxu0 }
 0x17f   :  { %v2121_v61 = vsel %vm2119_vm1, %v2093_v54, 0.0  ;;  %v2790_v62 = vadd.f32 %v2789_v47, %v2788_v45  ;;  %v2791_v0 = vpop.f32.mrb[70].mxu1  ;;  %v2108_v13 = vpop.f32.mrb[58].mxu0 }
 0x180   :  { %v2122_v1 = vadd.f32 %v2121_v61, %v2120_v60  ;;  %v2792_v2 = vpop.f32.mrb[71].mxu1  ;;  %v2110_v16 = vpop.f32.mrb[59].mxu0 }
 0x181   :  { %v2793_v3 = vadd.f32 %v2792_v2, %v2791_v0  ;;  %v2034_v4 = vadd.f32 %v2790_v62, %v1970_v14  ;;  %v2113_v40 = vpop.f32.mrb[60].mxu0 }
 0x183   :  { %v2098_v63 = vadd.f32 %v2097_v51, %v2034_v4  ;;  %v2037_v59 = vadd.f32 %v2793_v3, %v1973_v8 }
 0x185   :  { %v2123_v9 = vsel %vm2119_vm1, %v2098_v63, 0.0  ;;  %v2101_v56 = vadd.f32 %v2100_v6, %v2037_v59  ;;  %v2794_v10 = vpop.f32.mrb[72].mxu1 }
 0x186   :  { %v2124_v12 = vadd.f32 %v2123_v9, %v2122_v1  ;;  %v2795_v15 = vpop.f32.mrb[73].mxu1 }
 0x187   :  { %v2125_v11 = vsel %vm2119_vm1, %v2101_v56, 0.0  ;;  %v2796_v17 = vadd.f32 %v2795_v15, %v2794_v10  ;;  %v2797_v18 = vpop.f32.mrb[74].mxu1 }
 0x188   :  { %v2126_v19 = vadd.f32 %v2125_v11, %v2124_v12  ;;  %v2798_v20 = vpop.f32.mrb[75].mxu1 }
 0x189   :  { %v2799_v22 = vadd.f32 %v2798_v20, %v2797_v18  ;;  %v2042_v14 = vadd.f32 %v2796_v17, %v1978_v24  ;;  %v2115_v24 = vpop.f32.mrb[61].mxu0 }
 0x18a   :  { %v2116_v43 = vpop.f32.mrb[62].mxu0 }
 0x18b   :  { %v2106_v25 = vadd.f32 %v2105_v21, %v2042_v14  ;;  %v2045_v8 = vadd.f32 %v2799_v22, %v1981_v31  ;;  %v2117_v31 = vpop.f32.mrb[63].mxu0 }
 0x18d   :  { %v2127_v27 = vsel %vm2119_vm1, %v2106_v25, 0.0  ;;  %v2109_v29 = vadd.f32 %v2108_v13, %v2045_v8  ;;  %v2800_v32 = vpop.f32.mrb[76].mxu1  ;;  %v2180_v13 = vlaneseq  ;;  %v2175_v8 = vld [vmem:[%s3752_s2] sm:$0x1] }
 0x18e   :  { %v2128_v28 = vadd.f32 %v2127_v27, %v2126_v19  ;;  %v2801_v33 = vpop.f32.mrb[77].mxu1 }
 0x18f   :  { %v2129_v34 = vsel %vm2119_vm1, %v2109_v29, 0.0  ;;  %v2802_v35 = vadd.f32 %v2801_v33, %v2800_v32  ;;  %v2803_v36 = vpop.f32.mrb[78].mxu1 }
 0x190   :  { %v2130_v37 = vadd.f32 %v2129_v34, %v2128_v28  ;;  %v2804_v39 = vpop.f32.mrb[79].mxu1  ;;  %v2471_v28 = vld [vmem:[%s3753_s3] ss:$0 sm:$0xff] }
 0x191   :  { %v2050_v42 = vadd.f32 %v2802_v35, %v1986_v26 }
 0x193   :  { %v2114_v30 = vadd.f32 %v2113_v40, %v2050_v42 }
 0x195   :  { %v2132_v41 = vsel %vm2131_vm2, %v2114_v30, 0.0 }
 0x196   :  { %v2133_v46 = vadd.f32 %v2132_v41, %v2130_v37 }
 0x198   :  { %v2134_v48 = vrot.slane %v2133_v46, 4 }
 0x19a   :  { %v2135_v44 = vadd.f32 %v2134_v48, %v2133_v46 }
 0x19c   :  { %v2136_v49 = vrot.slane %v2135_v44, 2 }
 0x19e   :  { %v2137_v50 = vadd.f32 %v2136_v49, %v2135_v44 }
 0x1a0   :  { %v2138_v52 = vrot.slane %v2137_v50, 1 }
 0x1a2   :  { %v2139_v53 = vadd.f32 %v2138_v52, %v2137_v50 }
 0x1a4   :  { %v2140_v55 = vmul.f32 0.018518519, %v2139_v53 }
 0x1a6   :  { %v2141_v38 = vsub.f32 %v3699_v57, %v2140_v55  ;;  %v2142_v58 = vsub.f32 %v2093_v54, %v2140_v55  ;;  %v2143_v45 = vsub.f32 %v2098_v63, %v2140_v55  ;;  %v2144_v26 = vsub.f32 %v2101_v56, %v2140_v55 }
 0x1a7   :  { %v2145_v47 = vsub.f32 %v2106_v25, %v2140_v55  ;;  %v2146_v60 = vsub.f32 %v2109_v29, %v2140_v55  ;;  %v2147_v61 = vsub.f32 %v2114_v30, %v2140_v55  ;;  %v2181_v25 = vshrl.u32 %v2180_v13, 7 }
 0x1a8   :  { %v2148_v62 = vmul.f32 %v2141_v38, %v2141_v38  ;;  %v2149_v0 = vmul.f32 %v2142_v58, %v2142_v58  ;;  %v2150_v1 = vmul.f32 %v2143_v45, %v2143_v45  ;;  %v2151_v2 = vmul.f32 %v2144_v26, %v2144_v26 }
 0x1a9   :  { %v2152_v5 = vmul.f32 %v2145_v47, %v2145_v47  ;;  %v2153_v57 = vmul.f32 %v2146_v60, %v2146_v60  ;;  %v2154_v7 = vmul.f32 %v2147_v61, %v2147_v61  ;;  %v2182_v16 = vsub.s32 0, %v2181_v25 }
 0x1aa   :  { %v2155_v51 = vsel %vm2119_vm1, %v2148_v62, 0.0  ;;  %v2156_v3 = vsel %vm2119_vm1, %v2149_v0, 0.0  ;;  %v2158_v6 = vsel %vm2119_vm1, %v2150_v1, 0.0  ;;  %v2160_v54 = vsel %vm2119_vm1, %v2151_v2, 0.0 }
 0x1ab   :  { %v2157_v4 = vadd.f32 %v2156_v3, %v2155_v51  ;;  %v2162_v9 = vsel %vm2119_vm1, %v2152_v5, 0.0  ;;  %v2164_v10 = vsel %vm2119_vm1, %v2153_v57, 0.0  ;;  %v2166_v15 = vsel %vm2131_vm2, %v2154_v7, 0.0 }
 0x1ad   :  { %v2159_v59 = vadd.f32 %v2158_v6, %v2157_v4 }
 0x1af   :  { %v2161_v63 = vadd.f32 %v2160_v54, %v2159_v59 }
 0x1b1   :  { %v2163_v56 = vadd.f32 %v2162_v9, %v2161_v63 }
 0x1b3   :  { %v2165_v12 = vadd.f32 %v2164_v10, %v2163_v56 }
 0x1b5   :  { %v2167_v11 = vadd.f32 %v2166_v15, %v2165_v12 }
 0x1b7   :  { %v2168_v17 = vrot.slane %v2167_v11, 4 }
 0x1b9   :  { %v2169_v18 = vadd.f32 %v2168_v17, %v2167_v11 }
 0x1bb   :  { %v2170_v19 = vrot.slane %v2169_v18, 2 }
 0x1bd   :  { %v2171_v20 = vadd.f32 %v2170_v19, %v2169_v18 }
 0x1bf   :  { %v2172_v21 = vrot.slane %v2171_v20, 1 }
 0x1c1   :  { %v2173_v22 = vadd.f32 %v2172_v21, %v2171_v20 }
 0x1c3   :  { %v2174_v14 = vmul.f32 0.018518519, %v2173_v22 }
 0x1c5   :  { %v2176_v23 = vadd.f32 1e-05, %v2174_v14 }
 0x1c7   :  { %3046 = vrsqrt.f32 %v2176_v23 }
 0x1d1   :  { %v3047_v27 = vpop.eup %3046 }
 0x1d2   :  { %v2178_v29 = vmul.f32 %v3047_v27, %v2175_v8 }
 0x1d4   :  { %v2183_v32 = vrot.slane %v2178_v29, %v2182_v16 }
 0x1d6   :  { %v2185_v33 = vmul.f32 %v2183_v32, %v2141_v38  ;;  %v2186_v34 = vmul.f32 %v2183_v32, %v2142_v58  ;;  %v2187_v35 = vmul.f32 %v2183_v32, %v2143_v45  ;;  %v2188_v36 = vmul.f32 %v2183_v32, %v2144_v26 }
 0x1d7   :  { %v2189_v37 = vmul.f32 %v2183_v32, %v2145_v47  ;;  %v2190_v39 = vmul.f32 %v2183_v32, %v2146_v60  ;;  %v2191_v40 = vmul.f32 %v2183_v32, %v2147_v61 }
 0x1d8   :  { %v2199_v42 = vadd.f32 %v2471_v28, %v2185_v33  ;;  %v2200_v24 = vadd.f32 %v2471_v28, %v2186_v34  ;;  %v2201_v43 = vadd.f32 %v2471_v28, %v2187_v35  ;;  %v2202_v30 = vadd.f32 %v2471_v28, %v2188_v36 }
 0x1d9   :  { %v2203_v31 = vadd.f32 %v2471_v28, %v2189_v37  ;;  %v2204_v41 = vadd.f32 %v2471_v28, %v2190_v39  ;;  %v2205_v46 = vadd.f32 %v2471_v28, %v2191_v40 }
 0x1da   :  { %v2206_v48 = vmax.f32 %v2199_v42, 0.0  ;;  %v2207_v44 = vmax.f32 %v2200_v24, 0.0  ;;  %v2208_v49 = vmax.f32 %v2201_v43, 0.0  ;;  %v2209_v50 = vmax.f32 %v2202_v30, 0.0 }
 0x1db   :  { %v2210_v52 = vmax.f32 %v2203_v31, 0.0  ;;  %v2211_v53 = vmax.f32 %v2204_v41, 0.0  ;;  %v2212_v55 = vmax.f32 %v2205_v46, 0.0 }
 0x1dc   :  { %v2479_v38 = vpack.c.bf16 %v2206_v48, %v2206_v48  ;;  %v2480_v58 = vpack.c.bf16 %v2207_v44, %v2207_v44  ;;  %v2481_v45 = vpack.c.bf16 %v2208_v49, %v2208_v49  ;;  %v2482_v26 = vpack.c.bf16 %v2209_v50, %v2209_v50 }
 0x1dd   :  { %v2483_v47 = vpack.c.bf16 %v2210_v52, %v2210_v52  ;;  %v2484_v60 = vpack.c.bf16 %v2211_v53, %v2211_v53  ;;  %v2485_v61 = vpack.c.bf16 %v2212_v55, %v2212_v55 }
 0x1de   :  { %2243 = vst.msk [vmem:[%s3754_s4] sm:$0xf] %vm2242_vm3, %v2479_v38  ;;  %2244 = vst.msk [vmem:[%s3754_s4 + $0x4] sm:$0xf] %vm2242_vm3, %v2480_v58 }
 0x1df   :  { %2245 = vst.msk [vmem:[%s3754_s4 + $0x8] sm:$0xf] %vm2242_vm3, %v2481_v45  ;;  %2246 = vst.msk [vmem:[%s3754_s4 + $0xc] sm:$0xf] %vm2242_vm3, %v2482_v26 }
 0x1e0   :  { %2247 = vst.msk [vmem:[%s3754_s4 + $0x10] sm:$0xf] %vm2242_vm3, %v2483_v47  ;;  %2248 = vst.msk [vmem:[%s3754_s4 + $0x14] sm:$0xf] %vm2242_vm3, %v2484_v60 }
 0x1e1   :  { %2250 = vst.msk [vmem:[%s3754_s4 + $0x18] sm:$0x7] %vm2249_vm4, %v2485_v61 }

// kernel: cnn_forward.7
= control target key start
LH: loop header
LB: loop body
LE: loop exit
PB: predicated region body
PF: predicated region fallthrough
CT: control target
= control target key end

     0   :  { %vm1245_vm0 = vcmask 523264   ;;  %vm1618_vm1 = vcmask 285696   ;;  %vm1674_vm2 = vcmask 281600   ;;  %s2719_s1 = inlined_call_operand.vmem [shape: bf16[2240,35], index: 1, kind: input, shape index: {}]   ;;  %s2720_s0 = inlined_call_operand.vmem [shape: bf16[16,2240], index: 0, kind: input, shape index: {}]   ;;  %s2721_s2 = inlined_call_operand.vmem [shape: f32[1,35], index: 2, kind: input, shape index: {}]   ;;  %s2722_s3 = inlined_call_operand.vmem [shape: f32[1,35], index: 3, kind: input, shape index: {}]   ;;  %s2723_s4 = inlined_call_operand.vmem [shape: bf16[16,35], index: 4, kind: output, shape index: {}]  }
   0x1   :  { %v2022_v0 = vld [vmem:[%s2719_s1 + $0x40] sm:$0xff]   ;;  %v2024_v2 = vld [vmem:[%s2719_s1 + $0x48] sm:$0xff]   ;;  %v2026_v4 = vld [vmem:[%s2719_s1 + $0x50] sm:$0xff]  }
   0x2   :  { %v2023_v1 = vld [vmem:[%s2719_s1] sm:$0xff]   ;;  %1845 = vmatprep.subr.bf16.mxu1 %v2022_v0  ;;  %v2025_v3 = vld [vmem:[%s2719_s1 + $0x8] sm:$0xff]   ;;  %v2027_v5 = vld [vmem:[%s2719_s1 + $0x10] sm:$0xff]  }
   0x3   :  { %1846 = vmatpush3.bf16.msra.mxu1 %v2023_v1  ;;  %v2028_v6 = vld [vmem:[%s2719_s1 + $0x58] sm:$0xff]   ;;  %v2032_v8 = vld [vmem:[%s2719_s1 + $0x140] sm:$0xff]   ;;  %v2036_v12 = vld [vmem:[%s2719_s1 + $0x148] sm:$0xff]  }
   0x4   :  { %1847 = vmatprep.subr.bf16.mxu1 %v2024_v2  ;;  %v2029_v7 = vld [vmem:[%s2719_s1 + $0x18] sm:$0xff]   ;;  %v2033_v9 = vld [vmem:[%s2719_s1 + $0x100] sm:$0xff]   ;;  %1889 = vmatprep.subr.bf16.mxu0 %v2032_v8  ;;  %v2037_v13 = vld [vmem:[%s2719_s1 + $0x108] sm:$0xff]  }
   0x5   :  { %v2030_v10 = vld [vmem:[%s2719_s1 + $0x60] sm:$0xff]   ;;  %1890 = vmatpush3.bf16.msra.mxu0 %v2033_v9  ;;  %v2034_v14 = vld [vmem:[%s2719_s1 + $0x68] sm:$0xff]   ;;  %v2040_v16 = vld [vmem:[%s2719_s1 + $0x150] sm:$0xff]  }
   0x6   :  { %v2031_v11 = vld [vmem:[%s2719_s1 + $0x20] sm:$0xff]   ;;  %1891 = vmatprep.subr.bf16.mxu0 %v2036_v12  ;;  %v2035_v15 = vld [vmem:[%s2719_s1 + $0x28] sm:$0xff]   ;;  %v2041_v17 = vld [vmem:[%s2719_s1 + $0x110] sm:$0xff]  }
   0x7   :  { %1848 = vmatpush3.bf16.msra.mxu1 %v2025_v3  ;;  %v2038_v18 = vld [vmem:[%s2719_s1 + $0x70] sm:$0xff]   ;;  %v2044_v20 = vld [vmem:[%s2719_s1 + $0x158] sm:$0xff]   ;;  %v2047_v22 = vld [vmem:[%s2720_s0 + $0x4] ss:$72 sps:$4 sm:$0xff]  }
   0x8   :  { %1849 = vmatprep.subr.bf16.mxu1 %v2026_v4  ;;  %v2039_v19 = vld [vmem:[%s2719_s1 + $0x30] sm:$0xff]   ;;  %v2042_v21 = vld [vmem:[%s2719_s1 + $0x78] sm:$0xff]   ;;  %1281 = vmatprep.mubr.bf16.mxu1 %v2047_v22  ;;  %v2049_v25 = vld [vmem:[%s2719_s1 + $0xc0] sm:$0xff]  }
   0x9   :  { %1892 = vmatpush3.bf16.msra.mxu0 %v2037_v13  ;;  %v2048_v23 = vld [vmem:[%s2719_s1 + $0x118] sm:$0xff]   ;;  %v2045_v26 = vld [vmem:[%s2720_s0] ss:$72 sps:$4 sm:$0xff]   ;;  %v2057_v34 = vld [vmem:[%s2719_s1 + $0xd0] sm:$0xff]  }
   0xa   :  { %1893 = vmatprep.subr.bf16.mxu0 %v2040_v16  ;;  %v2043_v24 = vld [vmem:[%s2719_s1 + $0x38] sm:$0xff]   ;;  %v2051_v27 = vld [vmem:[%s2719_s1 + $0x160] sm:$0xff]   ;;  %v2053_v30 = vld [vmem:[%s2719_s1 + $0xc8] sm:$0xff]  }
   0xb   :  { %1850 = vmatpush3.bf16.msra.mxu1 %v2027_v5  ;;  %v2052_v28 = vld [vmem:[%s2719_s1 + $0x120] sm:$0xff]   ;;  %v2055_v31 = vld [vmem:[%s2719_s1 + $0x168] sm:$0xff]   ;;  %v2059_v35 = vld [vmem:[%s2719_s1 + $0x170] sm:$0xff]  }
   0xc   :  { %1851 = vmatprep.subr.bf16.mxu1 %v2028_v6  ;;  %v2050_v29 = vld [vmem:[%s2719_s1 + $0x80] sm:$0xff]   ;;  %v2056_v32 = vld [vmem:[%s2719_s1 + $0x128] sm:$0xff]   ;;  %v2060_v36 = vld [vmem:[%s2719_s1 + $0x130] sm:$0xff]  }
   0xd   :  { %1894 = vmatpush3.bf16.msra.mxu0 %v2041_v17  ;;  %v2054_v33 = vld [vmem:[%s2719_s1 + $0x88] sm:$0xff]   ;;  %v2058_v37 = vld [vmem:[%s2719_s1 + $0x90] sm:$0xff]   ;;  %v2061_v38 = vld [vmem:[%s2719_s1 + $0xd8] sm:$0xff]  }
   0xe   :  { %1895 = vmatprep.subr.bf16.mxu0 %v2044_v20  ;;  %v2063_v39 = vld [vmem:[%s2719_s1 + $0x178] sm:$0xff]   ;;  %v2065_v42 = vld [vmem:[%s2719_s1 + $0xe0] sm:$0xff]   ;;  %v2072_v48 = vld [vmem:[%s2719_s1 + $0xe8] sm:$0xff]  }
   0xf   :  { %1852 = vmatpush3.bf16.msra.mxu1 %v2029_v7  ;;  %v2064_v40 = vld [vmem:[%s2719_s1 + $0x138] sm:$0xff]   ;;  %v2070_v45 = vld [vmem:[%s2719_s1 + $0x240] sm:$0xff]   ;;  %v2074_v49 = vld [vmem:[%s2719_s1 + $0x248] sm:$0xff]  }
  0x10   :  { %1853 = vmatprep.subr.bf16.mxu1 %v2030_v10  ;;  %v2062_v41 = vld [vmem:[%s2719_s1 + $0x98] sm:$0xff]   ;;  %v2071_v46 = vld [vmem:[%s2719_s1 + $0x200] sm:$0xff]   ;;  %v2075_v50 = vld [vmem:[%s2719_s1 + $0x208] sm:$0xff]  }
  0x11   :  { %1896 = vmatpush3.bf16.msra.mxu0 %v2048_v23  ;;  %v2067_v43 = vld [vmem:[%s2720_s0 + $0x10] ss:$72 sps:$4 sm:$0xff]   ;;  %v2069_v44 = vld [vmem:[%s2720_s0 + $0x14] ss:$72 sps:$4 sm:$0xff]   ;;  %v2066_v47 = vld [vmem:[%s2719_s1 + $0xa0] sm:$0xff]  }
  0x12   :  { %1897 = vmatprep.subr.bf16.mxu0 %v2051_v27  ;;  %1363 = vmatprep.mubr.bf16.mxu0 %v2069_v44  ;;  %v2073_v51 = vld [vmem:[%s2719_s1 + $0xa8] sm:$0xff]   ;;  %v2076_v52 = vld [vmem:[%s2719_s1 + $0xf0] sm:$0xff]   ;;  %v2080_v56 = vld [vmem:[%s2719_s1 + $0xf8] sm:$0xff]  }
  0x13   :  { %1854 = vmatpush3.bf16.msra.mxu1 %v2031_v11  ;;  %v2078_v53 = vld [vmem:[%s2719_s1 + $0x250] sm:$0xff]   ;;  %v2082_v57 = vld [vmem:[%s2719_s1 + $0x258] sm:$0xff]   ;;  %v2087_v62 = vld [vmem:[%s2719_s1 + $0x1c0] sm:$0xff]  }
  0x14   :  { %1855 = vmatprep.subr.bf16.mxu1 %v2034_v14  ;;  %v2079_v54 = vld [vmem:[%s2719_s1 + $0x210] sm:$0xff]   ;;  %v2081_v58 = vld [vmem:[%s2719_s1 + $0xb8] sm:$0xff]   ;;  %v2088_v63 = vld [vmem:[%s2719_s1 + $0x180] sm:$0xff]  }
  0x15   :  { %1898 = vmatpush3.bf16.msra.mxu0 %v2052_v28  ;;  %v2077_v55 = vld [vmem:[%s2719_s1 + $0xb0] sm:$0xff]   ;;  %v2086_v60 = vld [vmem:[%s2719_s1 + $0x218] sm:$0xff]   ;;  %v2089_v0 = vld [vmem:[%s2719_s1 + $0x260] sm:$0xff]  }
  0x16   :  { %1899 = vmatprep.subr.bf16.mxu0 %v2055_v31  ;;  %v2085_v59 = vld [vmem:[%s2720_s0 + $0xc] ss:$72 sps:$4 sm:$0xff]   ;;  %v2083_v61 = vld [vmem:[%s2720_s0 + $0x8] ss:$72 sps:$4 sm:$0xff]   ;;  %v2090_v1 = vld [vmem:[%s2719_s1 + $0x220] sm:$0xff]  }
  0x17   :  { %1856 = vmatpush3.bf16.msra.mxu1 %v2035_v15  ;;  %v2091_v2 = vld [vmem:[%s2719_s1 + $0x1c8] sm:$0xff]   ;;  %v2095_v6 = vld [vmem:[%s2719_s1 + $0x1d0] sm:$0xff]   ;;  %v2099_v10 = vld [vmem:[%s2719_s1 + $0x1d8] sm:$0xff]  }
  0x18   :  { %1857 = vmatprep.subr.bf16.mxu1 %v2038_v18  ;;  %v2092_v3 = vld [vmem:[%s2719_s1 + $0x188] sm:$0xff]   ;;  %v2096_v7 = vld [vmem:[%s2719_s1 + $0x190] sm:$0xff]   ;;  %v2100_v11 = vld [vmem:[%s2719_s1 + $0x198] sm:$0xff]  }
  0x19   :  { %1900 = vmatpush3.bf16.msra.mxu0 %v2056_v32  ;;  %v2093_v4 = vld [vmem:[%s2719_s1 + $0x268] sm:$0xff]   ;;  %v2097_v8 = vld [vmem:[%s2719_s1 + $0x270] sm:$0xff]   ;;  %v2101_v12 = vld [vmem:[%s2719_s1 + $0x278] sm:$0xff]  }
  0x1a   :  { %1901 = vmatprep.subr.bf16.mxu0 %v2059_v35  ;;  %v2094_v5 = vld [vmem:[%s2719_s1 + $0x228] sm:$0xff]   ;;  %v2098_v9 = vld [vmem:[%s2719_s1 + $0x230] sm:$0xff]   ;;  %v2102_v13 = vld [vmem:[%s2719_s1 + $0x238] sm:$0xff]  }
  0x1b   :  { %1858 = vmatpush3.bf16.msra.mxu1 %v2039_v19  ;;  %v2103_v14 = vld [vmem:[%s2719_s1 + $0x1e0] sm:$0xff]   ;;  %v2110_v20 = vld [vmem:[%s2719_s1 + $0x1e8] sm:$0xff]   ;;  %v2117_v27 = vld [vmem:[%s2719_s1 + $0x310] sm:$0xff]  }
  0x1c   :  { %1859 = vmatprep.subr.bf16.mxu1 %v2042_v21  ;;  %v2104_v15 = vld [vmem:[%s2719_s1 + $0x1a0] sm:$0xff]   ;;  %v2111_v21 = vld [vmem:[%s2719_s1 + $0x1a8] sm:$0xff]   ;;  %v2118_v28 = vld [vmem:[%s2719_s1 + $0x1f8] sm:$0xff]  }
  0x1d   :  { %1902 = vmatpush3.bf16.msra.mxu0 %v2060_v36  ;;  %v2105_v16 = vld [vmem:[%s2720_s0 + $0x20] ss:$72 sps:$4 sm:$0xff]   ;;  %v2107_v17 = vld [vmem:[%s2720_s0 + $0x24] ss:$72 sps:$4 sm:$0xff]   ;;  %v2135_v44 = vld [vmem:[%s2719_s1 + $0x370] sm:$0xff]  }
  0x1e   :  { %1903 = vmatprep.subr.bf16.mxu0 %v2063_v39  ;;  %v2108_v18 = vld [vmem:[%s2719_s1 + $0x340] sm:$0xff]   ;;  %v2112_v22 = vld [vmem:[%s2719_s1 + $0x348] sm:$0xff]  }
  0x1f   :  { %1860 = vmatpush3.bf16.msra.mxu1 %v2043_v24  ;;  %v2109_v19 = vld [vmem:[%s2719_s1 + $0x300] sm:$0xff]   ;;  %v2113_v23 = vld [vmem:[%s2719_s1 + $0x308] sm:$0xff]   ;;  %v2114_v24 = vld [vmem:[%s2719_s1 + $0x1f0] sm:$0xff]  }
  0x20   :  { %1867 = vmatprep.subr.bf16.mxu1 %v2049_v25  ;;  %v2115_v25 = vld [vmem:[%s2719_s1 + $0x1b0] sm:$0xff]   ;;  %v2121_v31 = vld [vmem:[%s2720_s0 + $0x18] ss:$72 sps:$4 sm:$0xff]   ;;  %v2123_v32 = vld [vmem:[%s2720_s0 + $0x1c] ss:$72 sps:$4 sm:$0xff]  }
  0x21   :  { %1904 = vmatpush3.bf16.msra.mxu0 %v2064_v40  ;;  %v2126_v35 = vld [vmem:[%s2719_s1 + $0x280] sm:$0xff]   ;;  %v2130_v39 = vld [vmem:[%s2719_s1 + $0x288] sm:$0xff]  }
  0x22   :  { %1282 = vmatmul.mubr.bf16.vlgmr.msra.gmra.mrb[0].mxu1 %v2045_v26  ;;  %1933 = vmatprep.subr.bf16.mxu0 %v2070_v45  ;;  %v2116_v26 = vld [vmem:[%s2719_s1 + $0x350] sm:$0xff]   ;;  %v2127_v36 = vld [vmem:[%s2719_s1 + $0x360] sm:$0xff]   ;;  %v2131_v40 = vld [vmem:[%s2719_s1 + $0x368] sm:$0xff]  }
  0x23   :  { %1868 = vmatpush3.bf16.msra.mxu1 %v2050_v29  ;;  %1322 = vmatprep.mubr.bf16.mxu1 %v2085_v59  ;;  %v2119_v29 = vld [vmem:[%s2719_s1 + $0x1b8] sm:$0xff]   ;;  %v2136_v45 = vld [vmem:[%s2719_s1 + $0x330] sm:$0xff]  }
  0x24   :  { %1869 = vmatprep.subr.bf16.mxu1 %v2053_v30  ;;  %1364 = vmatmul.mubr.bf16.vlgmr.msra.gmra.mrb[0].mxu0 %v2067_v43  ;;  %v2120_v30 = vld [vmem:[%s2719_s1 + $0x358] sm:$0xff]   ;;  %v2134_v43 = vld [vmem:[%s2719_s1 + $0x290] sm:$0xff]  }
  0x25   :  { %1934 = vmatpush3.bf16.msra.mxu0 %v2071_v46  ;;  %1445 = vmatprep.mubr.bf16.mxu0 %v2107_v17  ;;  %v2137_v46 = vld [vmem:[%s2719_s1 + $0x2d8] sm:$0xff]   ;;  %v2150_v59 = vld [vmem:[%s2719_s1 + $0x2f0] sm:$0xff]   ;;  %v2174_v17 = vld [vmem:[%s2719_s1 + $0x3e8] sm:$0xff]  }
  0x26   :  { %1935 = vmatprep.subr.bf16.mxu0 %v2074_v49  ;;  %v2140_v49 = vld [vmem:[%s2719_s1 + $0x338] sm:$0xff]  }
  0x27   :  { %1870 = vmatpush3.bf16.msra.mxu1 %v2054_v33  ;;  %v2124_v33 = vld [vmem:[%s2719_s1 + $0x318] sm:$0xff]  }
  0x28   :  { %1871 = vmatprep.subr.bf16.mxu1 %v2057_v34  ;;  %v2125_v34 = vld [vmem:[%s2719_s1 + $0x2c0] sm:$0xff]  }
  0x29   :  { %1936 = vmatpush3.bf16.msra.mxu0 %v2075_v50  ;;  %v2141_v50 = vld [vmem:[%s2719_s1 + $0x2e0] sm:$0xff]  }
  0x2a   :  { %1937 = vmatprep.subr.bf16.mxu0 %v2078_v53  ;;  %v2145_v53 = vld [vmem:[%s2720_s0 + $0x34] ss:$72 sps:$4 sm:$0xff]  }
  0x2b   :  { %1872 = vmatpush3.bf16.msra.mxu1 %v2058_v37  ;;  %v2128_v37 = vld [vmem:[%s2719_s1 + $0x320] sm:$0xff]  }
  0x2c   :  { %1873 = vmatprep.subr.bf16.mxu1 %v2061_v38  ;;  %v2129_v38 = vld [vmem:[%s2719_s1 + $0x2c8] sm:$0xff]  }
  0x2d   :  { %1938 = vmatpush3.bf16.msra.mxu0 %v2079_v54  ;;  %v2191_v54 = vmov 0  }
  0x2e   :  { %1939 = vmatprep.subr.bf16.mxu0 %v2082_v57  ;;  %v2148_v57 = vld [vmem:[%s2719_s1 + $0x2a8] sm:$0xff]  }
  0x2f   :  { %1874 = vmatpush3.bf16.msra.mxu1 %v2062_v41  ;;  %v2132_v41 = vld [vmem:[%s2719_s1 + $0x328] sm:$0xff]  }
  0x30   :  { %1875 = vmatprep.subr.bf16.mxu1 %v2065_v42  ;;  %v2133_v42 = vld [vmem:[%s2719_s1 + $0x2d0] sm:$0xff]  }
  0x31   :  { %1940 = vmatpush3.bf16.msra.mxu0 %v2086_v60  ;;  %v2151_v60 = vld [vmem:[%s2719_s1 + $0x2b0] sm:$0xff]  }
  0x32   :  { %1941 = vmatprep.subr.bf16.mxu0 %v2089_v0  ;;  %v2155_v0 = vld [vmem:[%s2720_s0 + $0x28] ss:$72 sps:$4 sm:$0xff]  }
  0x33   :  { %1876 = vmatpush3.bf16.msra.mxu1 %v2066_v47  ;;  %v2138_v47 = vld [vmem:[%s2719_s1 + $0x298] sm:$0xff]  }
  0x34   :  { %1877 = vmatprep.subr.bf16.mxu1 %v2072_v48  ;;  %v2139_v48 = vld [vmem:[%s2719_s1 + $0x378] sm:$0xff]  }
  0x35   :  { %1942 = vmatpush3.bf16.msra.mxu0 %v2090_v1  ;;  %v2157_v1 = vld [vmem:[%s2720_s0 + $0x2c] ss:$72 sps:$4 sm:$0xff]  }
  0x36   :  { %1943 = vmatprep.subr.bf16.mxu0 %v2093_v4  ;;  %v2160_v4 = vld [vmem:[%s2719_s1 + $0x380] sm:$0xff]  }
  0x37   :  { %1878 = vmatpush3.bf16.msra.mxu1 %v2073_v51  ;;  %v2142_v51 = vld [vmem:[%s2719_s1 + $0x2a0] sm:$0xff]  }
  0x38   :  { %1879 = vmatprep.subr.bf16.mxu1 %v2076_v52  ;;  %v2143_v52 = vld [vmem:[%s2720_s0 + $0x30] ss:$72 sps:$4 sm:$0xff]  }
  0x39   :  { %1944 = vmatpush3.bf16.msra.mxu0 %v2094_v5  ;;  %v2161_v5 = vld [vmem:[%s2719_s1 + $0x420] sm:$0xff]  }
  0x3a   :  { %1945 = vmatprep.subr.bf16.mxu0 %v2097_v8  ;;  %v2165_v8 = vld [vmem:[%s2719_s1 + $0x3d0] sm:$0xff]  }
  0x3b   :  { %1880 = vmatpush3.bf16.msra.mxu1 %v2077_v55  ;;  %v2146_v55 = vld [vmem:[%s2719_s1 + $0x400] sm:$0xff]  }
  0x3c   :  { %1881 = vmatprep.subr.bf16.mxu1 %v2080_v56  ;;  %v2147_v56 = vld [vmem:[%s2719_s1 + $0x2e8] sm:$0xff]  }
  0x3d   :  { %1946 = vmatpush3.bf16.msra.mxu0 %v2098_v9  ;;  %v2164_v9 = vld [vmem:[%s2719_s1 + $0x428] sm:$0xff]  }
  0x3e   :  { %1947 = vmatprep.subr.bf16.mxu0 %v2101_v12  ;;  %v2167_v12 = vld [vmem:[%s2719_s1 + $0x430] sm:$0xff]  }
  0x3f   :  { %1882 = vmatpush3.bf16.msra.mxu1 %v2081_v58  ;;  %v2149_v58 = vld [vmem:[%s2719_s1 + $0x408] sm:$0xff]  }
  0x40   :  { %1911 = vmatprep.subr.bf16.mxu1 %v2087_v62  ;;  %v2153_v62 = vld [vmem:[%s2719_s1 + $0x2f8] sm:$0xff]  }
  0x41   :  { %1948 = vmatpush3.bf16.msra.mxu0 %v2102_v13  ;;  %v2169_v13 = vld [vmem:[%s2719_s1 + $0x398] sm:$0xff]  }
  0x42   :  { %1323 = vmatmul.mubr.bf16.vlgmr.msra.gmra.mrb[4].mxu1 %v2083_v61  ;;  %1977 = vmatprep.subr.bf16.mxu0 %v2108_v18  ;;  %v2152_v61 = vld [vmem:[%s2719_s1 + $0x410] sm:$0xff]   ;;  %v2173_v18 = vld [vmem:[%s2719_s1 + $0x440] sm:$0xff]  }
  0x43   :  { %1912 = vmatpush3.bf16.msra.mxu1 %v2088_v63  ;;  %1404 = vmatprep.mubr.bf16.mxu1 %v2123_v32  ;;  %v2154_v63 = vld [vmem:[%s2719_s1 + $0x2b8] sm:$0xff]  }
  0x44   :  { %1913 = vmatprep.subr.bf16.mxu1 %v2091_v2  ;;  %1446 = vmatmul.mubr.bf16.vlgmr.msra.gmra.mrb[4].mxu0 %v2105_v16  ;;  %v2158_v2 = vld [vmem:[%s2719_s1 + $0x418] sm:$0xff]   ;;  %v2172_v16 = vld [vmem:[%s2719_s1 + $0x3a0] sm:$0xff]  }
  0x45   :  { %1978 = vmatpush3.bf16.msra.mxu0 %v2109_v19  ;;  %1527 = vmatprep.mubr.bf16.mxu0 %v2145_v53  ;;  %v2175_v19 = vld [vmem:[%s2719_s1 + $0x3a8] sm:$0xff]  }
  0x46   :  { %1979 = vmatprep.subr.bf16.mxu0 %v2112_v22  ;;  %v2184_v22 = vld [vmem:[%s2720_s0 + $0x3c] ss:$72 sps:$4 sm:$0xff]  }
  0x47   :  { %1914 = vmatpush3.bf16.msra.mxu1 %v2092_v3  ;;  %v2159_v3 = vld [vmem:[%s2719_s1 + $0x3c0] sm:$0xff]  }
  0x48   :  { %1915 = vmatprep.subr.bf16.mxu1 %v2095_v6  ;;  %v2162_v6 = vld [vmem:[%s2719_s1 + $0x3c8] sm:$0xff]  }
  0x49   :  { %1980 = vmatpush3.bf16.msra.mxu0 %v2113_v23  ;;  %v2178_v23 = vld [vmem:[%s2719_s1 + $0x3b0] sm:$0xff]  }
  0x4a   :  { %1981 = vmatprep.subr.bf16.mxu0 %v2116_v26  ;;  %v2179_v26 = vld [vmem:[%s2719_s1 + $0x450] sm:$0xff]  }
  0x4b   :  { %1916 = vmatpush3.bf16.msra.mxu1 %v2096_v7  ;;  %v2163_v7 = vld [vmem:[%s2719_s1 + $0x388] sm:$0xff]  }
  0x4c   :  { %1917 = vmatprep.subr.bf16.mxu1 %v2099_v10  ;;  %v2166_v10 = vld [vmem:[%s2719_s1 + $0x390] sm:$0xff]  }
  0x4d   :  { %1982 = vmatpush3.bf16.msra.mxu0 %v2117_v27  ;;  %v2181_v27 = vld [vmem:[%s2719_s1 + $0x3b8] sm:$0xff]  }
  0x4e   :  { %1983 = vmatprep.subr.bf16.mxu0 %v2120_v30  ;;  %v2188_v30 = vld [vmem:[%s2720_s0 + $0x40] ss:$72 sps:$4 sm:$0xff]  }
  0x4f   :  { %1918 = vmatpush3.bf16.msra.mxu1 %v2100_v11  ;;  %v2168_v11 = vld [vmem:[%s2719_s1 + $0x3d8] sm:$0xff]  }
  0x50   :  { %1919 = vmatprep.subr.bf16.mxu1 %v2103_v14  ;;  %v2171_v14 = vld [vmem:[%s2719_s1 + $0x3e0] sm:$0xff]  }
  0x51   :  { %1984 = vmatpush3.bf16.msra.mxu0 %v2124_v33 }
  0x52   :  { %1985 = vmatprep.subr.bf16.mxu0 %v2127_v36 }
  0x53   :  { %1920 = vmatpush3.bf16.msra.mxu1 %v2104_v15  ;;  %v2170_v15 = vld [vmem:[%s2719_s1 + $0x438] sm:$0xff]  }
  0x54   :  { %1921 = vmatprep.subr.bf16.mxu1 %v2110_v20  ;;  %v2177_v20 = vld [vmem:[%s2719_s1 + $0x3f0] sm:$0xff]  }
  0x55   :  { %1986 = vmatpush3.bf16.msra.mxu0 %v2128_v37 }
  0x56   :  { %1987 = vmatprep.subr.bf16.mxu0 %v2131_v40 }
  0x57   :  { %1922 = vmatpush3.bf16.msra.mxu1 %v2111_v21  ;;  %v2176_v21 = vld [vmem:[%s2719_s1 + $0x448] sm:$0xff]  }
  0x58   :  { %1923 = vmatprep.subr.bf16.mxu1 %v2114_v24  ;;  %v2186_v24 = vld [vmem:[%s2720_s0 + $0x44] ss:$72 sps:$4 sm:$0xff]  }
  0x59   :  { %1988 = vmatpush3.bf16.msra.mxu0 %v2132_v41 }
  0x5a   :  { %1989 = vmatprep.subr.bf16.mxu0 %v2135_v44 }
  0x5b   :  { %1924 = vmatpush3.bf16.msra.mxu1 %v2115_v25  ;;  %v2180_v25 = vld [vmem:[%s2719_s1 + $0x3f8] sm:$0xff]  }
  0x5c   :  { %1925 = vmatprep.subr.bf16.mxu1 %v2118_v28  ;;  %v2185_v28 = vld [vmem:[%s2719_s1 + $0x458] sm:$0xff]  }
  0x5d   :  { %1990 = vmatpush3.bf16.msra.mxu0 %v2136_v45 }
  0x5e   :  { %1991 = vmatprep.subr.bf16.mxu0 %v2139_v48 }
  0x5f   :  { %1926 = vmatpush3.bf16.msra.mxu1 %v2119_v29  ;;  %v2182_v29 = vld [vmem:[%s2720_s0 + $0x38] ss:$72 sps:$4 sm:$0xff]  }
  0x60   :  { %1955 = vmatprep.subr.bf16.mxu1 %v2125_v34 }
  0x61   :  { %1992 = vmatpush3.bf16.msra.mxu0 %v2140_v49 }
  0x62   :  { %1405 = vmatmul.mubr.bf16.vlgmr.msra.gmra.mrb[8].mxu1 %v2121_v31  ;;  %1577 = vmatprep.subr.bf16.mxu0 %v2191_v54 }
  0x63   :  { %1956 = vmatpush3.bf16.msra.mxu1 %v2126_v35  ;;  %1486 = vmatprep.mubr.bf16.mxu1 %v2157_v1 }
  0x64   :  { %1957 = vmatprep.subr.bf16.mxu1 %v2129_v38  ;;  %1528 = vmatmul.mubr.bf16.vlgmr.msra.gmra.mrb[8].mxu0 %v2143_v52 }
  0x65   :  { %1578 = vmatpush1.bf16.msra.mxu0 %v2146_v55  ;;  %1839 = vmatprep.mubr.msk.bf16.mxu0 %vm1245_vm0, %v2186_v24 }
  0x66   :  { %1579 = vmatprep.subr.bf16.mxu0 %v2191_v54 }
  0x67   :  { %1958 = vmatpush3.bf16.msra.mxu1 %v2130_v39 }
  0x68   :  { %1959 = vmatprep.subr.bf16.mxu1 %v2133_v42 }
  0x69   :  { %1580 = vmatpush1.bf16.msra.mxu0 %v2149_v58 }
  0x6a   :  { %1581 = vmatprep.subr.bf16.mxu0 %v2191_v54 }
  0x6b   :  { %1960 = vmatpush3.bf16.msra.mxu1 %v2134_v43 }
  0x6c   :  { %1961 = vmatprep.subr.bf16.mxu1 %v2137_v46 }
  0x6d   :  { %1582 = vmatpush1.bf16.msra.mxu0 %v2152_v61 }
  0x6e   :  { %1583 = vmatprep.subr.bf16.mxu0 %v2191_v54 }
  0x6f   :  { %1962 = vmatpush3.bf16.msra.mxu1 %v2138_v47 }
  0x70   :  { %1963 = vmatprep.subr.bf16.mxu1 %v2141_v50 }
  0x71   :  { %1584 = vmatpush1.bf16.msra.mxu0 %v2158_v2 }
  0x72   :  { %1585 = vmatprep.subr.bf16.mxu0 %v2191_v54 }
  0x73   :  { %1964 = vmatpush3.bf16.msra.mxu1 %v2142_v51 }
  0x74   :  { %1965 = vmatprep.subr.bf16.mxu1 %v2147_v56 }
  0x75   :  { %1586 = vmatpush1.bf16.msra.mxu0 %v2161_v5 }
  0x76   :  { %1587 = vmatprep.subr.bf16.mxu0 %v2191_v54 }
  0x77   :  { %1966 = vmatpush3.bf16.msra.mxu1 %v2148_v57 }
  0x78   :  { %1967 = vmatprep.subr.bf16.mxu1 %v2150_v59 }
  0x79   :  { %1588 = vmatpush1.bf16.msra.mxu0 %v2164_v9 }
  0x7a   :  { %1589 = vmatprep.subr.bf16.mxu0 %v2191_v54 }
  0x7b   :  { %1968 = vmatpush3.bf16.msra.mxu1 %v2151_v60 }
  0x7c   :  { %1969 = vmatprep.subr.bf16.mxu1 %v2153_v62 }
  0x7d   :  { %1590 = vmatpush1.bf16.msra.mxu0 %v2167_v12 }
  0x7e   :  { %1591 = vmatprep.subr.bf16.mxu0 %v2191_v54 }
  0x7f   :  { %1970 = vmatpush3.bf16.msra.mxu1 %v2154_v63 }
  0x80   :  { %1999 = vmatprep.subr.bf16.mxu1 %v2159_v3 }
  0x81   :  { %1592 = vmatpush1.bf16.msra.mxu0 %v2170_v15 }
  0x82   :  { %1487 = vmatmul.mubr.bf16.vlgmr.msra.gmra.mrb[12].mxu1 %v2155_v0  ;;  %1593 = vmatprep.subr.bf16.mxu0 %v2191_v54 }
  0x83   :  { %2000 = vmatpush3.bf16.msra.mxu1 %v2160_v4  ;;  %1568 = vmatprep.mubr.bf16.mxu1 %v2184_v22 }
  0x84   :  { %2001 = vmatprep.subr.bf16.mxu1 %v2162_v6 }
  0x85   :  { %1594 = vmatpush1.bf16.msra.mxu0 %v2173_v18 }
  0x86   :  { %1595 = vmatprep.subr.bf16.mxu0 %v2191_v54 }
  0x87   :  { %2002 = vmatpush3.bf16.msra.mxu1 %v2163_v7 }
  0x88   :  { %2003 = vmatprep.subr.bf16.mxu1 %v2165_v8 }
  0x89   :  { %1596 = vmatpush1.bf16.msra.mxu0 %v2176_v21 }
  0x8a   :  { %1597 = vmatprep.subr.bf16.mxu0 %v2191_v54 }
  0x8b   :  { %2004 = vmatpush3.bf16.msra.mxu1 %v2166_v10 }
  0x8c   :  { %2005 = vmatprep.subr.bf16.mxu1 %v2168_v11 }
  0x8d   :  { %1598 = vmatpush1.bf16.msra.mxu0 %v2179_v26 }
  0x8e   :  { %1599 = vmatprep.subr.bf16.mxu0 %v2191_v54 }
  0x8f   :  { %2006 = vmatpush3.bf16.msra.mxu1 %v2169_v13 }
  0x90   :  { %2007 = vmatprep.subr.bf16.mxu1 %v2171_v14 }
  0x91   :  { %1600 = vmatpush1.bf16.msra.mxu0 %v2185_v28 }
  0x93   :  { %2008 = vmatpush3.bf16.msra.mxu1 %v2172_v16 }
  0x94   :  { %2009 = vmatprep.subr.bf16.mxu1 %v2174_v17  ;;  %1610 = vmatmul.mubr.bf16.vlgmr.msra.gmra.mrb[12].mxu0 %v2188_v30 }
  0x97   :  { %2010 = vmatpush3.bf16.msra.mxu1 %v2175_v19 }
  0x98   :  { %2011 = vmatprep.subr.bf16.mxu1 %v2177_v20 }
  0x9b   :  { %2012 = vmatpush3.bf16.msra.mxu1 %v2178_v23 }
  0x9c   :  { %2013 = vmatprep.subr.bf16.mxu1 %v2180_v25 }
  0x9f   :  { %2014 = vmatpush3.bf16.msra.mxu1 %v2181_v27 }
  0xa2   :  { %1569 = vmatmul.mubr.bf16.vlgmr.msra.gmra.mrb[16].mxu1 %v2182_v29 }
  0xf5   :  { %v1861_v31 = vpop.f32.mrb[0].mxu1 }
  0xf6   :  { %v1862_v32 = vpop.f32.mrb[1].mxu1 }
  0xf7   :  { %v1863_v33 = vadd.f32 %v1862_v32, %v1861_v31  ;;  %v1864_v34 = vpop.f32.mrb[2].mxu1  ;;  %v1905_v37 = vpop.f32.mrb[0].mxu0 }
  0xf8   :  { %v1865_v35 = vpop.f32.mrb[3].mxu1  ;;  %v1906_v38 = vpop.f32.mrb[1].mxu0 }
  0xf9   :  { %v1866_v36 = vadd.f32 %v1865_v35, %v1864_v34  ;;  %v1907_v39 = vadd.f32 %v1906_v38, %v1905_v37  ;;  %v1908_v40 = vpop.f32.mrb[2].mxu0 }
  0xfa   :  { %v1909_v41 = vpop.f32.mrb[3].mxu0 }
  0xfb   :  { %v1910_v42 = vadd.f32 %v1909_v41, %v1908_v40 }
 0x115   :  { %v1883_v43 = vpop.f32.mrb[4].mxu1 }
 0x116   :  { %v1884_v44 = vpop.f32.mrb[5].mxu1 }
 0x117   :  { %v1885_v45 = vadd.f32 %v1884_v44, %v1883_v43  ;;  %v1886_v46 = vpop.f32.mrb[6].mxu1  ;;  %v1949_v53 = vpop.f32.mrb[4].mxu0 }
 0x118   :  { %v1887_v47 = vpop.f32.mrb[7].mxu1  ;;  %v1950_v54 = vpop.f32.mrb[5].mxu0 }
 0x119   :  { %v1325_v48 = vadd.f32 %v1885_v45, %v1863_v33  ;;  %v1888_v49 = vadd.f32 %v1887_v47, %v1886_v46  ;;  %v1951_v55 = vadd.f32 %v1950_v54, %v1949_v53  ;;  %v1952_v56 = vpop.f32.mrb[6].mxu0 }
 0x11a   :  { %v1953_v57 = vpop.f32.mrb[7].mxu0 }
 0x11b   :  { %v1328_v50 = vadd.f32 %v1888_v49, %v1866_v36  ;;  %v1366_v51 = vadd.f32 %v1907_v39, %v1325_v48  ;;  %v1954_v58 = vadd.f32 %v1953_v57, %v1952_v56 }
 0x11d   :  { %v1369_v52 = vadd.f32 %v1910_v42, %v1328_v50 }
 0x135   :  { %v1927_v59 = vpop.f32.mrb[8].mxu1 }
 0x136   :  { %v1928_v60 = vpop.f32.mrb[9].mxu1 }
 0x137   :  { %v1929_v61 = vadd.f32 %v1928_v60, %v1927_v59  ;;  %v1930_v62 = vpop.f32.mrb[10].mxu1  ;;  %v1993_v5 = vpop.f32.mrb[8].mxu0  ;;  %v1648_v60 = vlaneseq }
 0x138   :  { %v1931_v63 = vpop.f32.mrb[11].mxu1  ;;  %v1994_v6 = vpop.f32.mrb[9].mxu0 }
 0x139   :  { %v1407_v0 = vadd.f32 %v1929_v61, %v1366_v51  ;;  %v1932_v1 = vadd.f32 %v1931_v63, %v1930_v62  ;;  %v1995_v7 = vadd.f32 %v1994_v6, %v1993_v5  ;;  %v1996_v8 = vpop.f32.mrb[10].mxu0  ;;  %v1649_v61 = vshrl.u32 %v1648_v60, 7  ;;  %v1643_v62 = vld [vmem:[%s2721_s2] sm:$0x1] }
 0x13a   :  { %v1997_v9 = vpop.f32.mrb[11].mxu0 }
 0x13b   :  { %v1410_v2 = vadd.f32 %v1932_v1, %v1369_v52  ;;  %v1448_v3 = vadd.f32 %v1951_v55, %v1407_v0  ;;  %v1998_v10 = vadd.f32 %v1997_v9, %v1996_v8  ;;  %v1650_v63 = vsub.s32 0, %v1649_v61 }
 0x13d   :  { %v1451_v4 = vadd.f32 %v1954_v58, %v1410_v2 }
 0x155   :  { %v1971_v11 = vpop.f32.mrb[12].mxu1 }
 0x156   :  { %v1972_v12 = vpop.f32.mrb[13].mxu1 }
 0x157   :  { %v1973_v13 = vadd.f32 %v1972_v12, %v1971_v11  ;;  %v1974_v14 = vpop.f32.mrb[14].mxu1 }
 0x158   :  { %v1975_v15 = vpop.f32.mrb[15].mxu1 }
 0x159   :  { %v1489_v16 = vadd.f32 %v1973_v13, %v1448_v3  ;;  %v1976_v17 = vadd.f32 %v1975_v15, %v1974_v14  ;;  %v1840_v3 = vld [vmem:[%s2722_s3] ss:$0 sm:$0xff] }
 0x15b   :  { %v1492_v18 = vadd.f32 %v1976_v17, %v1451_v4  ;;  %v1530_v19 = vadd.f32 %v1995_v7, %v1489_v16 }
 0x15d   :  { %v1533_v20 = vadd.f32 %v1998_v10, %v1492_v18 }
 0x167   :  { %v1611_v25 = vpop.f32.mrb[12].mxu0 }
 0x168   :  { %v1613_v27 = vpop.f32.mrb[13].mxu0 }
 0x169   :  { %v1614_v30 = vpop.f32.mrb[14].mxu0 }
 0x16a   :  { %v1616_v31 = vpop.f32.mrb[15].mxu0 }
 0x175   :  { %v2015_v21 = vpop.f32.mrb[16].mxu1 }
 0x176   :  { %v2016_v22 = vpop.f32.mrb[17].mxu1 }
 0x177   :  { %v2017_v23 = vadd.f32 %v2016_v22, %v2015_v21  ;;  %v2018_v24 = vpop.f32.mrb[18].mxu1 }
 0x178   :  { %v2019_v26 = vpop.f32.mrb[19].mxu1 }
 0x179   :  { %v1571_v28 = vadd.f32 %v2017_v23, %v1530_v19  ;;  %v2020_v29 = vadd.f32 %v2019_v26, %v2018_v24 }
 0x17b   :  { %v1612_v32 = vadd.f32 %v1611_v25, %v1571_v28  ;;  %v1574_v33 = vadd.f32 %v2020_v29, %v1533_v20 }
 0x17d   :  { %v1615_v34 = vadd.f32 %v1614_v30, %v1574_v33  ;;  %v1619_v35 = vsel %vm1618_vm1, %v1612_v32, 0.0 }
 0x17f   :  { %v1620_v36 = vsel %vm1618_vm1, %v1615_v34, 0.0 }
 0x180   :  { %v1621_v37 = vadd.f32 %v1620_v36, %v1619_v35 }
 0x182   :  { %v1622_v38 = vrot.slane %v1621_v37, 4 }
 0x184   :  { %v1623_v39 = vadd.f32 %v1622_v38, %v1621_v37 }
 0x186   :  { %v1624_v40 = vrot.slane %v1623_v39, 2 }
 0x188   :  { %v1625_v41 = vadd.f32 %v1624_v40, %v1623_v39 }
 0x18a   :  { %v1626_v42 = vrot.slane %v1625_v41, 1 }
 0x18c   :  { %v1627_v43 = vadd.f32 %v1626_v42, %v1625_v41 }
 0x18e   :  { %v1628_v44 = vmul.f32 0.0625, %v1627_v43 }
 0x190   :  { %v1629_v45 = vsub.f32 %v1612_v32, %v1628_v44  ;;  %v1630_v46 = vsub.f32 %v1615_v34, %v1628_v44 }
 0x192   :  { %v1631_v47 = vmul.f32 %v1629_v45, %v1629_v45  ;;  %v1632_v48 = vmul.f32 %v1630_v46, %v1630_v46 }
 0x194   :  { %v1633_v49 = vsel %vm1618_vm1, %v1631_v47, 0.0  ;;  %v1634_v50 = vsel %vm1618_vm1, %v1632_v48, 0.0 }
 0x195   :  { %v1635_v51 = vadd.f32 %v1634_v50, %v1633_v49 }
 0x197   :  { %v1636_v52 = vrot.slane %v1635_v51, 4 }
 0x199   :  { %v1637_v53 = vadd.f32 %v1636_v52, %v1635_v51 }
 0x19b   :  { %v1638_v54 = vrot.slane %v1637_v53, 2 }
 0x19d   :  { %v1639_v55 = vadd.f32 %v1638_v54, %v1637_v53 }
 0x19f   :  { %v1640_v56 = vrot.slane %v1639_v55, 1 }
 0x1a1   :  { %v1641_v57 = vadd.f32 %v1640_v56, %v1639_v55 }
 0x1a3   :  { %v1642_v58 = vmul.f32 0.0625, %v1641_v57 }
 0x1a5   :  { %v1644_v59 = vadd.f32 1e-05, %v1642_v58 }
 0x1a7   :  { %2189 = vrsqrt.f32 %v1644_v59 }
 0x1b1   :  { %v2190_v0 = vpop.eup %2189 }
 0x1b2   :  { %v1646_v1 = vmul.f32 %v2190_v0, %v1643_v62 }
 0x1b4   :  { %v1651_v2 = vrot.slane %v1646_v1, %v1650_v63 }
 0x1b6   :  { %v1653_v4 = vmul.f32 %v1651_v2, %v1629_v45  ;;  %v1654_v5 = vmul.f32 %v1651_v2, %v1630_v46 }
 0x1b8   :  { %v1662_v6 = vadd.f32 %v1840_v3, %v1653_v4  ;;  %v1663_v7 = vadd.f32 %v1840_v3, %v1654_v5 }
 0x1ba   :  { %v1664_v8 = vmax.f32 %v1662_v6, 0.0  ;;  %v1665_v9 = vmax.f32 %v1663_v7, 0.0 }
 0x1bc   :  { %v1843_v10 = vpack.c.bf16 %v1664_v8, %v1664_v8  ;;  %v1844_v11 = vpack.c.bf16 %v1665_v9, %v1665_v9 }
 0x1be   :  { %1675 = vst.msk [vmem:[%s2723_s4] sm:$0xf] %vm1674_vm2, %v1843_v10  ;;  %1676 = vst.msk [vmem:[%s2723_s4 + $0x4] sm:$0xf] %vm1674_vm2, %v1844_v11 }

// kernel: cnn_forward.9
= control target key start
LH: loop header
LB: loop body
LE: loop exit
PB: predicated region body
PF: predicated region fallthrough
CT: control target
= control target key end

     0   :  { %vm1245_vm0 = vcmask 523264   ;;  %vm1618_vm1 = vcmask 31744   ;;  %s2706_s1 = inlined_call_operand.vmem [shape: bf16[2240,4], index: 1, kind: input, shape index: {}]   ;;  %s2707_s0 = inlined_call_operand.vmem [shape: bf16[16,2240], index: 0, kind: input, shape index: {}]   ;;  %s2708_s2 = inlined_call_operand.vmem [shape: f32[1,4], index: 2, kind: input, shape index: {}]   ;;  %s2709_s3 = inlined_call_operand.vmem [shape: f32[1,4], index: 3, kind: input, shape index: {}]   ;;  %s2710_s4 = inlined_call_operand.vmem [shape: f32[16,4], index: 4, kind: output, shape index: {}]  }
   0x1   :  { %v2007_v0 = vld [vmem:[%s2706_s1 + $0x40] sm:$0xff]   ;;  %v2009_v2 = vld [vmem:[%s2706_s1 + $0x48] sm:$0xff]   ;;  %v2011_v4 = vld [vmem:[%s2706_s1 + $0x50] sm:$0xff]  }
   0x2   :  { %v2008_v1 = vld [vmem:[%s2706_s1] sm:$0xff]   ;;  %1830 = vmatprep.subr.bf16.mxu1 %v2007_v0  ;;  %v2010_v3 = vld [vmem:[%s2706_s1 + $0x8] sm:$0xff]   ;;  %v2012_v5 = vld [vmem:[%s2706_s1 + $0x10] sm:$0xff]  }
   0x3   :  { %1831 = vmatpush3.bf16.msra.mxu1 %v2008_v1  ;;  %v2013_v6 = vld [vmem:[%s2706_s1 + $0x58] sm:$0xff]   ;;  %v2017_v8 = vld [vmem:[%s2706_s1 + $0x140] sm:$0xff]   ;;  %v2021_v12 = vld [vmem:[%s2706_s1 + $0x148] sm:$0xff]  }
   0x4   :  { %1832 = vmatprep.subr.bf16.mxu1 %v2009_v2  ;;  %v2014_v7 = vld [vmem:[%s2706_s1 + $0x18] sm:$0xff]   ;;  %v2018_v9 = vld [vmem:[%s2706_s1 + $0x100] sm:$0xff]   ;;  %1874 = vmatprep.subr.bf16.mxu0 %v2017_v8  ;;  %v2022_v13 = vld [vmem:[%s2706_s1 + $0x108] sm:$0xff]  }
   0x5   :  { %v2015_v10 = vld [vmem:[%s2706_s1 + $0x60] sm:$0xff]   ;;  %1875 = vmatpush3.bf16.msra.mxu0 %v2018_v9  ;;  %v2019_v14 = vld [vmem:[%s2706_s1 + $0x68] sm:$0xff]   ;;  %v2025_v16 = vld [vmem:[%s2706_s1 + $0x150] sm:$0xff]  }
   0x6   :  { %v2016_v11 = vld [vmem:[%s2706_s1 + $0x20] sm:$0xff]   ;;  %1876 = vmatprep.subr.bf16.mxu0 %v2021_v12  ;;  %v2020_v15 = vld [vmem:[%s2706_s1 + $0x28] sm:$0xff]   ;;  %v2026_v17 = vld [vmem:[%s2706_s1 + $0x110] sm:$0xff]  }
   0x7   :  { %1833 = vmatpush3.bf16.msra.mxu1 %v2010_v3  ;;  %v2023_v18 = vld [vmem:[%s2706_s1 + $0x70] sm:$0xff]   ;;  %v2029_v20 = vld [vmem:[%s2706_s1 + $0x158] sm:$0xff]   ;;  %v2032_v22 = vld [vmem:[%s2707_s0 + $0x4] ss:$72 sps:$4 sm:$0xff]  }
   0x8   :  { %1834 = vmatprep.subr.bf16.mxu1 %v2011_v4  ;;  %v2024_v19 = vld [vmem:[%s2706_s1 + $0x30] sm:$0xff]   ;;  %v2027_v21 = vld [vmem:[%s2706_s1 + $0x78] sm:$0xff]   ;;  %1281 = vmatprep.mubr.bf16.mxu1 %v2032_v22  ;;  %v2034_v25 = vld [vmem:[%s2706_s1 + $0xc0] sm:$0xff]  }
   0x9   :  { %1877 = vmatpush3.bf16.msra.mxu0 %v2022_v13  ;;  %v2033_v23 = vld [vmem:[%s2706_s1 + $0x118] sm:$0xff]   ;;  %v2030_v26 = vld [vmem:[%s2707_s0] ss:$72 sps:$4 sm:$0xff]   ;;  %v2042_v34 = vld [vmem:[%s2706_s1 + $0xd0] sm:$0xff]  }
   0xa   :  { %1878 = vmatprep.subr.bf16.mxu0 %v2025_v16  ;;  %v2028_v24 = vld [vmem:[%s2706_s1 + $0x38] sm:$0xff]   ;;  %v2036_v27 = vld [vmem:[%s2706_s1 + $0x160] sm:$0xff]   ;;  %v2038_v30 = vld [vmem:[%s2706_s1 + $0xc8] sm:$0xff]  }
   0xb   :  { %1835 = vmatpush3.bf16.msra.mxu1 %v2012_v5  ;;  %v2037_v28 = vld [vmem:[%s2706_s1 + $0x120] sm:$0xff]   ;;  %v2040_v31 = vld [vmem:[%s2706_s1 + $0x168] sm:$0xff]   ;;  %v2044_v35 = vld [vmem:[%s2706_s1 + $0x170] sm:$0xff]  }
   0xc   :  { %1836 = vmatprep.subr.bf16.mxu1 %v2013_v6  ;;  %v2035_v29 = vld [vmem:[%s2706_s1 + $0x80] sm:$0xff]   ;;  %v2041_v32 = vld [vmem:[%s2706_s1 + $0x128] sm:$0xff]   ;;  %v2045_v36 = vld [vmem:[%s2706_s1 + $0x130] sm:$0xff]  }
   0xd   :  { %1879 = vmatpush3.bf16.msra.mxu0 %v2026_v17  ;;  %v2039_v33 = vld [vmem:[%s2706_s1 + $0x88] sm:$0xff]   ;;  %v2043_v37 = vld [vmem:[%s2706_s1 + $0x90] sm:$0xff]   ;;  %v2046_v38 = vld [vmem:[%s2706_s1 + $0xd8] sm:$0xff]  }
   0xe   :  { %1880 = vmatprep.subr.bf16.mxu0 %v2029_v20  ;;  %v2048_v39 = vld [vmem:[%s2706_s1 + $0x178] sm:$0xff]   ;;  %v2050_v42 = vld [vmem:[%s2706_s1 + $0xe0] sm:$0xff]   ;;  %v2057_v48 = vld [vmem:[%s2706_s1 + $0xe8] sm:$0xff]  }
   0xf   :  { %1837 = vmatpush3.bf16.msra.mxu1 %v2014_v7  ;;  %v2049_v40 = vld [vmem:[%s2706_s1 + $0x138] sm:$0xff]   ;;  %v2055_v45 = vld [vmem:[%s2706_s1 + $0x240] sm:$0xff]   ;;  %v2059_v49 = vld [vmem:[%s2706_s1 + $0x248] sm:$0xff]  }
  0x10   :  { %1838 = vmatprep.subr.bf16.mxu1 %v2015_v10  ;;  %v2047_v41 = vld [vmem:[%s2706_s1 + $0x98] sm:$0xff]   ;;  %v2056_v46 = vld [vmem:[%s2706_s1 + $0x200] sm:$0xff]   ;;  %v2060_v50 = vld [vmem:[%s2706_s1 + $0x208] sm:$0xff]  }
  0x11   :  { %1881 = vmatpush3.bf16.msra.mxu0 %v2033_v23  ;;  %v2052_v43 = vld [vmem:[%s2707_s0 + $0x10] ss:$72 sps:$4 sm:$0xff]   ;;  %v2054_v44 = vld [vmem:[%s2707_s0 + $0x14] ss:$72 sps:$4 sm:$0xff]   ;;  %v2051_v47 = vld [vmem:[%s2706_s1 + $0xa0] sm:$0xff]  }
  0x12   :  { %1882 = vmatprep.subr.bf16.mxu0 %v2036_v27  ;;  %1363 = vmatprep.mubr.bf16.mxu0 %v2054_v44  ;;  %v2058_v51 = vld [vmem:[%s2706_s1 + $0xa8] sm:$0xff]   ;;  %v2061_v52 = vld [vmem:[%s2706_s1 + $0xf0] sm:$0xff]   ;;  %v2065_v56 = vld [vmem:[%s2706_s1 + $0xf8] sm:$0xff]  }
  0x13   :  { %1839 = vmatpush3.bf16.msra.mxu1 %v2016_v11  ;;  %v2063_v53 = vld [vmem:[%s2706_s1 + $0x250] sm:$0xff]   ;;  %v2067_v57 = vld [vmem:[%s2706_s1 + $0x258] sm:$0xff]   ;;  %v2072_v62 = vld [vmem:[%s2706_s1 + $0x1c0] sm:$0xff]  }
  0x14   :  { %1840 = vmatprep.subr.bf16.mxu1 %v2019_v14  ;;  %v2064_v54 = vld [vmem:[%s2706_s1 + $0x210] sm:$0xff]   ;;  %v2066_v58 = vld [vmem:[%s2706_s1 + $0xb8] sm:$0xff]   ;;  %v2073_v63 = vld [vmem:[%s2706_s1 + $0x180] sm:$0xff]  }
  0x15   :  { %1883 = vmatpush3.bf16.msra.mxu0 %v2037_v28  ;;  %v2062_v55 = vld [vmem:[%s2706_s1 + $0xb0] sm:$0xff]   ;;  %v2071_v60 = vld [vmem:[%s2706_s1 + $0x218] sm:$0xff]   ;;  %v2074_v0 = vld [vmem:[%s2706_s1 + $0x260] sm:$0xff]  }
  0x16   :  { %1884 = vmatprep.subr.bf16.mxu0 %v2040_v31  ;;  %v2070_v59 = vld [vmem:[%s2707_s0 + $0xc] ss:$72 sps:$4 sm:$0xff]   ;;  %v2068_v61 = vld [vmem:[%s2707_s0 + $0x8] ss:$72 sps:$4 sm:$0xff]   ;;  %v2075_v1 = vld [vmem:[%s2706_s1 + $0x220] sm:$0xff]  }
  0x17   :  { %1841 = vmatpush3.bf16.msra.mxu1 %v2020_v15  ;;  %v2076_v2 = vld [vmem:[%s2706_s1 + $0x1c8] sm:$0xff]   ;;  %v2080_v6 = vld [vmem:[%s2706_s1 + $0x1d0] sm:$0xff]   ;;  %v2084_v10 = vld [vmem:[%s2706_s1 + $0x1d8] sm:$0xff]  }
  0x18   :  { %1842 = vmatprep.subr.bf16.mxu1 %v2023_v18  ;;  %v2077_v3 = vld [vmem:[%s2706_s1 + $0x188] sm:$0xff]   ;;  %v2081_v7 = vld [vmem:[%s2706_s1 + $0x190] sm:$0xff]   ;;  %v2085_v11 = vld [vmem:[%s2706_s1 + $0x198] sm:$0xff]  }
  0x19   :  { %1885 = vmatpush3.bf16.msra.mxu0 %v2041_v32  ;;  %v2078_v4 = vld [vmem:[%s2706_s1 + $0x268] sm:$0xff]   ;;  %v2082_v8 = vld [vmem:[%s2706_s1 + $0x270] sm:$0xff]   ;;  %v2086_v12 = vld [vmem:[%s2706_s1 + $0x278] sm:$0xff]  }
  0x1a   :  { %1886 = vmatprep.subr.bf16.mxu0 %v2044_v35  ;;  %v2079_v5 = vld [vmem:[%s2706_s1 + $0x228] sm:$0xff]   ;;  %v2083_v9 = vld [vmem:[%s2706_s1 + $0x230] sm:$0xff]   ;;  %v2087_v13 = vld [vmem:[%s2706_s1 + $0x238] sm:$0xff]  }
  0x1b   :  { %1843 = vmatpush3.bf16.msra.mxu1 %v2024_v19  ;;  %v2088_v14 = vld [vmem:[%s2706_s1 + $0x1e0] sm:$0xff]   ;;  %v2095_v20 = vld [vmem:[%s2706_s1 + $0x1e8] sm:$0xff]   ;;  %v2102_v27 = vld [vmem:[%s2706_s1 + $0x310] sm:$0xff]  }
  0x1c   :  { %1844 = vmatprep.subr.bf16.mxu1 %v2027_v21  ;;  %v2089_v15 = vld [vmem:[%s2706_s1 + $0x1a0] sm:$0xff]   ;;  %v2096_v21 = vld [vmem:[%s2706_s1 + $0x1a8] sm:$0xff]   ;;  %v2103_v28 = vld [vmem:[%s2706_s1 + $0x1f8] sm:$0xff]  }
  0x1d   :  { %1887 = vmatpush3.bf16.msra.mxu0 %v2045_v36  ;;  %v2090_v16 = vld [vmem:[%s2707_s0 + $0x20] ss:$72 sps:$4 sm:$0xff]   ;;  %v2092_v17 = vld [vmem:[%s2707_s0 + $0x24] ss:$72 sps:$4 sm:$0xff]   ;;  %v2120_v44 = vld [vmem:[%s2706_s1 + $0x370] sm:$0xff]  }
  0x1e   :  { %1888 = vmatprep.subr.bf16.mxu0 %v2048_v39  ;;  %v2093_v18 = vld [vmem:[%s2706_s1 + $0x340] sm:$0xff]   ;;  %v2097_v22 = vld [vmem:[%s2706_s1 + $0x348] sm:$0xff]  }
  0x1f   :  { %1845 = vmatpush3.bf16.msra.mxu1 %v2028_v24  ;;  %v2094_v19 = vld [vmem:[%s2706_s1 + $0x300] sm:$0xff]   ;;  %v2098_v23 = vld [vmem:[%s2706_s1 + $0x308] sm:$0xff]   ;;  %v2099_v24 = vld [vmem:[%s2706_s1 + $0x1f0] sm:$0xff]  }
  0x20   :  { %1852 = vmatprep.subr.bf16.mxu1 %v2034_v25  ;;  %v2100_v25 = vld [vmem:[%s2706_s1 + $0x1b0] sm:$0xff]   ;;  %v2106_v31 = vld [vmem:[%s2707_s0 + $0x18] ss:$72 sps:$4 sm:$0xff]   ;;  %v2108_v32 = vld [vmem:[%s2707_s0 + $0x1c] ss:$72 sps:$4 sm:$0xff]  }
  0x21   :  { %1889 = vmatpush3.bf16.msra.mxu0 %v2049_v40  ;;  %v2111_v35 = vld [vmem:[%s2706_s1 + $0x280] sm:$0xff]   ;;  %v2115_v39 = vld [vmem:[%s2706_s1 + $0x288] sm:$0xff]  }
  0x22   :  { %1282 = vmatmul.mubr.bf16.vlgmr.msra.gmra.mrb[0].mxu1 %v2030_v26  ;;  %1918 = vmatprep.subr.bf16.mxu0 %v2055_v45  ;;  %v2101_v26 = vld [vmem:[%s2706_s1 + $0x350] sm:$0xff]   ;;  %v2112_v36 = vld [vmem:[%s2706_s1 + $0x360] sm:$0xff]   ;;  %v2116_v40 = vld [vmem:[%s2706_s1 + $0x368] sm:$0xff]  }
  0x23   :  { %1853 = vmatpush3.bf16.msra.mxu1 %v2035_v29  ;;  %1322 = vmatprep.mubr.bf16.mxu1 %v2070_v59  ;;  %v2104_v29 = vld [vmem:[%s2706_s1 + $0x1b8] sm:$0xff]   ;;  %v2121_v45 = vld [vmem:[%s2706_s1 + $0x330] sm:$0xff]  }
  0x24   :  { %1854 = vmatprep.subr.bf16.mxu1 %v2038_v30  ;;  %1364 = vmatmul.mubr.bf16.vlgmr.msra.gmra.mrb[0].mxu0 %v2052_v43  ;;  %v2105_v30 = vld [vmem:[%s2706_s1 + $0x358] sm:$0xff]   ;;  %v2119_v43 = vld [vmem:[%s2706_s1 + $0x290] sm:$0xff]  }
  0x25   :  { %1919 = vmatpush3.bf16.msra.mxu0 %v2056_v46  ;;  %1445 = vmatprep.mubr.bf16.mxu0 %v2092_v17  ;;  %v2122_v46 = vld [vmem:[%s2706_s1 + $0x2d8] sm:$0xff]   ;;  %v2135_v59 = vld [vmem:[%s2706_s1 + $0x2f0] sm:$0xff]   ;;  %v2159_v17 = vld [vmem:[%s2706_s1 + $0x3e8] sm:$0xff]  }
  0x26   :  { %1920 = vmatprep.subr.bf16.mxu0 %v2059_v49  ;;  %v2125_v49 = vld [vmem:[%s2706_s1 + $0x338] sm:$0xff]  }
  0x27   :  { %1855 = vmatpush3.bf16.msra.mxu1 %v2039_v33  ;;  %v2109_v33 = vld [vmem:[%s2706_s1 + $0x318] sm:$0xff]  }
  0x28   :  { %1856 = vmatprep.subr.bf16.mxu1 %v2042_v34  ;;  %v2110_v34 = vld [vmem:[%s2706_s1 + $0x2c0] sm:$0xff]  }
  0x29   :  { %1921 = vmatpush3.bf16.msra.mxu0 %v2060_v50  ;;  %v2126_v50 = vld [vmem:[%s2706_s1 + $0x2e0] sm:$0xff]  }
  0x2a   :  { %1922 = vmatprep.subr.bf16.mxu0 %v2063_v53  ;;  %v2130_v53 = vld [vmem:[%s2707_s0 + $0x34] ss:$72 sps:$4 sm:$0xff]  }
  0x2b   :  { %1857 = vmatpush3.bf16.msra.mxu1 %v2043_v37  ;;  %v2113_v37 = vld [vmem:[%s2706_s1 + $0x320] sm:$0xff]  }
  0x2c   :  { %1858 = vmatprep.subr.bf16.mxu1 %v2046_v38  ;;  %v2114_v38 = vld [vmem:[%s2706_s1 + $0x2c8] sm:$0xff]  }
  0x2d   :  { %1923 = vmatpush3.bf16.msra.mxu0 %v2064_v54  ;;  %v2176_v54 = vmov 0  }
  0x2e   :  { %1924 = vmatprep.subr.bf16.mxu0 %v2067_v57  ;;  %v2133_v57 = vld [vmem:[%s2706_s1 + $0x2a8] sm:$0xff]  }
  0x2f   :  { %1859 = vmatpush3.bf16.msra.mxu1 %v2047_v41  ;;  %v2117_v41 = vld [vmem:[%s2706_s1 + $0x328] sm:$0xff]  }
  0x30   :  { %1860 = vmatprep.subr.bf16.mxu1 %v2050_v42  ;;  %v2118_v42 = vld [vmem:[%s2706_s1 + $0x2d0] sm:$0xff]  }
  0x31   :  { %1925 = vmatpush3.bf16.msra.mxu0 %v2071_v60  ;;  %v2136_v60 = vld [vmem:[%s2706_s1 + $0x2b0] sm:$0xff]  }
  0x32   :  { %1926 = vmatprep.subr.bf16.mxu0 %v2074_v0  ;;  %v2140_v0 = vld [vmem:[%s2707_s0 + $0x28] ss:$72 sps:$4 sm:$0xff]  }
  0x33   :  { %1861 = vmatpush3.bf16.msra.mxu1 %v2051_v47  ;;  %v2123_v47 = vld [vmem:[%s2706_s1 + $0x298] sm:$0xff]  }
  0x34   :  { %1862 = vmatprep.subr.bf16.mxu1 %v2057_v48  ;;  %v2124_v48 = vld [vmem:[%s2706_s1 + $0x378] sm:$0xff]  }
  0x35   :  { %1927 = vmatpush3.bf16.msra.mxu0 %v2075_v1  ;;  %v2142_v1 = vld [vmem:[%s2707_s0 + $0x2c] ss:$72 sps:$4 sm:$0xff]  }
  0x36   :  { %1928 = vmatprep.subr.bf16.mxu0 %v2078_v4  ;;  %v2145_v4 = vld [vmem:[%s2706_s1 + $0x380] sm:$0xff]  }
  0x37   :  { %1863 = vmatpush3.bf16.msra.mxu1 %v2058_v51  ;;  %v2127_v51 = vld [vmem:[%s2706_s1 + $0x2a0] sm:$0xff]  }
  0x38   :  { %1864 = vmatprep.subr.bf16.mxu1 %v2061_v52  ;;  %v2128_v52 = vld [vmem:[%s2707_s0 + $0x30] ss:$72 sps:$4 sm:$0xff]  }
  0x39   :  { %1929 = vmatpush3.bf16.msra.mxu0 %v2079_v5  ;;  %v2146_v5 = vld [vmem:[%s2706_s1 + $0x420] sm:$0xff]  }
  0x3a   :  { %1930 = vmatprep.subr.bf16.mxu0 %v2082_v8  ;;  %v2150_v8 = vld [vmem:[%s2706_s1 + $0x3d0] sm:$0xff]  }
  0x3b   :  { %1865 = vmatpush3.bf16.msra.mxu1 %v2062_v55  ;;  %v2131_v55 = vld [vmem:[%s2706_s1 + $0x400] sm:$0xff]  }
  0x3c   :  { %1866 = vmatprep.subr.bf16.mxu1 %v2065_v56  ;;  %v2132_v56 = vld [vmem:[%s2706_s1 + $0x2e8] sm:$0xff]  }
  0x3d   :  { %1931 = vmatpush3.bf16.msra.mxu0 %v2083_v9  ;;  %v2149_v9 = vld [vmem:[%s2706_s1 + $0x428] sm:$0xff]  }
  0x3e   :  { %1932 = vmatprep.subr.bf16.mxu0 %v2086_v12  ;;  %v2152_v12 = vld [vmem:[%s2706_s1 + $0x430] sm:$0xff]  }
  0x3f   :  { %1867 = vmatpush3.bf16.msra.mxu1 %v2066_v58  ;;  %v2134_v58 = vld [vmem:[%s2706_s1 + $0x408] sm:$0xff]  }
  0x40   :  { %1896 = vmatprep.subr.bf16.mxu1 %v2072_v62  ;;  %v2138_v62 = vld [vmem:[%s2706_s1 + $0x2f8] sm:$0xff]  }
  0x41   :  { %1933 = vmatpush3.bf16.msra.mxu0 %v2087_v13  ;;  %v2154_v13 = vld [vmem:[%s2706_s1 + $0x398] sm:$0xff]  }
  0x42   :  { %1323 = vmatmul.mubr.bf16.vlgmr.msra.gmra.mrb[4].mxu1 %v2068_v61  ;;  %1962 = vmatprep.subr.bf16.mxu0 %v2093_v18  ;;  %v2137_v61 = vld [vmem:[%s2706_s1 + $0x410] sm:$0xff]   ;;  %v2158_v18 = vld [vmem:[%s2706_s1 + $0x440] sm:$0xff]  }
  0x43   :  { %1897 = vmatpush3.bf16.msra.mxu1 %v2073_v63  ;;  %1404 = vmatprep.mubr.bf16.mxu1 %v2108_v32  ;;  %v2139_v63 = vld [vmem:[%s2706_s1 + $0x2b8] sm:$0xff]  }
  0x44   :  { %1898 = vmatprep.subr.bf16.mxu1 %v2076_v2  ;;  %1446 = vmatmul.mubr.bf16.vlgmr.msra.gmra.mrb[4].mxu0 %v2090_v16  ;;  %v2143_v2 = vld [vmem:[%s2706_s1 + $0x418] sm:$0xff]   ;;  %v2157_v16 = vld [vmem:[%s2706_s1 + $0x3a0] sm:$0xff]  }
  0x45   :  { %1963 = vmatpush3.bf16.msra.mxu0 %v2094_v19  ;;  %1527 = vmatprep.mubr.bf16.mxu0 %v2130_v53  ;;  %v2160_v19 = vld [vmem:[%s2706_s1 + $0x3a8] sm:$0xff]  }
  0x46   :  { %1964 = vmatprep.subr.bf16.mxu0 %v2097_v22  ;;  %v2169_v22 = vld [vmem:[%s2707_s0 + $0x3c] ss:$72 sps:$4 sm:$0xff]  }
  0x47   :  { %1899 = vmatpush3.bf16.msra.mxu1 %v2077_v3  ;;  %v2144_v3 = vld [vmem:[%s2706_s1 + $0x3c0] sm:$0xff]  }
  0x48   :  { %1900 = vmatprep.subr.bf16.mxu1 %v2080_v6  ;;  %v2147_v6 = vld [vmem:[%s2706_s1 + $0x3c8] sm:$0xff]  }
  0x49   :  { %1965 = vmatpush3.bf16.msra.mxu0 %v2098_v23  ;;  %v2163_v23 = vld [vmem:[%s2706_s1 + $0x3b0] sm:$0xff]  }
  0x4a   :  { %1966 = vmatprep.subr.bf16.mxu0 %v2101_v26  ;;  %v2164_v26 = vld [vmem:[%s2706_s1 + $0x450] sm:$0xff]  }
  0x4b   :  { %1901 = vmatpush3.bf16.msra.mxu1 %v2081_v7  ;;  %v2148_v7 = vld [vmem:[%s2706_s1 + $0x388] sm:$0xff]  }
  0x4c   :  { %1902 = vmatprep.subr.bf16.mxu1 %v2084_v10  ;;  %v2151_v10 = vld [vmem:[%s2706_s1 + $0x390] sm:$0xff]  }
  0x4d   :  { %1967 = vmatpush3.bf16.msra.mxu0 %v2102_v27  ;;  %v2166_v27 = vld [vmem:[%s2706_s1 + $0x3b8] sm:$0xff]  }
  0x4e   :  { %1968 = vmatprep.subr.bf16.mxu0 %v2105_v30  ;;  %v2173_v30 = vld [vmem:[%s2707_s0 + $0x40] ss:$72 sps:$4 sm:$0xff]  }
  0x4f   :  { %1903 = vmatpush3.bf16.msra.mxu1 %v2085_v11  ;;  %v2153_v11 = vld [vmem:[%s2706_s1 + $0x3d8] sm:$0xff]  }
  0x50   :  { %1904 = vmatprep.subr.bf16.mxu1 %v2088_v14  ;;  %v2156_v14 = vld [vmem:[%s2706_s1 + $0x3e0] sm:$0xff]  }
  0x51   :  { %1969 = vmatpush3.bf16.msra.mxu0 %v2109_v33 }
  0x52   :  { %1970 = vmatprep.subr.bf16.mxu0 %v2112_v36 }
  0x53   :  { %1905 = vmatpush3.bf16.msra.mxu1 %v2089_v15  ;;  %v2155_v15 = vld [vmem:[%s2706_s1 + $0x438] sm:$0xff]  }
  0x54   :  { %1906 = vmatprep.subr.bf16.mxu1 %v2095_v20  ;;  %v2162_v20 = vld [vmem:[%s2706_s1 + $0x3f0] sm:$0xff]  }
  0x55   :  { %1971 = vmatpush3.bf16.msra.mxu0 %v2113_v37 }
  0x56   :  { %1972 = vmatprep.subr.bf16.mxu0 %v2116_v40 }
  0x57   :  { %1907 = vmatpush3.bf16.msra.mxu1 %v2096_v21  ;;  %v2161_v21 = vld [vmem:[%s2706_s1 + $0x448] sm:$0xff]  }
  0x58   :  { %1908 = vmatprep.subr.bf16.mxu1 %v2099_v24  ;;  %v2171_v24 = vld [vmem:[%s2707_s0 + $0x44] ss:$72 sps:$4 sm:$0xff]  }
  0x59   :  { %1973 = vmatpush3.bf16.msra.mxu0 %v2117_v41 }
  0x5a   :  { %1974 = vmatprep.subr.bf16.mxu0 %v2120_v44 }
  0x5b   :  { %1909 = vmatpush3.bf16.msra.mxu1 %v2100_v25  ;;  %v2165_v25 = vld [vmem:[%s2706_s1 + $0x3f8] sm:$0xff]  }
  0x5c   :  { %1910 = vmatprep.subr.bf16.mxu1 %v2103_v28  ;;  %v2170_v28 = vld [vmem:[%s2706_s1 + $0x458] sm:$0xff]  }
  0x5d   :  { %1975 = vmatpush3.bf16.msra.mxu0 %v2121_v45 }
  0x5e   :  { %1976 = vmatprep.subr.bf16.mxu0 %v2124_v48 }
  0x5f   :  { %1911 = vmatpush3.bf16.msra.mxu1 %v2104_v29  ;;  %v2167_v29 = vld [vmem:[%s2707_s0 + $0x38] ss:$72 sps:$4 sm:$0xff]  }
  0x60   :  { %1940 = vmatprep.subr.bf16.mxu1 %v2110_v34 }
  0x61   :  { %1977 = vmatpush3.bf16.msra.mxu0 %v2125_v49 }
  0x62   :  { %1405 = vmatmul.mubr.bf16.vlgmr.msra.gmra.mrb[8].mxu1 %v2106_v31  ;;  %1577 = vmatprep.subr.bf16.mxu0 %v2176_v54 }
  0x63   :  { %1941 = vmatpush3.bf16.msra.mxu1 %v2111_v35  ;;  %1486 = vmatprep.mubr.bf16.mxu1 %v2142_v1 }
  0x64   :  { %1942 = vmatprep.subr.bf16.mxu1 %v2114_v38  ;;  %1528 = vmatmul.mubr.bf16.vlgmr.msra.gmra.mrb[8].mxu0 %v2128_v52 }
  0x65   :  { %1578 = vmatpush1.bf16.msra.mxu0 %v2131_v55  ;;  %1828 = vmatprep.mubr.msk.bf16.mxu0 %vm1245_vm0, %v2171_v24 }
  0x66   :  { %1579 = vmatprep.subr.bf16.mxu0 %v2176_v54 }
  0x67   :  { %1943 = vmatpush3.bf16.msra.mxu1 %v2115_v39 }
  0x68   :  { %1944 = vmatprep.subr.bf16.mxu1 %v2118_v42 }
  0x69   :  { %1580 = vmatpush1.bf16.msra.mxu0 %v2134_v58 }
  0x6a   :  { %1581 = vmatprep.subr.bf16.mxu0 %v2176_v54 }
  0x6b   :  { %1945 = vmatpush3.bf16.msra.mxu1 %v2119_v43 }
  0x6c   :  { %1946 = vmatprep.subr.bf16.mxu1 %v2122_v46 }
  0x6d   :  { %1582 = vmatpush1.bf16.msra.mxu0 %v2137_v61 }
  0x6e   :  { %1583 = vmatprep.subr.bf16.mxu0 %v2176_v54 }
  0x6f   :  { %1947 = vmatpush3.bf16.msra.mxu1 %v2123_v47 }
  0x70   :  { %1948 = vmatprep.subr.bf16.mxu1 %v2126_v50 }
  0x71   :  { %1584 = vmatpush1.bf16.msra.mxu0 %v2143_v2 }
  0x72   :  { %1585 = vmatprep.subr.bf16.mxu0 %v2176_v54 }
  0x73   :  { %1949 = vmatpush3.bf16.msra.mxu1 %v2127_v51 }
  0x74   :  { %1950 = vmatprep.subr.bf16.mxu1 %v2132_v56 }
  0x75   :  { %1586 = vmatpush1.bf16.msra.mxu0 %v2146_v5 }
  0x76   :  { %1587 = vmatprep.subr.bf16.mxu0 %v2176_v54 }
  0x77   :  { %1951 = vmatpush3.bf16.msra.mxu1 %v2133_v57 }
  0x78   :  { %1952 = vmatprep.subr.bf16.mxu1 %v2135_v59 }
  0x79   :  { %1588 = vmatpush1.bf16.msra.mxu0 %v2149_v9 }
  0x7a   :  { %1589 = vmatprep.subr.bf16.mxu0 %v2176_v54 }
  0x7b   :  { %1953 = vmatpush3.bf16.msra.mxu1 %v2136_v60 }
  0x7c   :  { %1954 = vmatprep.subr.bf16.mxu1 %v2138_v62 }
  0x7d   :  { %1590 = vmatpush1.bf16.msra.mxu0 %v2152_v12 }
  0x7e   :  { %1591 = vmatprep.subr.bf16.mxu0 %v2176_v54 }
  0x7f   :  { %1955 = vmatpush3.bf16.msra.mxu1 %v2139_v63 }
  0x80   :  { %1984 = vmatprep.subr.bf16.mxu1 %v2144_v3 }
  0x81   :  { %1592 = vmatpush1.bf16.msra.mxu0 %v2155_v15 }
  0x82   :  { %1487 = vmatmul.mubr.bf16.vlgmr.msra.gmra.mrb[12].mxu1 %v2140_v0  ;;  %1593 = vmatprep.subr.bf16.mxu0 %v2176_v54 }
  0x83   :  { %1985 = vmatpush3.bf16.msra.mxu1 %v2145_v4  ;;  %1568 = vmatprep.mubr.bf16.mxu1 %v2169_v22 }
  0x84   :  { %1986 = vmatprep.subr.bf16.mxu1 %v2147_v6 }
  0x85   :  { %1594 = vmatpush1.bf16.msra.mxu0 %v2158_v18 }
  0x86   :  { %1595 = vmatprep.subr.bf16.mxu0 %v2176_v54 }
  0x87   :  { %1987 = vmatpush3.bf16.msra.mxu1 %v2148_v7 }
  0x88   :  { %1988 = vmatprep.subr.bf16.mxu1 %v2150_v8 }
  0x89   :  { %1596 = vmatpush1.bf16.msra.mxu0 %v2161_v21 }
  0x8a   :  { %1597 = vmatprep.subr.bf16.mxu0 %v2176_v54 }
  0x8b   :  { %1989 = vmatpush3.bf16.msra.mxu1 %v2151_v10 }
  0x8c   :  { %1990 = vmatprep.subr.bf16.mxu1 %v2153_v11 }
  0x8d   :  { %1598 = vmatpush1.bf16.msra.mxu0 %v2164_v26 }
  0x8e   :  { %1599 = vmatprep.subr.bf16.mxu0 %v2176_v54 }
  0x8f   :  { %1991 = vmatpush3.bf16.msra.mxu1 %v2154_v13 }
  0x90   :  { %1992 = vmatprep.subr.bf16.mxu1 %v2156_v14 }
  0x91   :  { %1600 = vmatpush1.bf16.msra.mxu0 %v2170_v28 }
  0x93   :  { %1993 = vmatpush3.bf16.msra.mxu1 %v2157_v16 }
  0x94   :  { %1994 = vmatprep.subr.bf16.mxu1 %v2159_v17  ;;  %1610 = vmatmul.mubr.bf16.vlgmr.msra.gmra.mrb[12].mxu0 %v2173_v30 }
  0x97   :  { %1995 = vmatpush3.bf16.msra.mxu1 %v2160_v19 }
  0x98   :  { %1996 = vmatprep.subr.bf16.mxu1 %v2162_v20 }
  0x9b   :  { %1997 = vmatpush3.bf16.msra.mxu1 %v2163_v23 }
  0x9c   :  { %1998 = vmatprep.subr.bf16.mxu1 %v2165_v25 }
  0x9f   :  { %1999 = vmatpush3.bf16.msra.mxu1 %v2166_v27 }
  0xa2   :  { %1569 = vmatmul.mubr.bf16.vlgmr.msra.gmra.mrb[16].mxu1 %v2167_v29 }
  0xf5   :  { %v1846_v31 = vpop.f32.mrb[0].mxu1 }
  0xf6   :  { %v1847_v32 = vpop.f32.mrb[1].mxu1 }
  0xf7   :  { %v1848_v33 = vadd.f32 %v1847_v32, %v1846_v31  ;;  %v1849_v34 = vpop.f32.mrb[2].mxu1  ;;  %v1890_v37 = vpop.f32.mrb[0].mxu0 }
  0xf8   :  { %v1850_v35 = vpop.f32.mrb[3].mxu1  ;;  %v1891_v38 = vpop.f32.mrb[1].mxu0 }
  0xf9   :  { %v1851_v36 = vadd.f32 %v1850_v35, %v1849_v34  ;;  %v1892_v39 = vadd.f32 %v1891_v38, %v1890_v37  ;;  %v1893_v40 = vpop.f32.mrb[2].mxu0 }
  0xfa   :  { %v1894_v41 = vpop.f32.mrb[3].mxu0 }
  0xfb   :  { %v1895_v42 = vadd.f32 %v1894_v41, %v1893_v40 }
 0x115   :  { %v1868_v43 = vpop.f32.mrb[4].mxu1 }
 0x116   :  { %v1869_v44 = vpop.f32.mrb[5].mxu1 }
 0x117   :  { %v1870_v45 = vadd.f32 %v1869_v44, %v1868_v43  ;;  %v1871_v46 = vpop.f32.mrb[6].mxu1  ;;  %v1934_v53 = vpop.f32.mrb[4].mxu0 }
 0x118   :  { %v1872_v47 = vpop.f32.mrb[7].mxu1  ;;  %v1935_v54 = vpop.f32.mrb[5].mxu0 }
 0x119   :  { %v1325_v48 = vadd.f32 %v1870_v45, %v1848_v33  ;;  %v1873_v49 = vadd.f32 %v1872_v47, %v1871_v46  ;;  %v1936_v55 = vadd.f32 %v1935_v54, %v1934_v53  ;;  %v1937_v56 = vpop.f32.mrb[6].mxu0 }
 0x11a   :  { %v1938_v57 = vpop.f32.mrb[7].mxu0 }
 0x11b   :  { %v1328_v50 = vadd.f32 %v1873_v49, %v1851_v36  ;;  %v1366_v51 = vadd.f32 %v1892_v39, %v1325_v48  ;;  %v1939_v58 = vadd.f32 %v1938_v57, %v1937_v56 }
 0x11d   :  { %v1369_v52 = vadd.f32 %v1895_v42, %v1328_v50 }
 0x135   :  { %v1912_v59 = vpop.f32.mrb[8].mxu1 }
 0x136   :  { %v1913_v60 = vpop.f32.mrb[9].mxu1 }
 0x137   :  { %v1914_v61 = vadd.f32 %v1913_v60, %v1912_v59  ;;  %v1915_v62 = vpop.f32.mrb[10].mxu1  ;;  %v1978_v5 = vpop.f32.mrb[8].mxu0  ;;  %v1648_v60 = vlaneseq }
 0x138   :  { %v1916_v63 = vpop.f32.mrb[11].mxu1  ;;  %v1979_v6 = vpop.f32.mrb[9].mxu0 }
 0x139   :  { %v1407_v0 = vadd.f32 %v1914_v61, %v1366_v51  ;;  %v1917_v1 = vadd.f32 %v1916_v63, %v1915_v62  ;;  %v1980_v7 = vadd.f32 %v1979_v6, %v1978_v5  ;;  %v1981_v8 = vpop.f32.mrb[10].mxu0  ;;  %v1649_v61 = vshrl.u32 %v1648_v60, 7  ;;  %v1643_v62 = vld [vmem:[%s2708_s2] sm:$0x1] }
 0x13a   :  { %v1982_v9 = vpop.f32.mrb[11].mxu0 }
 0x13b   :  { %v1410_v2 = vadd.f32 %v1917_v1, %v1369_v52  ;;  %v1448_v3 = vadd.f32 %v1936_v55, %v1407_v0  ;;  %v1983_v10 = vadd.f32 %v1982_v9, %v1981_v8  ;;  %v1650_v63 = vsub.s32 0, %v1649_v61 }
 0x13d   :  { %v1451_v4 = vadd.f32 %v1939_v58, %v1410_v2 }
 0x155   :  { %v1956_v11 = vpop.f32.mrb[12].mxu1 }
 0x156   :  { %v1957_v12 = vpop.f32.mrb[13].mxu1 }
 0x157   :  { %v1958_v13 = vadd.f32 %v1957_v12, %v1956_v11  ;;  %v1959_v14 = vpop.f32.mrb[14].mxu1 }
 0x158   :  { %v1960_v15 = vpop.f32.mrb[15].mxu1 }
 0x159   :  { %v1489_v16 = vadd.f32 %v1958_v13, %v1448_v3  ;;  %v1961_v17 = vadd.f32 %v1960_v15, %v1959_v14  ;;  %v1829_v3 = vld [vmem:[%s2709_s3] ss:$0 sm:$0xff] }
 0x15b   :  { %v1492_v18 = vadd.f32 %v1961_v17, %v1451_v4  ;;  %v1530_v19 = vadd.f32 %v1980_v7, %v1489_v16 }
 0x15d   :  { %v1533_v20 = vadd.f32 %v1983_v10, %v1492_v18 }
 0x167   :  { %v1611_v25 = vpop.f32.mrb[12].mxu0 }
 0x168   :  { %v1613_v27 = vpop.f32.mrb[13].mxu0 }
 0x169   :  { %v1614_v30 = vpop.f32.mrb[14].mxu0 }
 0x16a   :  { %v1616_v31 = vpop.f32.mrb[15].mxu0 }
 0x175   :  { %v2000_v21 = vpop.f32.mrb[16].mxu1 }
 0x176   :  { %v2001_v22 = vpop.f32.mrb[17].mxu1 }
 0x177   :  { %v2002_v23 = vadd.f32 %v2001_v22, %v2000_v21  ;;  %v2003_v24 = vpop.f32.mrb[18].mxu1 }
 0x178   :  { %v2004_v26 = vpop.f32.mrb[19].mxu1 }
 0x179   :  { %v1571_v28 = vadd.f32 %v2002_v23, %v1530_v19  ;;  %v2005_v29 = vadd.f32 %v2004_v26, %v2003_v24 }
 0x17b   :  { %v1612_v32 = vadd.f32 %v1611_v25, %v1571_v28  ;;  %v1574_v33 = vadd.f32 %v2005_v29, %v1533_v20 }
 0x17d   :  { %v1615_v34 = vadd.f32 %v1614_v30, %v1574_v33  ;;  %v1619_v35 = vsel %vm1618_vm1, %v1612_v32, 0.0 }
 0x17f   :  { %v1620_v36 = vsel %vm1618_vm1, %v1615_v34, 0.0 }
 0x180   :  { %v1621_v37 = vadd.f32 %v1620_v36, %v1619_v35 }
 0x182   :  { %v1622_v38 = vrot.slane %v1621_v37, 4 }
 0x184   :  { %v1623_v39 = vadd.f32 %v1622_v38, %v1621_v37 }
 0x186   :  { %v1624_v40 = vrot.slane %v1623_v39, 2 }
 0x188   :  { %v1625_v41 = vadd.f32 %v1624_v40, %v1623_v39 }
 0x18a   :  { %v1626_v42 = vrot.slane %v1625_v41, 1 }
 0x18c   :  { %v1627_v43 = vadd.f32 %v1626_v42, %v1625_v41 }
 0x18e   :  { %v1628_v44 = vmul.f32 0.0625, %v1627_v43 }
 0x190   :  { %v1629_v45 = vsub.f32 %v1612_v32, %v1628_v44  ;;  %v1630_v46 = vsub.f32 %v1615_v34, %v1628_v44 }
 0x192   :  { %v1631_v47 = vmul.f32 %v1629_v45, %v1629_v45  ;;  %v1632_v48 = vmul.f32 %v1630_v46, %v1630_v46 }
 0x194   :  { %v1633_v49 = vsel %vm1618_vm1, %v1631_v47, 0.0  ;;  %v1634_v50 = vsel %vm1618_vm1, %v1632_v48, 0.0 }
 0x195   :  { %v1635_v51 = vadd.f32 %v1634_v50, %v1633_v49 }
 0x197   :  { %v1636_v52 = vrot.slane %v1635_v51, 4 }
 0x199   :  { %v1637_v53 = vadd.f32 %v1636_v52, %v1635_v51 }
 0x19b   :  { %v1638_v54 = vrot.slane %v1637_v53, 2 }
 0x19d   :  { %v1639_v55 = vadd.f32 %v1638_v54, %v1637_v53 }
 0x19f   :  { %v1640_v56 = vrot.slane %v1639_v55, 1 }
 0x1a1   :  { %v1641_v57 = vadd.f32 %v1640_v56, %v1639_v55 }
 0x1a3   :  { %v1642_v58 = vmul.f32 0.0625, %v1641_v57 }
 0x1a5   :  { %v1644_v59 = vadd.f32 1e-05, %v1642_v58 }
 0x1a7   :  { %2174 = vrsqrt.f32 %v1644_v59 }
 0x1b1   :  { %v2175_v0 = vpop.eup %2174 }
 0x1b2   :  { %v1646_v1 = vmul.f32 %v2175_v0, %v1643_v62 }
 0x1b4   :  { %v1651_v2 = vrot.slane %v1646_v1, %v1650_v63 }
 0x1b6   :  { %v1653_v4 = vmul.f32 %v1651_v2, %v1629_v45  ;;  %v1654_v5 = vmul.f32 %v1651_v2, %v1630_v46 }
 0x1b8   :  { %v1662_v6 = vadd.f32 %v1829_v3, %v1653_v4  ;;  %v1663_v7 = vadd.f32 %v1829_v3, %v1654_v5 }
 0x1ba   :  { %1664 = vst.msk [vmem:[%s2710_s4] sm:$0xff] %vm1618_vm1, %v1662_v6  ;;  %1665 = vst.msk [vmem:[%s2710_s4 + $0x8] sm:$0xff] %vm1618_vm1, %v1663_v7 }

</bundles_post_ra>
